<compile_context>
chip_gen: v6e
topology: v6e:2x2x1
jax: 0.10.0
libtpu: 0.0.40
codegen_flags: <defaults>
</compile_context>

<pallas_src>
import functools

import numpy as np

import jax
import jax.numpy as jnp
from jax.experimental import pallas as pl
from jax.experimental.pallas import tpu as pltpu

# ----------------------- solver / model configuration -----------------------
METHOD = "Euler"
T0, T1, STEP_H = 0.0, 1.0, 0.25
N_STEPS = int(round((T1 - T0) / STEP_H))

# small synthetic shapes
BATCH, CH, HEIGHT, WIDTH = 2, 4, 16, 16
CIN = CH + 1  # ConcatConv2d: +1 channel carrying t

# 3x3 conv taps, (dh, dw) with dh/dw in {0,1,2}; offset = (dh-1, dw-1).
_TAPS = tuple((dh, dw) for dh in range(3) for dw in range(3))


def _make_tap_masks(H, W):
    """masks[k, i*W+j] = 1 if source pixel (i+dh-1, j+dw-1) is inside the
    image for tap k, else 0 (i.e. the zero-padding indicator)."""
    masks = np.zeros((len(_TAPS), H * W), np.float32)
    for k, (dh, dw) in enumerate(_TAPS):
        valid = np.zeros((H, W), np.float32)
        i0, i1 = max(0, 1 - dh), min(H, H + 1 - dh)
        j0, j1 = max(0, 1 - dw), min(W, W + 1 - dw)
        valid[i0:i1, j0:j1] = 1.0
        masks[k] = valid.reshape(-1)
    return masks


# ------------------------------ fused Pallas kernel ------------------------------
def _ode_fused_kernel(x_ref, wd1_ref, b1_ref, tm1_ref,
                      wd2_ref, b2_ref, tm2_ref, mask_ref, o_ref,
                      *, width, n_steps, t0, dt):
    """Whole Euler ODE solve for one batch element.

    Layout: spatial is flattened onto the 128-lane axis.
      x_ref:   (1, C, H*W)   state x (NCHW flattened), float32
      wd*_ref: (9, C, C)     data-channel weights, wd[k][co, c] = w[dh,dw,1+c,co]
      b*_ref:  (C, 1)        bias column
      tm*_ref: (C, H*W)      t-channel map: sum_k w[dh,dw,0,co] * mask_k[p]
      mask_ref:(9, H*W)      zero-padding validity masks per tap
      o_ref:   (1, C, H*W)   output state
    """
    C, HW = x_ref.shape[1], x_ref.shape[2]

    x = x_ref[0]                 # (C, HW)
    masks = mask_ref[...]        # (9, HW)
    b1, b2 = b1_ref[...], b2_ref[...]     # (C, 1)
    tm1, tm2 = tm1_ref[...], tm2_ref[...]  # (C, HW)

    def conv3x3(z, wd_ref, base):
        # 3x3 'same' conv over the data channels of z (C, HW), plus `base`
        # (bias + t-channel contribution). Shifts via pltpu.roll on the lane
        # axis; padding handled by the precomputed masks.
        acc = base
        for k, (dh, dw) in enumerate(_TAPS):
            d = (dh - 1) * width + (dw - 1)        # flat source offset
            shift = (-d) % HW                      # roll(z, -d)[p] = z[p + d]
            zk = pltpu.roll(z, shift, axis=1) if shift else z
            zk = zk * masks[k:k + 1, :]            # zero the padded border
            acc = acc + jnp.dot(wd_ref[k], zk,     # (C,C) @ (C,HW) on MXU
                                preferred_element_type=jnp.float32)
        return acc

    # Fixed-step forward Euler, fully unrolled (N_STEPS = 4).
    for step in range(n_steps):
        t = jnp.float32(t0 + step * dt)
        h1 = conv3x3(jnp.maximum(x, 0.0), wd1_ref, b1 + t * tm1)
        h1 = jnp.maximum(h1, 0.0)
        f = conv3x3(h1, wd2_ref, b2 + t * tm2)
        x = x + jnp.float32(dt) * f

    o_ref[0] = x


# --------------------------------- ODE block ---------------------------------
def make_params(key, ch):
    """Deterministic parameter init for the synthetic ConcatConv odefunc."""
    k1, k2, k3, k4 = jax.random.split(key, 4)
    cin = ch + 1
    scale = 0.1
    w1 = scale * jax.random.normal(k1, (3, 3, cin, ch), jnp.float32)
    b1 = scale * jax.random.normal(k2, (1, ch), jnp.float32)
    w2 = scale * jax.random.normal(k3, (3, 3, cin, ch), jnp.float32)
    b2 = scale * jax.random.normal(k4, (1, ch), jnp.float32)
    return {"w1": w1, "b1": b1, "w2": w2, "b2": b2}


def ode_block_forward(x_nchw, params):
    """Forward pass of ODEBlock: fixed-step Euler odesolve of the ConcatConv
    odefunc, input/output in PyTorch NCHW layout. One fused pallas_call."""
    N, C, H, W = x_nchw.shape
    HW = H * W
    x3 = x_nchw.reshape(N, C, HW).astype(jnp.float32)   # pure reshape, no transpose

    # Trace-time constants / tiny weight re-layouts (done once under jit).
    masks = jnp.asarray(_make_tap_masks(H, W))           # (9, HW)
    hp = jax.lax.Precision.HIGHEST
    w1, w2 = params["w1"], params["w2"]                  # (3,3,C+1,C)
    b1 = params["b1"].reshape(-1, 1).astype(jnp.float32)  # (C,1)
    b2 = params["b2"].reshape(-1, 1).astype(jnp.float32)
    wd1 = jnp.transpose(w1[:, :, 1:, :].reshape(9, C, C), (0, 2, 1))  # (9,Cout,C)
    wd2 = jnp.transpose(w2[:, :, 1:, :].reshape(9, C, C), (0, 2, 1))
    tm1 = jnp.dot(w1[:, :, 0, :].reshape(9, C).T, masks, precision=hp)  # (C,HW)
    tm2 = jnp.dot(w2[:, :, 0, :].reshape(9, C).T, masks, precision=hp)

    kern = functools.partial(_ode_fused_kernel, width=W,
                             n_steps=N_STEPS, t0=T0, dt=STEP_H)
    out3 = pl.pallas_call(
        kern,
        out_shape=jax.ShapeDtypeStruct((N, C, HW), jnp.float32),
        grid=(N,),
        in_specs=[
            pl.BlockSpec((1, C, HW), lambda n: (n, 0, 0)),  # x (per batch elem)
            pl.BlockSpec((9, C, C), lambda n: (0, 0, 0)),   # wd1 (resident)
            pl.BlockSpec((C, 1), lambda n: (0, 0)),         # b1
            pl.BlockSpec((C, HW), lambda n: (0, 0)),        # tm1
            pl.BlockSpec((9, C, C), lambda n: (0, 0, 0)),   # wd2
            pl.BlockSpec((C, 1), lambda n: (0, 0)),         # b2
            pl.BlockSpec((C, HW), lambda n: (0, 0)),        # tm2
            pl.BlockSpec((9, HW), lambda n: (0, 0)),        # masks
        ],
        out_specs=pl.BlockSpec((1, C, HW), lambda n: (n, 0, 0)),
        compiler_params=pltpu.CompilerParams(
            dimension_semantics=("parallel",)),              # 1 elem / TC on v7x
    )(x3, wd1, b1, tm1, wd2, b2, tm2, masks)

    return out3.reshape(N, C, H, W)


# ------------------------------ pure-JAX reference ------------------------------
def _ref_forward(x_nchw, params):
    """Reference implementation (XLA conv) of the same fixed-step Euler solve."""
    x = x_nchw.astype(jnp.float32)
    N, C, H, W = x.shape

    def conv(z, w, b):
        out = jax.lax.conv_general_dilated(
            z, w, window_strides=(1, 1), padding="SAME",
            dimension_numbers=("NCHW", "HWIO", "NCHW"),
            precision=jax.lax.Precision.HIGHEST)
        return out + b.reshape(1, -1, 1, 1)

    for n in range(N_STEPS):
        t = T0 + n * STEP_H
        tpl = jnp.full((N, 1, H, W), t, jnp.float32)
        z1 = jnp.concatenate([tpl, jnp.maximum(x, 0.0)], axis=1)
        h1 = jnp.maximum(conv(z1, params["w1"], params["b1"]), 0.0)
        z2 = jnp.concatenate([tpl, h1], axis=1)
        x = x + STEP_H * conv(z2, params["w2"], params["b2"])
    return x


# ------------------------------------ main ------------------------------------
if __name__ == "__main__":
    key = jax.random.PRNGKey(0)
    kx, kp = jax.random.split(key)
    x = jax.random.normal(kx, (BATCH, CH, HEIGHT, WIDTH), jnp.float32)  # NCHW
    params = make_params(kp, CH)

    out = jax.block_until_ready(jax.jit(ode_block_forward)(x, params))
    assert out.shape == (BATCH, CH, HEIGHT, WIDTH)
    assert out.dtype == jnp.float32

    ref = jax.block_until_ready(jax.jit(_ref_forward)(x, params))
    err = float(jnp.max(jnp.abs(out - ref)))
    assert err < 1e-3, f"mismatch vs reference: max|diff|={err}"

    print("KERNEL_OK")
</pallas_src>

<mosaic_0001>
module attributes {stable_mosaic.version = 11 : i64} {
  func.func @_ode_fused_kernel(%arg0: i32, %arg1: memref<1x4x256xf32, #tpu.memory_space<vmem>>, %arg2: memref<9x4x4xf32, #tpu.memory_space<vmem>>, %arg3: memref<4x1xf32, #tpu.memory_space<vmem>>, %arg4: memref<4x256xf32, #tpu.memory_space<vmem>>, %arg5: memref<9x4x4xf32, #tpu.memory_space<vmem>>, %arg6: memref<4x1xf32, #tpu.memory_space<vmem>>, %arg7: memref<4x256xf32, #tpu.memory_space<vmem>>, %arg8: memref<9x256xf32, #tpu.memory_space<vmem>>, %arg9: memref<1x4x256xf32, #tpu.memory_space<vmem>>) attributes {dimension_semantics = [#tpu.dimension_semantics<parallel>], iteration_bounds = array<i64: 2>, scalar_prefetch = 0 : i64, scratch_operands = 0 : i64, tpu.core_type = #tpu.core_type<tc>, window_params = [{transform_indices = @transform_0, window_bounds = array<i64: 1, 4, 256>}, {pipeline_mode = #tpu.pipeline_mode<synchronous>, transform_indices = @transform_1, window_bounds = array<i64: 9, 4, 4>}, {pipeline_mode = #tpu.pipeline_mode<synchronous>, transform_indices = @transform_2, window_bounds = array<i64: 4, 1>}, {pipeline_mode = #tpu.pipeline_mode<synchronous>, transform_indices = @transform_3, window_bounds = array<i64: 4, 256>}, {pipeline_mode = #tpu.pipeline_mode<synchronous>, transform_indices = @transform_4, window_bounds = array<i64: 9, 4, 4>}, {pipeline_mode = #tpu.pipeline_mode<synchronous>, transform_indices = @transform_5, window_bounds = array<i64: 4, 1>}, {pipeline_mode = #tpu.pipeline_mode<synchronous>, transform_indices = @transform_6, window_bounds = array<i64: 4, 256>}, {pipeline_mode = #tpu.pipeline_mode<synchronous>, transform_indices = @transform_7, window_bounds = array<i64: 9, 256>}, {transform_indices = @transform_8, window_bounds = array<i64: 1, 4, 256>}]} {
    %c0 = arith.constant 0 : index
    %c0_0 = arith.constant 0 : index
    %c0_1 = arith.constant 0 : index
    %0 = vector.load %arg1[%c0, %c0_0, %c0_1] : memref<1x4x256xf32, #tpu.memory_space<vmem>>, vector<1x4x256xf32>
    %1 = vector.shape_cast %0 : vector<1x4x256xf32> to vector<4x256xf32>
    %c0_2 = arith.constant 0 : index
    %c0_3 = arith.constant 0 : index
    %2 = vector.load %arg8[%c0_2, %c0_3] : memref<9x256xf32, #tpu.memory_space<vmem>>, vector<9x256xf32>
    %c0_4 = arith.constant 0 : index
    %c0_5 = arith.constant 0 : index
    %3 = vector.load %arg3[%c0_4, %c0_5] : memref<4x1xf32, #tpu.memory_space<vmem>>, vector<4x1xf32>
    %c0_6 = arith.constant 0 : index
    %c0_7 = arith.constant 0 : index
    %4 = vector.load %arg6[%c0_6, %c0_7] : memref<4x1xf32, #tpu.memory_space<vmem>>, vector<4x1xf32>
    %c0_8 = arith.constant 0 : index
    %c0_9 = arith.constant 0 : index
    %5 = vector.load %arg4[%c0_8, %c0_9] : memref<4x256xf32, #tpu.memory_space<vmem>>, vector<4x256xf32>
    %c0_10 = arith.constant 0 : index
    %c0_11 = arith.constant 0 : index
    %6 = vector.load %arg7[%c0_10, %c0_11] : memref<4x256xf32, #tpu.memory_space<vmem>>, vector<4x256xf32>
    %cst = arith.constant 0.000000e+00 : f32
    %7 = vector.broadcast %cst : f32 to vector<4x256xf32>
    %8 = arith.maximumf %1, %7 : vector<4x256xf32>
    %cst_12 = arith.constant 0.000000e+00 : f32
    %9 = vector.broadcast %cst_12 : f32 to vector<4x256xf32>
    %10 = arith.mulf %9, %5 : vector<4x256xf32>
    %11 = vector.broadcast %3 : vector<4x1xf32> to vector<4x256xf32>
    %12 = arith.addf %11, %10 : vector<4x256xf32>
    %c17_i32 = arith.constant 17 : i32
    %13 = tpu.dynamic_rotate %8 by %c17_i32 dim 1 : vector<4x256xf32>, i32 -> vector<4x256xf32>
    %14 = vector.extract_strided_slice %2 {offsets = [0, 0], sizes = [1, 256], strides = [1, 1]} : vector<9x256xf32> to vector<1x256xf32>
    %15 = vector.broadcast %14 : vector<1x256xf32> to vector<4x256xf32>
    %16 = arith.mulf %13, %15 : vector<4x256xf32>
    %c0_13 = arith.constant 0 : index
    %c0_14 = arith.constant 0 : index
    %c0_15 = arith.constant 0 : index
    %17 = vector.load %arg2[%c0_13, %c0_14, %c0_15] : memref<9x4x4xf32, #tpu.memory_space<vmem>>, vector<1x4x4xf32>
    %18 = vector.shape_cast %17 : vector<1x4x4xf32> to vector<4x4xf32>
    %cst_16 = arith.constant dense<0.000000e+00> : vector<4x256xf32>
    %19 = tpu.matmul %18, %16, %cst_16 {dimension_numbers = #tpu.dot_dimension_numbers<[1], [0], [0], [1], [0, 0, 1, 1], [], []>} : vector<4x4xf32>, vector<4x256xf32>, vector<4x256xf32> -> vector<4x256xf32>
    %20 = arith.addf %12, %19 : vector<4x256xf32>
    %c16_i32 = arith.constant 16 : i32
    %21 = tpu.dynamic_rotate %8 by %c16_i32 dim 1 : vector<4x256xf32>, i32 -> vector<4x256xf32>
    %22 = vector.extract_strided_slice %2 {offsets = [1, 0], sizes = [1, 256], strides = [1, 1]} : vector<9x256xf32> to vector<1x256xf32>
    %23 = vector.broadcast %22 : vector<1x256xf32> to vector<4x256xf32>
    %24 = arith.mulf %21, %23 : vector<4x256xf32>
    %c1 = arith.constant 1 : index
    %c0_17 = arith.constant 0 : index
    %c0_18 = arith.constant 0 : index
    %25 = vector.load %arg2[%c1, %c0_17, %c0_18] : memref<9x4x4xf32, #tpu.memory_space<vmem>>, vector<1x4x4xf32>
    %26 = vector.shape_cast %25 : vector<1x4x4xf32> to vector<4x4xf32>
    %cst_19 = arith.constant dense<0.000000e+00> : vector<4x256xf32>
    %27 = tpu.matmul %26, %24, %cst_19 {dimension_numbers = #tpu.dot_dimension_numbers<[1], [0], [0], [1], [0, 0, 1, 1], [], []>} : vector<4x4xf32>, vector<4x256xf32>, vector<4x256xf32> -> vector<4x256xf32>
    %28 = arith.addf %20, %27 : vector<4x256xf32>
    %c15_i32 = arith.constant 15 : i32
    %29 = tpu.dynamic_rotate %8 by %c15_i32 dim 1 : vector<4x256xf32>, i32 -> vector<4x256xf32>
    %30 = vector.extract_strided_slice %2 {offsets = [2, 0], sizes = [1, 256], strides = [1, 1]} : vector<9x256xf32> to vector<1x256xf32>
    %31 = vector.broadcast %30 : vector<1x256xf32> to vector<4x256xf32>
    %32 = arith.mulf %29, %31 : vector<4x256xf32>
    %c2 = arith.constant 2 : index
    %c0_20 = arith.constant 0 : index
    %c0_21 = arith.constant 0 : index
    %33 = vector.load %arg2[%c2, %c0_20, %c0_21] : memref<9x4x4xf32, #tpu.memory_space<vmem>>, vector<1x4x4xf32>
    %34 = vector.shape_cast %33 : vector<1x4x4xf32> to vector<4x4xf32>
    %cst_22 = arith.constant dense<0.000000e+00> : vector<4x256xf32>
    %35 = tpu.matmul %34, %32, %cst_22 {dimension_numbers = #tpu.dot_dimension_numbers<[1], [0], [0], [1], [0, 0, 1, 1], [], []>} : vector<4x4xf32>, vector<4x256xf32>, vector<4x256xf32> -> vector<4x256xf32>
    %36 = arith.addf %28, %35 : vector<4x256xf32>
    %c1_i32 = arith.constant 1 : i32
    %37 = tpu.dynamic_rotate %8 by %c1_i32 dim 1 : vector<4x256xf32>, i32 -> vector<4x256xf32>
    %38 = vector.extract_strided_slice %2 {offsets = [3, 0], sizes = [1, 256], strides = [1, 1]} : vector<9x256xf32> to vector<1x256xf32>
    %39 = vector.broadcast %38 : vector<1x256xf32> to vector<4x256xf32>
    %40 = arith.mulf %37, %39 : vector<4x256xf32>
    %c3 = arith.constant 3 : index
    %c0_23 = arith.constant 0 : index
    %c0_24 = arith.constant 0 : index
    %41 = vector.load %arg2[%c3, %c0_23, %c0_24] : memref<9x4x4xf32, #tpu.memory_space<vmem>>, vector<1x4x4xf32>
    %42 = vector.shape_cast %41 : vector<1x4x4xf32> to vector<4x4xf32>
    %cst_25 = arith.constant dense<0.000000e+00> : vector<4x256xf32>
    %43 = tpu.matmul %42, %40, %cst_25 {dimension_numbers = #tpu.dot_dimension_numbers<[1], [0], [0], [1], [0, 0, 1, 1], [], []>} : vector<4x4xf32>, vector<4x256xf32>, vector<4x256xf32> -> vector<4x256xf32>
    %44 = arith.addf %36, %43 : vector<4x256xf32>
    %45 = vector.extract_strided_slice %2 {offsets = [4, 0], sizes = [1, 256], strides = [1, 1]} : vector<9x256xf32> to vector<1x256xf32>
    %46 = vector.broadcast %45 : vector<1x256xf32> to vector<4x256xf32>
    %47 = arith.mulf %8, %46 : vector<4x256xf32>
    %c4 = arith.constant 4 : index
    %c0_26 = arith.constant 0 : index
    %c0_27 = arith.constant 0 : index
    %48 = vector.load %arg2[%c4, %c0_26, %c0_27] : memref<9x4x4xf32, #tpu.memory_space<vmem>>, vector<1x4x4xf32>
    %49 = vector.shape_cast %48 : vector<1x4x4xf32> to vector<4x4xf32>
    %cst_28 = arith.constant dense<0.000000e+00> : vector<4x256xf32>
    %50 = tpu.matmul %49, %47, %cst_28 {dimension_numbers = #tpu.dot_dimension_numbers<[1], [0], [0], [1], [0, 0, 1, 1], [], []>} : vector<4x4xf32>, vector<4x256xf32>, vector<4x256xf32> -> vector<4x256xf32>
    %51 = arith.addf %44, %50 : vector<4x256xf32>
    %c255_i32 = arith.constant 255 : i32
    %52 = tpu.dynamic_rotate %8 by %c255_i32 dim 1 : vector<4x256xf32>, i32 -> vector<4x256xf32>
    %53 = vector.extract_strided_slice %2 {offsets = [5, 0], sizes = [1, 256], strides = [1, 1]} : vector<9x256xf32> to vector<1x256xf32>
    %54 = vector.broadcast %53 : vector<1x256xf32> to vector<4x256xf32>
    %55 = arith.mulf %52, %54 : vector<4x256xf32>
    %c5 = arith.constant 5 : index
    %c0_29 = arith.constant 0 : index
    %c0_30 = arith.constant 0 : index
    %56 = vector.load %arg2[%c5, %c0_29, %c0_30] : memref<9x4x4xf32, #tpu.memory_space<vmem>>, vector<1x4x4xf32>
    %57 = vector.shape_cast %56 : vector<1x4x4xf32> to vector<4x4xf32>
    %cst_31 = arith.constant dense<0.000000e+00> : vector<4x256xf32>
    %58 = tpu.matmul %57, %55, %cst_31 {dimension_numbers = #tpu.dot_dimension_numbers<[1], [0], [0], [1], [0, 0, 1, 1], [], []>} : vector<4x4xf32>, vector<4x256xf32>, vector<4x256xf32> -> vector<4x256xf32>
    %59 = arith.addf %51, %58 : vector<4x256xf32>
    %c241_i32 = arith.constant 241 : i32
    %60 = tpu.dynamic_rotate %8 by %c241_i32 dim 1 : vector<4x256xf32>, i32 -> vector<4x256xf32>
    %61 = vector.extract_strided_slice %2 {offsets = [6, 0], sizes = [1, 256], strides = [1, 1]} : vector<9x256xf32> to vector<1x256xf32>
    %62 = vector.broadcast %61 : vector<1x256xf32> to vector<4x256xf32>
    %63 = arith.mulf %60, %62 : vector<4x256xf32>
    %c6 = arith.constant 6 : index
    %c0_32 = arith.constant 0 : index
    %c0_33 = arith.constant 0 : index
    %64 = vector.load %arg2[%c6, %c0_32, %c0_33] : memref<9x4x4xf32, #tpu.memory_space<vmem>>, vector<1x4x4xf32>
    %65 = vector.shape_cast %64 : vector<1x4x4xf32> to vector<4x4xf32>
    %cst_34 = arith.constant dense<0.000000e+00> : vector<4x256xf32>
    %66 = tpu.matmul %65, %63, %cst_34 {dimension_numbers = #tpu.dot_dimension_numbers<[1], [0], [0], [1], [0, 0, 1, 1], [], []>} : vector<4x4xf32>, vector<4x256xf32>, vector<4x256xf32> -> vector<4x256xf32>
    %67 = arith.addf %59, %66 : vector<4x256xf32>
    %c240_i32 = arith.constant 240 : i32
    %68 = tpu.dynamic_rotate %8 by %c240_i32 dim 1 : vector<4x256xf32>, i32 -> vector<4x256xf32>
    %69 = vector.extract_strided_slice %2 {offsets = [7, 0], sizes = [1, 256], strides = [1, 1]} : vector<9x256xf32> to vector<1x256xf32>
    %70 = vector.broadcast %69 : vector<1x256xf32> to vector<4x256xf32>
    %71 = arith.mulf %68, %70 : vector<4x256xf32>
    %c7 = arith.constant 7 : index
    %c0_35 = arith.constant 0 : index
    %c0_36 = arith.constant 0 : index
    %72 = vector.load %arg2[%c7, %c0_35, %c0_36] : memref<9x4x4xf32, #tpu.memory_space<vmem>>, vector<1x4x4xf32>
    %73 = vector.shape_cast %72 : vector<1x4x4xf32> to vector<4x4xf32>
    %cst_37 = arith.constant dense<0.000000e+00> : vector<4x256xf32>
    %74 = tpu.matmul %73, %71, %cst_37 {dimension_numbers = #tpu.dot_dimension_numbers<[1], [0], [0], [1], [0, 0, 1, 1], [], []>} : vector<4x4xf32>, vector<4x256xf32>, vector<4x256xf32> -> vector<4x256xf32>
    %75 = arith.addf %67, %74 : vector<4x256xf32>
    %c239_i32 = arith.constant 239 : i32
    %76 = tpu.dynamic_rotate %8 by %c239_i32 dim 1 : vector<4x256xf32>, i32 -> vector<4x256xf32>
    %77 = vector.extract_strided_slice %2 {offsets = [8, 0], sizes = [1, 256], strides = [1, 1]} : vector<9x256xf32> to vector<1x256xf32>
    %78 = vector.broadcast %77 : vector<1x256xf32> to vector<4x256xf32>
    %79 = arith.mulf %76, %78 : vector<4x256xf32>
    %c8 = arith.constant 8 : index
    %c0_38 = arith.constant 0 : index
    %c0_39 = arith.constant 0 : index
    %80 = vector.load %arg2[%c8, %c0_38, %c0_39] : memref<9x4x4xf32, #tpu.memory_space<vmem>>, vector<1x4x4xf32>
    %81 = vector.shape_cast %80 : vector<1x4x4xf32> to vector<4x4xf32>
    %cst_40 = arith.constant dense<0.000000e+00> : vector<4x256xf32>
    %82 = tpu.matmul %81, %79, %cst_40 {dimension_numbers = #tpu.dot_dimension_numbers<[1], [0], [0], [1], [0, 0, 1, 1], [], []>} : vector<4x4xf32>, vector<4x256xf32>, vector<4x256xf32> -> vector<4x256xf32>
    %83 = arith.addf %75, %82 : vector<4x256xf32>
    %cst_41 = arith.constant 0.000000e+00 : f32
    %84 = vector.broadcast %cst_41 : f32 to vector<4x256xf32>
    %85 = arith.maximumf %83, %84 : vector<4x256xf32>
    %cst_42 = arith.constant 0.000000e+00 : f32
    %86 = vector.broadcast %cst_42 : f32 to vector<4x256xf32>
    %87 = arith.mulf %86, %6 : vector<4x256xf32>
    %88 = vector.broadcast %4 : vector<4x1xf32> to vector<4x256xf32>
    %89 = arith.addf %88, %87 : vector<4x256xf32>
    %c17_i32_43 = arith.constant 17 : i32
    %90 = tpu.dynamic_rotate %85 by %c17_i32_43 dim 1 : vector<4x256xf32>, i32 -> vector<4x256xf32>
    %91 = vector.extract_strided_slice %2 {offsets = [0, 0], sizes = [1, 256], strides = [1, 1]} : vector<9x256xf32> to vector<1x256xf32>
    %92 = vector.broadcast %91 : vector<1x256xf32> to vector<4x256xf32>
    %93 = arith.mulf %90, %92 : vector<4x256xf32>
    %c0_44 = arith.constant 0 : index
    %c0_45 = arith.constant 0 : index
    %c0_46 = arith.constant 0 : index
    %94 = vector.load %arg5[%c0_44, %c0_45, %c0_46] : memref<9x4x4xf32, #tpu.memory_space<vmem>>, vector<1x4x4xf32>
    %95 = vector.shape_cast %94 : vector<1x4x4xf32> to vector<4x4xf32>
    %cst_47 = arith.constant dense<0.000000e+00> : vector<4x256xf32>
    %96 = tpu.matmul %95, %93, %cst_47 {dimension_numbers = #tpu.dot_dimension_numbers<[1], [0], [0], [1], [0, 0, 1, 1], [], []>} : vector<4x4xf32>, vector<4x256xf32>, vector<4x256xf32> -> vector<4x256xf32>
    %97 = arith.addf %89, %96 : vector<4x256xf32>
    %c16_i32_48 = arith.constant 16 : i32
    %98 = tpu.dynamic_rotate %85 by %c16_i32_48 dim 1 : vector<4x256xf32>, i32 -> vector<4x256xf32>
    %99 = vector.extract_strided_slice %2 {offsets = [1, 0], sizes = [1, 256], strides = [1, 1]} : vector<9x256xf32> to vector<1x256xf32>
    %100 = vector.broadcast %99 : vector<1x256xf32> to vector<4x256xf32>
    %101 = arith.mulf %98, %100 : vector<4x256xf32>
    %c1_49 = arith.constant 1 : index
    %c0_50 = arith.constant 0 : index
    %c0_51 = arith.constant 0 : index
    %102 = vector.load %arg5[%c1_49, %c0_50, %c0_51] : memref<9x4x4xf32, #tpu.memory_space<vmem>>, vector<1x4x4xf32>
    %103 = vector.shape_cast %102 : vector<1x4x4xf32> to vector<4x4xf32>
    %cst_52 = arith.constant dense<0.000000e+00> : vector<4x256xf32>
    %104 = tpu.matmul %103, %101, %cst_52 {dimension_numbers = #tpu.dot_dimension_numbers<[1], [0], [0], [1], [0, 0, 1, 1], [], []>} : vector<4x4xf32>, vector<4x256xf32>, vector<4x256xf32> -> vector<4x256xf32>
    %105 = arith.addf %97, %104 : vector<4x256xf32>
    %c15_i32_53 = arith.constant 15 : i32
    %106 = tpu.dynamic_rotate %85 by %c15_i32_53 dim 1 : vector<4x256xf32>, i32 -> vector<4x256xf32>
    %107 = vector.extract_strided_slice %2 {offsets = [2, 0], sizes = [1, 256], strides = [1, 1]} : vector<9x256xf32> to vector<1x256xf32>
    %108 = vector.broadcast %107 : vector<1x256xf32> to vector<4x256xf32>
    %109 = arith.mulf %106, %108 : vector<4x256xf32>
    %c2_54 = arith.constant 2 : index
    %c0_55 = arith.constant 0 : index
    %c0_56 = arith.constant 0 : index
    %110 = vector.load %arg5[%c2_54, %c0_55, %c0_56] : memref<9x4x4xf32, #tpu.memory_space<vmem>>, vector<1x4x4xf32>
    %111 = vector.shape_cast %110 : vector<1x4x4xf32> to vector<4x4xf32>
    %cst_57 = arith.constant dense<0.000000e+00> : vector<4x256xf32>
    %112 = tpu.matmul %111, %109, %cst_57 {dimension_numbers = #tpu.dot_dimension_numbers<[1], [0], [0], [1], [0, 0, 1, 1], [], []>} : vector<4x4xf32>, vector<4x256xf32>, vector<4x256xf32> -> vector<4x256xf32>
    %113 = arith.addf %105, %112 : vector<4x256xf32>
    %c1_i32_58 = arith.constant 1 : i32
    %114 = tpu.dynamic_rotate %85 by %c1_i32_58 dim 1 : vector<4x256xf32>, i32 -> vector<4x256xf32>
    %115 = vector.extract_strided_slice %2 {offsets = [3, 0], sizes = [1, 256], strides = [1, 1]} : vector<9x256xf32> to vector<1x256xf32>
    %116 = vector.broadcast %115 : vector<1x256xf32> to vector<4x256xf32>
    %117 = arith.mulf %114, %116 : vector<4x256xf32>
    %c3_59 = arith.constant 3 : index
    %c0_60 = arith.constant 0 : index
    %c0_61 = arith.constant 0 : index
    %118 = vector.load %arg5[%c3_59, %c0_60, %c0_61] : memref<9x4x4xf32, #tpu.memory_space<vmem>>, vector<1x4x4xf32>
    %119 = vector.shape_cast %118 : vector<1x4x4xf32> to vector<4x4xf32>
    %cst_62 = arith.constant dense<0.000000e+00> : vector<4x256xf32>
    %120 = tpu.matmul %119, %117, %cst_62 {dimension_numbers = #tpu.dot_dimension_numbers<[1], [0], [0], [1], [0, 0, 1, 1], [], []>} : vector<4x4xf32>, vector<4x256xf32>, vector<4x256xf32> -> vector<4x256xf32>
    %121 = arith.addf %113, %120 : vector<4x256xf32>
    %122 = vector.extract_strided_slice %2 {offsets = [4, 0], sizes = [1, 256], strides = [1, 1]} : vector<9x256xf32> to vector<1x256xf32>
    %123 = vector.broadcast %122 : vector<1x256xf32> to vector<4x256xf32>
    %124 = arith.mulf %85, %123 : vector<4x256xf32>
    %c4_63 = arith.constant 4 : index
    %c0_64 = arith.constant 0 : index
    %c0_65 = arith.constant 0 : index
    %125 = vector.load %arg5[%c4_63, %c0_64, %c0_65] : memref<9x4x4xf32, #tpu.memory_space<vmem>>, vector<1x4x4xf32>
    %126 = vector.shape_cast %125 : vector<1x4x4xf32> to vector<4x4xf32>
    %cst_66 = arith.constant dense<0.000000e+00> : vector<4x256xf32>
    %127 = tpu.matmul %126, %124, %cst_66 {dimension_numbers = #tpu.dot_dimension_numbers<[1], [0], [0], [1], [0, 0, 1, 1], [], []>} : vector<4x4xf32>, vector<4x256xf32>, vector<4x256xf32> -> vector<4x256xf32>
    %128 = arith.addf %121, %127 : vector<4x256xf32>
    %c255_i32_67 = arith.constant 255 : i32
    %129 = tpu.dynamic_rotate %85 by %c255_i32_67 dim 1 : vector<4x256xf32>, i32 -> vector<4x256xf32>
    %130 = vector.extract_strided_slice %2 {offsets = [5, 0], sizes = [1, 256], strides = [1, 1]} : vector<9x256xf32> to vector<1x256xf32>
    %131 = vector.broadcast %130 : vector<1x256xf32> to vector<4x256xf32>
    %132 = arith.mulf %129, %131 : vector<4x256xf32>
    %c5_68 = arith.constant 5 : index
    %c0_69 = arith.constant 0 : index
    %c0_70 = arith.constant 0 : index
    %133 = vector.load %arg5[%c5_68, %c0_69, %c0_70] : memref<9x4x4xf32, #tpu.memory_space<vmem>>, vector<1x4x4xf32>
    %134 = vector.shape_cast %133 : vector<1x4x4xf32> to vector<4x4xf32>
    %cst_71 = arith.constant dense<0.000000e+00> : vector<4x256xf32>
    %135 = tpu.matmul %134, %132, %cst_71 {dimension_numbers = #tpu.dot_dimension_numbers<[1], [0], [0], [1], [0, 0, 1, 1], [], []>} : vector<4x4xf32>, vector<4x256xf32>, vector<4x256xf32> -> vector<4x256xf32>
    %136 = arith.addf %128, %135 : vector<4x256xf32>
    %c241_i32_72 = arith.constant 241 : i32
    %137 = tpu.dynamic_rotate %85 by %c241_i32_72 dim 1 : vector<4x256xf32>, i32 -> vector<4x256xf32>
    %138 = vector.extract_strided_slice %2 {offsets = [6, 0], sizes = [1, 256], strides = [1, 1]} : vector<9x256xf32> to vector<1x256xf32>
    %139 = vector.broadcast %138 : vector<1x256xf32> to vector<4x256xf32>
    %140 = arith.mulf %137, %139 : vector<4x256xf32>
    %c6_73 = arith.constant 6 : index
    %c0_74 = arith.constant 0 : index
    %c0_75 = arith.constant 0 : index
    %141 = vector.load %arg5[%c6_73, %c0_74, %c0_75] : memref<9x4x4xf32, #tpu.memory_space<vmem>>, vector<1x4x4xf32>
    %142 = vector.shape_cast %141 : vector<1x4x4xf32> to vector<4x4xf32>
    %cst_76 = arith.constant dense<0.000000e+00> : vector<4x256xf32>
    %143 = tpu.matmul %142, %140, %cst_76 {dimension_numbers = #tpu.dot_dimension_numbers<[1], [0], [0], [1], [0, 0, 1, 1], [], []>} : vector<4x4xf32>, vector<4x256xf32>, vector<4x256xf32> -> vector<4x256xf32>
    %144 = arith.addf %136, %143 : vector<4x256xf32>
    %c240_i32_77 = arith.constant 240 : i32
    %145 = tpu.dynamic_rotate %85 by %c240_i32_77 dim 1 : vector<4x256xf32>, i32 -> vector<4x256xf32>
    %146 = vector.extract_strided_slice %2 {offsets = [7, 0], sizes = [1, 256], strides = [1, 1]} : vector<9x256xf32> to vector<1x256xf32>
    %147 = vector.broadcast %146 : vector<1x256xf32> to vector<4x256xf32>
    %148 = arith.mulf %145, %147 : vector<4x256xf32>
    %c7_78 = arith.constant 7 : index
    %c0_79 = arith.constant 0 : index
    %c0_80 = arith.constant 0 : index
    %149 = vector.load %arg5[%c7_78, %c0_79, %c0_80] : memref<9x4x4xf32, #tpu.memory_space<vmem>>, vector<1x4x4xf32>
    %150 = vector.shape_cast %149 : vector<1x4x4xf32> to vector<4x4xf32>
    %cst_81 = arith.constant dense<0.000000e+00> : vector<4x256xf32>
    %151 = tpu.matmul %150, %148, %cst_81 {dimension_numbers = #tpu.dot_dimension_numbers<[1], [0], [0], [1], [0, 0, 1, 1], [], []>} : vector<4x4xf32>, vector<4x256xf32>, vector<4x256xf32> -> vector<4x256xf32>
    %152 = arith.addf %144, %151 : vector<4x256xf32>
    %c239_i32_82 = arith.constant 239 : i32
    %153 = tpu.dynamic_rotate %85 by %c239_i32_82 dim 1 : vector<4x256xf32>, i32 -> vector<4x256xf32>
    %154 = vector.extract_strided_slice %2 {offsets = [8, 0], sizes = [1, 256], strides = [1, 1]} : vector<9x256xf32> to vector<1x256xf32>
    %155 = vector.broadcast %154 : vector<1x256xf32> to vector<4x256xf32>
    %156 = arith.mulf %153, %155 : vector<4x256xf32>
    %c8_83 = arith.constant 8 : index
    %c0_84 = arith.constant 0 : index
    %c0_85 = arith.constant 0 : index
    %157 = vector.load %arg5[%c8_83, %c0_84, %c0_85] : memref<9x4x4xf32, #tpu.memory_space<vmem>>, vector<1x4x4xf32>
    %158 = vector.shape_cast %157 : vector<1x4x4xf32> to vector<4x4xf32>
    %cst_86 = arith.constant dense<0.000000e+00> : vector<4x256xf32>
    %159 = tpu.matmul %158, %156, %cst_86 {dimension_numbers = #tpu.dot_dimension_numbers<[1], [0], [0], [1], [0, 0, 1, 1], [], []>} : vector<4x4xf32>, vector<4x256xf32>, vector<4x256xf32> -> vector<4x256xf32>
    %160 = arith.addf %152, %159 : vector<4x256xf32>
    %cst_87 = arith.constant 2.500000e-01 : f32
    %161 = vector.broadcast %cst_87 : f32 to vector<4x256xf32>
    %162 = arith.mulf %161, %160 : vector<4x256xf32>
    %163 = arith.addf %1, %162 : vector<4x256xf32>
    %cst_88 = arith.constant 0.000000e+00 : f32
    %164 = vector.broadcast %cst_88 : f32 to vector<4x256xf32>
    %165 = arith.maximumf %163, %164 : vector<4x256xf32>
    %cst_89 = arith.constant 2.500000e-01 : f32
    %166 = vector.broadcast %cst_89 : f32 to vector<4x256xf32>
    %167 = arith.mulf %166, %5 : vector<4x256xf32>
    %168 = vector.broadcast %3 : vector<4x1xf32> to vector<4x256xf32>
    %169 = arith.addf %168, %167 : vector<4x256xf32>
    %c17_i32_90 = arith.constant 17 : i32
    %170 = tpu.dynamic_rotate %165 by %c17_i32_90 dim 1 : vector<4x256xf32>, i32 -> vector<4x256xf32>
    %171 = vector.extract_strided_slice %2 {offsets = [0, 0], sizes = [1, 256], strides = [1, 1]} : vector<9x256xf32> to vector<1x256xf32>
    %172 = vector.broadcast %171 : vector<1x256xf32> to vector<4x256xf32>
    %173 = arith.mulf %170, %172 : vector<4x256xf32>
    %c0_91 = arith.constant 0 : index
    %c0_92 = arith.constant 0 : index
    %c0_93 = arith.constant 0 : index
    %174 = vector.load %arg2[%c0_91, %c0_92, %c0_93] : memref<9x4x4xf32, #tpu.memory_space<vmem>>, vector<1x4x4xf32>
    %175 = vector.shape_cast %174 : vector<1x4x4xf32> to vector<4x4xf32>
    %cst_94 = arith.constant dense<0.000000e+00> : vector<4x256xf32>
    %176 = tpu.matmul %175, %173, %cst_94 {dimension_numbers = #tpu.dot_dimension_numbers<[1], [0], [0], [1], [0, 0, 1, 1], [], []>} : vector<4x4xf32>, vector<4x256xf32>, vector<4x256xf32> -> vector<4x256xf32>
    %177 = arith.addf %169, %176 : vector<4x256xf32>
    %c16_i32_95 = arith.constant 16 : i32
    %178 = tpu.dynamic_rotate %165 by %c16_i32_95 dim 1 : vector<4x256xf32>, i32 -> vector<4x256xf32>
    %179 = vector.extract_strided_slice %2 {offsets = [1, 0], sizes = [1, 256], strides = [1, 1]} : vector<9x256xf32> to vector<1x256xf32>
    %180 = vector.broadcast %179 : vector<1x256xf32> to vector<4x256xf32>
    %181 = arith.mulf %178, %180 : vector<4x256xf32>
    %c1_96 = arith.constant 1 : index
    %c0_97 = arith.constant 0 : index
    %c0_98 = arith.constant 0 : index
    %182 = vector.load %arg2[%c1_96, %c0_97, %c0_98] : memref<9x4x4xf32, #tpu.memory_space<vmem>>, vector<1x4x4xf32>
    %183 = vector.shape_cast %182 : vector<1x4x4xf32> to vector<4x4xf32>
    %cst_99 = arith.constant dense<0.000000e+00> : vector<4x256xf32>
    %184 = tpu.matmul %183, %181, %cst_99 {dimension_numbers = #tpu.dot_dimension_numbers<[1], [0], [0], [1], [0, 0, 1, 1], [], []>} : vector<4x4xf32>, vector<4x256xf32>, vector<4x256xf32> -> vector<4x256xf32>
    %185 = arith.addf %177, %184 : vector<4x256xf32>
    %c15_i32_100 = arith.constant 15 : i32
    %186 = tpu.dynamic_rotate %165 by %c15_i32_100 dim 1 : vector<4x256xf32>, i32 -> vector<4x256xf32>
    %187 = vector.extract_strided_slice %2 {offsets = [2, 0], sizes = [1, 256], strides = [1, 1]} : vector<9x256xf32> to vector<1x256xf32>
    %188 = vector.broadcast %187 : vector<1x256xf32> to vector<4x256xf32>
    %189 = arith.mulf %186, %188 : vector<4x256xf32>
    %c2_101 = arith.constant 2 : index
    %c0_102 = arith.constant 0 : index
    %c0_103 = arith.constant 0 : index
    %190 = vector.load %arg2[%c2_101, %c0_102, %c0_103] : memref<9x4x4xf32, #tpu.memory_space<vmem>>, vector<1x4x4xf32>
    %191 = vector.shape_cast %190 : vector<1x4x4xf32> to vector<4x4xf32>
    %cst_104 = arith.constant dense<0.000000e+00> : vector<4x256xf32>
    %192 = tpu.matmul %191, %189, %cst_104 {dimension_numbers = #tpu.dot_dimension_numbers<[1], [0], [0], [1], [0, 0, 1, 1], [], []>} : vector<4x4xf32>, vector<4x256xf32>, vector<4x256xf32> -> vector<4x256xf32>
    %193 = arith.addf %185, %192 : vector<4x256xf32>
    %c1_i32_105 = arith.constant 1 : i32
    %194 = tpu.dynamic_rotate %165 by %c1_i32_105 dim 1 : vector<4x256xf32>, i32 -> vector<4x256xf32>
    %195 = vector.extract_strided_slice %2 {offsets = [3, 0], sizes = [1, 256], strides = [1, 1]} : vector<9x256xf32> to vector<1x256xf32>
    %196 = vector.broadcast %195 : vector<1x256xf32> to vector<4x256xf32>
    %197 = arith.mulf %194, %196 : vector<4x256xf32>
    %c3_106 = arith.constant 3 : index
    %c0_107 = arith.constant 0 : index
    %c0_108 = arith.constant 0 : index
    %198 = vector.load %arg2[%c3_106, %c0_107, %c0_108] : memref<9x4x4xf32, #tpu.memory_space<vmem>>, vector<1x4x4xf32>
    %199 = vector.shape_cast %198 : vector<1x4x4xf32> to vector<4x4xf32>
    %cst_109 = arith.constant dense<0.000000e+00> : vector<4x256xf32>
    %200 = tpu.matmul %199, %197, %cst_109 {dimension_numbers = #tpu.dot_dimension_numbers<[1], [0], [0], [1], [0, 0, 1, 1], [], []>} : vector<4x4xf32>, vector<4x256xf32>, vector<4x256xf32> -> vector<4x256xf32>
    %201 = arith.addf %193, %200 : vector<4x256xf32>
    %202 = vector.extract_strided_slice %2 {offsets = [4, 0], sizes = [1, 256], strides = [1, 1]} : vector<9x256xf32> to vector<1x256xf32>
    %203 = vector.broadcast %202 : vector<1x256xf32> to vector<4x256xf32>
    %204 = arith.mulf %165, %203 : vector<4x256xf32>
    %c4_110 = arith.constant 4 : index
    %c0_111 = arith.constant 0 : index
    %c0_112 = arith.constant 0 : index
    %205 = vector.load %arg2[%c4_110, %c0_111, %c0_112] : memref<9x4x4xf32, #tpu.memory_space<vmem>>, vector<1x4x4xf32>
    %206 = vector.shape_cast %205 : vector<1x4x4xf32> to vector<4x4xf32>
    %cst_113 = arith.constant dense<0.000000e+00> : vector<4x256xf32>
    %207 = tpu.matmul %206, %204, %cst_113 {dimension_numbers = #tpu.dot_dimension_numbers<[1], [0], [0], [1], [0, 0, 1, 1], [], []>} : vector<4x4xf32>, vector<4x256xf32>, vector<4x256xf32> -> vector<4x256xf32>
    %208 = arith.addf %201, %207 : vector<4x256xf32>
    %c255_i32_114 = arith.constant 255 : i32
    %209 = tpu.dynamic_rotate %165 by %c255_i32_114 dim 1 : vector<4x256xf32>, i32 -> vector<4x256xf32>
    %210 = vector.extract_strided_slice %2 {offsets = [5, 0], sizes = [1, 256], strides = [1, 1]} : vector<9x256xf32> to vector<1x256xf32>
    %211 = vector.broadcast %210 : vector<1x256xf32> to vector<4x256xf32>
    %212 = arith.mulf %209, %211 : vector<4x256xf32>
    %c5_115 = arith.constant 5 : index
    %c0_116 = arith.constant 0 : index
    %c0_117 = arith.constant 0 : index
    %213 = vector.load %arg2[%c5_115, %c0_116, %c0_117] : memref<9x4x4xf32, #tpu.memory_space<vmem>>, vector<1x4x4xf32>
    %214 = vector.shape_cast %213 : vector<1x4x4xf32> to vector<4x4xf32>
    %cst_118 = arith.constant dense<0.000000e+00> : vector<4x256xf32>
    %215 = tpu.matmul %214, %212, %cst_118 {dimension_numbers = #tpu.dot_dimension_numbers<[1], [0], [0], [1], [0, 0, 1, 1], [], []>} : vector<4x4xf32>, vector<4x256xf32>, vector<4x256xf32> -> vector<4x256xf32>
    %216 = arith.addf %208, %215 : vector<4x256xf32>
    %c241_i32_119 = arith.constant 241 : i32
    %217 = tpu.dynamic_rotate %165 by %c241_i32_119 dim 1 : vector<4x256xf32>, i32 -> vector<4x256xf32>
    %218 = vector.extract_strided_slice %2 {offsets = [6, 0], sizes = [1, 256], strides = [1, 1]} : vector<9x256xf32> to vector<1x256xf32>
    %219 = vector.broadcast %218 : vector<1x256xf32> to vector<4x256xf32>
    %220 = arith.mulf %217, %219 : vector<4x256xf32>
    %c6_120 = arith.constant 6 : index
    %c0_121 = arith.constant 0 : index
    %c0_122 = arith.constant 0 : index
    %221 = vector.load %arg2[%c6_120, %c0_121, %c0_122] : memref<9x4x4xf32, #tpu.memory_space<vmem>>, vector<1x4x4xf32>
    %222 = vector.shape_cast %221 : vector<1x4x4xf32> to vector<4x4xf32>
    %cst_123 = arith.constant dense<0.000000e+00> : vector<4x256xf32>
    %223 = tpu.matmul %222, %220, %cst_123 {dimension_numbers = #tpu.dot_dimension_numbers<[1], [0], [0], [1], [0, 0, 1, 1], [], []>} : vector<4x4xf32>, vector<4x256xf32>, vector<4x256xf32> -> vector<4x256xf32>
    %224 = arith.addf %216, %223 : vector<4x256xf32>
    %c240_i32_124 = arith.constant 240 : i32
    %225 = tpu.dynamic_rotate %165 by %c240_i32_124 dim 1 : vector<4x256xf32>, i32 -> vector<4x256xf32>
    %226 = vector.extract_strided_slice %2 {offsets = [7, 0], sizes = [1, 256], strides = [1, 1]} : vector<9x256xf32> to vector<1x256xf32>
    %227 = vector.broadcast %226 : vector<1x256xf32> to vector<4x256xf32>
    %228 = arith.mulf %225, %227 : vector<4x256xf32>
    %c7_125 = arith.constant 7 : index
    %c0_126 = arith.constant 0 : index
    %c0_127 = arith.constant 0 : index
    %229 = vector.load %arg2[%c7_125, %c0_126, %c0_127] : memref<9x4x4xf32, #tpu.memory_space<vmem>>, vector<1x4x4xf32>
    %230 = vector.shape_cast %229 : vector<1x4x4xf32> to vector<4x4xf32>
    %cst_128 = arith.constant dense<0.000000e+00> : vector<4x256xf32>
    %231 = tpu.matmul %230, %228, %cst_128 {dimension_numbers = #tpu.dot_dimension_numbers<[1], [0], [0], [1], [0, 0, 1, 1], [], []>} : vector<4x4xf32>, vector<4x256xf32>, vector<4x256xf32> -> vector<4x256xf32>
    %232 = arith.addf %224, %231 : vector<4x256xf32>
    %c239_i32_129 = arith.constant 239 : i32
    %233 = tpu.dynamic_rotate %165 by %c239_i32_129 dim 1 : vector<4x256xf32>, i32 -> vector<4x256xf32>
    %234 = vector.extract_strided_slice %2 {offsets = [8, 0], sizes = [1, 256], strides = [1, 1]} : vector<9x256xf32> to vector<1x256xf32>
    %235 = vector.broadcast %234 : vector<1x256xf32> to vector<4x256xf32>
    %236 = arith.mulf %233, %235 : vector<4x256xf32>
    %c8_130 = arith.constant 8 : index
    %c0_131 = arith.constant 0 : index
    %c0_132 = arith.constant 0 : index
    %237 = vector.load %arg2[%c8_130, %c0_131, %c0_132] : memref<9x4x4xf32, #tpu.memory_space<vmem>>, vector<1x4x4xf32>
    %238 = vector.shape_cast %237 : vector<1x4x4xf32> to vector<4x4xf32>
    %cst_133 = arith.constant dense<0.000000e+00> : vector<4x256xf32>
    %239 = tpu.matmul %238, %236, %cst_133 {dimension_numbers = #tpu.dot_dimension_numbers<[1], [0], [0], [1], [0, 0, 1, 1], [], []>} : vector<4x4xf32>, vector<4x256xf32>, vector<4x256xf32> -> vector<4x256xf32>
    %240 = arith.addf %232, %239 : vector<4x256xf32>
    %cst_134 = arith.constant 0.000000e+00 : f32
    %241 = vector.broadcast %cst_134 : f32 to vector<4x256xf32>
    %242 = arith.maximumf %240, %241 : vector<4x256xf32>
    %cst_135 = arith.constant 2.500000e-01 : f32
    %243 = vector.broadcast %cst_135 : f32 to vector<4x256xf32>
    %244 = arith.mulf %243, %6 : vector<4x256xf32>
    %245 = vector.broadcast %4 : vector<4x1xf32> to vector<4x256xf32>
    %246 = arith.addf %245, %244 : vector<4x256xf32>
    %c17_i32_136 = arith.constant 17 : i32
    %247 = tpu.dynamic_rotate %242 by %c17_i32_136 dim 1 : vector<4x256xf32>, i32 -> vector<4x256xf32>
    %248 = vector.extract_strided_slice %2 {offsets = [0, 0], sizes = [1, 256], strides = [1, 1]} : vector<9x256xf32> to vector<1x256xf32>
    %249 = vector.broadcast %248 : vector<1x256xf32> to vector<4x256xf32>
    %250 = arith.mulf %247, %249 : vector<4x256xf32>
    %c0_137 = arith.constant 0 : index
    %c0_138 = arith.constant 0 : index
    %c0_139 = arith.constant 0 : index
    %251 = vector.load %arg5[%c0_137, %c0_138, %c0_139] : memref<9x4x4xf32, #tpu.memory_space<vmem>>, vector<1x4x4xf32>
    %252 = vector.shape_cast %251 : vector<1x4x4xf32> to vector<4x4xf32>
    %cst_140 = arith.constant dense<0.000000e+00> : vector<4x256xf32>
    %253 = tpu.matmul %252, %250, %cst_140 {dimension_numbers = #tpu.dot_dimension_numbers<[1], [0], [0], [1], [0, 0, 1, 1], [], []>} : vector<4x4xf32>, vector<4x256xf32>, vector<4x256xf32> -> vector<4x256xf32>
    %254 = arith.addf %246, %253 : vector<4x256xf32>
    %c16_i32_141 = arith.constant 16 : i32
    %255 = tpu.dynamic_rotate %242 by %c16_i32_141 dim 1 : vector<4x256xf32>, i32 -> vector<4x256xf32>
    %256 = vector.extract_strided_slice %2 {offsets = [1, 0], sizes = [1, 256], strides = [1, 1]} : vector<9x256xf32> to vector<1x256xf32>
    %257 = vector.broadcast %256 : vector<1x256xf32> to vector<4x256xf32>
    %258 = arith.mulf %255, %257 : vector<4x256xf32>
    %c1_142 = arith.constant 1 : index
    %c0_143 = arith.constant 0 : index
    %c0_144 = arith.constant 0 : index
    %259 = vector.load %arg5[%c1_142, %c0_143, %c0_144] : memref<9x4x4xf32, #tpu.memory_space<vmem>>, vector<1x4x4xf32>
    %260 = vector.shape_cast %259 : vector<1x4x4xf32> to vector<4x4xf32>
    %cst_145 = arith.constant dense<0.000000e+00> : vector<4x256xf32>
    %261 = tpu.matmul %260, %258, %cst_145 {dimension_numbers = #tpu.dot_dimension_numbers<[1], [0], [0], [1], [0, 0, 1, 1], [], []>} : vector<4x4xf32>, vector<4x256xf32>, vector<4x256xf32> -> vector<4x256xf32>
    %262 = arith.addf %254, %261 : vector<4x256xf32>
    %c15_i32_146 = arith.constant 15 : i32
    %263 = tpu.dynamic_rotate %242 by %c15_i32_146 dim 1 : vector<4x256xf32>, i32 -> vector<4x256xf32>
    %264 = vector.extract_strided_slice %2 {offsets = [2, 0], sizes = [1, 256], strides = [1, 1]} : vector<9x256xf32> to vector<1x256xf32>
    %265 = vector.broadcast %264 : vector<1x256xf32> to vector<4x256xf32>
    %266 = arith.mulf %263, %265 : vector<4x256xf32>
    %c2_147 = arith.constant 2 : index
    %c0_148 = arith.constant 0 : index
    %c0_149 = arith.constant 0 : index
    %267 = vector.load %arg5[%c2_147, %c0_148, %c0_149] : memref<9x4x4xf32, #tpu.memory_space<vmem>>, vector<1x4x4xf32>
    %268 = vector.shape_cast %267 : vector<1x4x4xf32> to vector<4x4xf32>
    %cst_150 = arith.constant dense<0.000000e+00> : vector<4x256xf32>
    %269 = tpu.matmul %268, %266, %cst_150 {dimension_numbers = #tpu.dot_dimension_numbers<[1], [0], [0], [1], [0, 0, 1, 1], [], []>} : vector<4x4xf32>, vector<4x256xf32>, vector<4x256xf32> -> vector<4x256xf32>
    %270 = arith.addf %262, %269 : vector<4x256xf32>
    %c1_i32_151 = arith.constant 1 : i32
    %271 = tpu.dynamic_rotate %242 by %c1_i32_151 dim 1 : vector<4x256xf32>, i32 -> vector<4x256xf32>
    %272 = vector.extract_strided_slice %2 {offsets = [3, 0], sizes = [1, 256], strides = [1, 1]} : vector<9x256xf32> to vector<1x256xf32>
    %273 = vector.broadcast %272 : vector<1x256xf32> to vector<4x256xf32>
    %274 = arith.mulf %271, %273 : vector<4x256xf32>
    %c3_152 = arith.constant 3 : index
    %c0_153 = arith.constant 0 : index
    %c0_154 = arith.constant 0 : index
    %275 = vector.load %arg5[%c3_152, %c0_153, %c0_154] : memref<9x4x4xf32, #tpu.memory_space<vmem>>, vector<1x4x4xf32>
    %276 = vector.shape_cast %275 : vector<1x4x4xf32> to vector<4x4xf32>
    %cst_155 = arith.constant dense<0.000000e+00> : vector<4x256xf32>
    %277 = tpu.matmul %276, %274, %cst_155 {dimension_numbers = #tpu.dot_dimension_numbers<[1], [0], [0], [1], [0, 0, 1, 1], [], []>} : vector<4x4xf32>, vector<4x256xf32>, vector<4x256xf32> -> vector<4x256xf32>
    %278 = arith.addf %270, %277 : vector<4x256xf32>
    %279 = vector.extract_strided_slice %2 {offsets = [4, 0], sizes = [1, 256], strides = [1, 1]} : vector<9x256xf32> to vector<1x256xf32>
    %280 = vector.broadcast %279 : vector<1x256xf32> to vector<4x256xf32>
    %281 = arith.mulf %242, %280 : vector<4x256xf32>
    %c4_156 = arith.constant 4 : index
    %c0_157 = arith.constant 0 : index
    %c0_158 = arith.constant 0 : index
    %282 = vector.load %arg5[%c4_156, %c0_157, %c0_158] : memref<9x4x4xf32, #tpu.memory_space<vmem>>, vector<1x4x4xf32>
    %283 = vector.shape_cast %282 : vector<1x4x4xf32> to vector<4x4xf32>
    %cst_159 = arith.constant dense<0.000000e+00> : vector<4x256xf32>
    %284 = tpu.matmul %283, %281, %cst_159 {dimension_numbers = #tpu.dot_dimension_numbers<[1], [0], [0], [1], [0, 0, 1, 1], [], []>} : vector<4x4xf32>, vector<4x256xf32>, vector<4x256xf32> -> vector<4x256xf32>
    %285 = arith.addf %278, %284 : vector<4x256xf32>
    %c255_i32_160 = arith.constant 255 : i32
    %286 = tpu.dynamic_rotate %242 by %c255_i32_160 dim 1 : vector<4x256xf32>, i32 -> vector<4x256xf32>
    %287 = vector.extract_strided_slice %2 {offsets = [5, 0], sizes = [1, 256], strides = [1, 1]} : vector<9x256xf32> to vector<1x256xf32>
    %288 = vector.broadcast %287 : vector<1x256xf32> to vector<4x256xf32>
    %289 = arith.mulf %286, %288 : vector<4x256xf32>
    %c5_161 = arith.constant 5 : index
    %c0_162 = arith.constant 0 : index
    %c0_163 = arith.constant 0 : index
    %290 = vector.load %arg5[%c5_161, %c0_162, %c0_163] : memref<9x4x4xf32, #tpu.memory_space<vmem>>, vector<1x4x4xf32>
    %291 = vector.shape_cast %290 : vector<1x4x4xf32> to vector<4x4xf32>
    %cst_164 = arith.constant dense<0.000000e+00> : vector<4x256xf32>
    %292 = tpu.matmul %291, %289, %cst_164 {dimension_numbers = #tpu.dot_dimension_numbers<[1], [0], [0], [1], [0, 0, 1, 1], [], []>} : vector<4x4xf32>, vector<4x256xf32>, vector<4x256xf32> -> vector<4x256xf32>
    %293 = arith.addf %285, %292 : vector<4x256xf32>
    %c241_i32_165 = arith.constant 241 : i32
    %294 = tpu.dynamic_rotate %242 by %c241_i32_165 dim 1 : vector<4x256xf32>, i32 -> vector<4x256xf32>
    %295 = vector.extract_strided_slice %2 {offsets = [6, 0], sizes = [1, 256], strides = [1, 1]} : vector<9x256xf32> to vector<1x256xf32>
    %296 = vector.broadcast %295 : vector<1x256xf32> to vector<4x256xf32>
    %297 = arith.mulf %294, %296 : vector<4x256xf32>
    %c6_166 = arith.constant 6 : index
    %c0_167 = arith.constant 0 : index
    %c0_168 = arith.constant 0 : index
    %298 = vector.load %arg5[%c6_166, %c0_167, %c0_168] : memref<9x4x4xf32, #tpu.memory_space<vmem>>, vector<1x4x4xf32>
    %299 = vector.shape_cast %298 : vector<1x4x4xf32> to vector<4x4xf32>
    %cst_169 = arith.constant dense<0.000000e+00> : vector<4x256xf32>
    %300 = tpu.matmul %299, %297, %cst_169 {dimension_numbers = #tpu.dot_dimension_numbers<[1], [0], [0], [1], [0, 0, 1, 1], [], []>} : vector<4x4xf32>, vector<4x256xf32>, vector<4x256xf32> -> vector<4x256xf32>
    %301 = arith.addf %293, %300 : vector<4x256xf32>
    %c240_i32_170 = arith.constant 240 : i32
    %302 = tpu.dynamic_rotate %242 by %c240_i32_170 dim 1 : vector<4x256xf32>, i32 -> vector<4x256xf32>
    %303 = vector.extract_strided_slice %2 {offsets = [7, 0], sizes = [1, 256], strides = [1, 1]} : vector<9x256xf32> to vector<1x256xf32>
    %304 = vector.broadcast %303 : vector<1x256xf32> to vector<4x256xf32>
    %305 = arith.mulf %302, %304 : vector<4x256xf32>
    %c7_171 = arith.constant 7 : index
    %c0_172 = arith.constant 0 : index
    %c0_173 = arith.constant 0 : index
    %306 = vector.load %arg5[%c7_171, %c0_172, %c0_173] : memref<9x4x4xf32, #tpu.memory_space<vmem>>, vector<1x4x4xf32>
    %307 = vector.shape_cast %306 : vector<1x4x4xf32> to vector<4x4xf32>
    %cst_174 = arith.constant dense<0.000000e+00> : vector<4x256xf32>
    %308 = tpu.matmul %307, %305, %cst_174 {dimension_numbers = #tpu.dot_dimension_numbers<[1], [0], [0], [1], [0, 0, 1, 1], [], []>} : vector<4x4xf32>, vector<4x256xf32>, vector<4x256xf32> -> vector<4x256xf32>
    %309 = arith.addf %301, %308 : vector<4x256xf32>
    %c239_i32_175 = arith.constant 239 : i32
    %310 = tpu.dynamic_rotate %242 by %c239_i32_175 dim 1 : vector<4x256xf32>, i32 -> vector<4x256xf32>
    %311 = vector.extract_strided_slice %2 {offsets = [8, 0], sizes = [1, 256], strides = [1, 1]} : vector<9x256xf32> to vector<1x256xf32>
    %312 = vector.broadcast %311 : vector<1x256xf32> to vector<4x256xf32>
    %313 = arith.mulf %310, %312 : vector<4x256xf32>
    %c8_176 = arith.constant 8 : index
    %c0_177 = arith.constant 0 : index
    %c0_178 = arith.constant 0 : index
    %314 = vector.load %arg5[%c8_176, %c0_177, %c0_178] : memref<9x4x4xf32, #tpu.memory_space<vmem>>, vector<1x4x4xf32>
    %315 = vector.shape_cast %314 : vector<1x4x4xf32> to vector<4x4xf32>
    %cst_179 = arith.constant dense<0.000000e+00> : vector<4x256xf32>
    %316 = tpu.matmul %315, %313, %cst_179 {dimension_numbers = #tpu.dot_dimension_numbers<[1], [0], [0], [1], [0, 0, 1, 1], [], []>} : vector<4x4xf32>, vector<4x256xf32>, vector<4x256xf32> -> vector<4x256xf32>
    %317 = arith.addf %309, %316 : vector<4x256xf32>
    %cst_180 = arith.constant 2.500000e-01 : f32
    %318 = vector.broadcast %cst_180 : f32 to vector<4x256xf32>
    %319 = arith.mulf %318, %317 : vector<4x256xf32>
    %320 = arith.addf %163, %319 : vector<4x256xf32>
    %cst_181 = arith.constant 0.000000e+00 : f32
    %321 = vector.broadcast %cst_181 : f32 to vector<4x256xf32>
    %322 = arith.maximumf %320, %321 : vector<4x256xf32>
    %cst_182 = arith.constant 5.000000e-01 : f32
    %323 = vector.broadcast %cst_182 : f32 to vector<4x256xf32>
    %324 = arith.mulf %323, %5 : vector<4x256xf32>
    %325 = vector.broadcast %3 : vector<4x1xf32> to vector<4x256xf32>
    %326 = arith.addf %325, %324 : vector<4x256xf32>
    %c17_i32_183 = arith.constant 17 : i32
    %327 = tpu.dynamic_rotate %322 by %c17_i32_183 dim 1 : vector<4x256xf32>, i32 -> vector<4x256xf32>
    %328 = vector.extract_strided_slice %2 {offsets = [0, 0], sizes = [1, 256], strides = [1, 1]} : vector<9x256xf32> to vector<1x256xf32>
    %329 = vector.broadcast %328 : vector<1x256xf32> to vector<4x256xf32>
    %330 = arith.mulf %327, %329 : vector<4x256xf32>
    %c0_184 = arith.constant 0 : index
    %c0_185 = arith.constant 0 : index
    %c0_186 = arith.constant 0 : index
    %331 = vector.load %arg2[%c0_184, %c0_185, %c0_186] : memref<9x4x4xf32, #tpu.memory_space<vmem>>, vector<1x4x4xf32>
    %332 = vector.shape_cast %331 : vector<1x4x4xf32> to vector<4x4xf32>
    %cst_187 = arith.constant dense<0.000000e+00> : vector<4x256xf32>
    %333 = tpu.matmul %332, %330, %cst_187 {dimension_numbers = #tpu.dot_dimension_numbers<[1], [0], [0], [1], [0, 0, 1, 1], [], []>} : vector<4x4xf32>, vector<4x256xf32>, vector<4x256xf32> -> vector<4x256xf32>
    %334 = arith.addf %326, %333 : vector<4x256xf32>
    %c16_i32_188 = arith.constant 16 : i32
    %335 = tpu.dynamic_rotate %322 by %c16_i32_188 dim 1 : vector<4x256xf32>, i32 -> vector<4x256xf32>
    %336 = vector.extract_strided_slice %2 {offsets = [1, 0], sizes = [1, 256], strides = [1, 1]} : vector<9x256xf32> to vector<1x256xf32>
    %337 = vector.broadcast %336 : vector<1x256xf32> to vector<4x256xf32>
    %338 = arith.mulf %335, %337 : vector<4x256xf32>
    %c1_189 = arith.constant 1 : index
    %c0_190 = arith.constant 0 : index
    %c0_191 = arith.constant 0 : index
    %339 = vector.load %arg2[%c1_189, %c0_190, %c0_191] : memref<9x4x4xf32, #tpu.memory_space<vmem>>, vector<1x4x4xf32>
    %340 = vector.shape_cast %339 : vector<1x4x4xf32> to vector<4x4xf32>
    %cst_192 = arith.constant dense<0.000000e+00> : vector<4x256xf32>
    %341 = tpu.matmul %340, %338, %cst_192 {dimension_numbers = #tpu.dot_dimension_numbers<[1], [0], [0], [1], [0, 0, 1, 1], [], []>} : vector<4x4xf32>, vector<4x256xf32>, vector<4x256xf32> -> vector<4x256xf32>
    %342 = arith.addf %334, %341 : vector<4x256xf32>
    %c15_i32_193 = arith.constant 15 : i32
    %343 = tpu.dynamic_rotate %322 by %c15_i32_193 dim 1 : vector<4x256xf32>, i32 -> vector<4x256xf32>
    %344 = vector.extract_strided_slice %2 {offsets = [2, 0], sizes = [1, 256], strides = [1, 1]} : vector<9x256xf32> to vector<1x256xf32>
    %345 = vector.broadcast %344 : vector<1x256xf32> to vector<4x256xf32>
    %346 = arith.mulf %343, %345 : vector<4x256xf32>
    %c2_194 = arith.constant 2 : index
    %c0_195 = arith.constant 0 : index
    %c0_196 = arith.constant 0 : index
    %347 = vector.load %arg2[%c2_194, %c0_195, %c0_196] : memref<9x4x4xf32, #tpu.memory_space<vmem>>, vector<1x4x4xf32>
    %348 = vector.shape_cast %347 : vector<1x4x4xf32> to vector<4x4xf32>
    %cst_197 = arith.constant dense<0.000000e+00> : vector<4x256xf32>
    %349 = tpu.matmul %348, %346, %cst_197 {dimension_numbers = #tpu.dot_dimension_numbers<[1], [0], [0], [1], [0, 0, 1, 1], [], []>} : vector<4x4xf32>, vector<4x256xf32>, vector<4x256xf32> -> vector<4x256xf32>
    %350 = arith.addf %342, %349 : vector<4x256xf32>
    %c1_i32_198 = arith.constant 1 : i32
    %351 = tpu.dynamic_rotate %322 by %c1_i32_198 dim 1 : vector<4x256xf32>, i32 -> vector<4x256xf32>
    %352 = vector.extract_strided_slice %2 {offsets = [3, 0], sizes = [1, 256], strides = [1, 1]} : vector<9x256xf32> to vector<1x256xf32>
    %353 = vector.broadcast %352 : vector<1x256xf32> to vector<4x256xf32>
    %354 = arith.mulf %351, %353 : vector<4x256xf32>
    %c3_199 = arith.constant 3 : index
    %c0_200 = arith.constant 0 : index
    %c0_201 = arith.constant 0 : index
    %355 = vector.load %arg2[%c3_199, %c0_200, %c0_201] : memref<9x4x4xf32, #tpu.memory_space<vmem>>, vector<1x4x4xf32>
    %356 = vector.shape_cast %355 : vector<1x4x4xf32> to vector<4x4xf32>
    %cst_202 = arith.constant dense<0.000000e+00> : vector<4x256xf32>
    %357 = tpu.matmul %356, %354, %cst_202 {dimension_numbers = #tpu.dot_dimension_numbers<[1], [0], [0], [1], [0, 0, 1, 1], [], []>} : vector<4x4xf32>, vector<4x256xf32>, vector<4x256xf32> -> vector<4x256xf32>
    %358 = arith.addf %350, %357 : vector<4x256xf32>
    %359 = vector.extract_strided_slice %2 {offsets = [4, 0], sizes = [1, 256], strides = [1, 1]} : vector<9x256xf32> to vector<1x256xf32>
    %360 = vector.broadcast %359 : vector<1x256xf32> to vector<4x256xf32>
    %361 = arith.mulf %322, %360 : vector<4x256xf32>
    %c4_203 = arith.constant 4 : index
    %c0_204 = arith.constant 0 : index
    %c0_205 = arith.constant 0 : index
    %362 = vector.load %arg2[%c4_203, %c0_204, %c0_205] : memref<9x4x4xf32, #tpu.memory_space<vmem>>, vector<1x4x4xf32>
    %363 = vector.shape_cast %362 : vector<1x4x4xf32> to vector<4x4xf32>
    %cst_206 = arith.constant dense<0.000000e+00> : vector<4x256xf32>
    %364 = tpu.matmul %363, %361, %cst_206 {dimension_numbers = #tpu.dot_dimension_numbers<[1], [0], [0], [1], [0, 0, 1, 1], [], []>} : vector<4x4xf32>, vector<4x256xf32>, vector<4x256xf32> -> vector<4x256xf32>
    %365 = arith.addf %358, %364 : vector<4x256xf32>
    %c255_i32_207 = arith.constant 255 : i32
    %366 = tpu.dynamic_rotate %322 by %c255_i32_207 dim 1 : vector<4x256xf32>, i32 -> vector<4x256xf32>
    %367 = vector.extract_strided_slice %2 {offsets = [5, 0], sizes = [1, 256], strides = [1, 1]} : vector<9x256xf32> to vector<1x256xf32>
    %368 = vector.broadcast %367 : vector<1x256xf32> to vector<4x256xf32>
    %369 = arith.mulf %366, %368 : vector<4x256xf32>
    %c5_208 = arith.constant 5 : index
    %c0_209 = arith.constant 0 : index
    %c0_210 = arith.constant 0 : index
    %370 = vector.load %arg2[%c5_208, %c0_209, %c0_210] : memref<9x4x4xf32, #tpu.memory_space<vmem>>, vector<1x4x4xf32>
    %371 = vector.shape_cast %370 : vector<1x4x4xf32> to vector<4x4xf32>
    %cst_211 = arith.constant dense<0.000000e+00> : vector<4x256xf32>
    %372 = tpu.matmul %371, %369, %cst_211 {dimension_numbers = #tpu.dot_dimension_numbers<[1], [0], [0], [1], [0, 0, 1, 1], [], []>} : vector<4x4xf32>, vector<4x256xf32>, vector<4x256xf32> -> vector<4x256xf32>
    %373 = arith.addf %365, %372 : vector<4x256xf32>
    %c241_i32_212 = arith.constant 241 : i32
    %374 = tpu.dynamic_rotate %322 by %c241_i32_212 dim 1 : vector<4x256xf32>, i32 -> vector<4x256xf32>
    %375 = vector.extract_strided_slice %2 {offsets = [6, 0], sizes = [1, 256], strides = [1, 1]} : vector<9x256xf32> to vector<1x256xf32>
    %376 = vector.broadcast %375 : vector<1x256xf32> to vector<4x256xf32>
    %377 = arith.mulf %374, %376 : vector<4x256xf32>
    %c6_213 = arith.constant 6 : index
    %c0_214 = arith.constant 0 : index
    %c0_215 = arith.constant 0 : index
    %378 = vector.load %arg2[%c6_213, %c0_214, %c0_215] : memref<9x4x4xf32, #tpu.memory_space<vmem>>, vector<1x4x4xf32>
    %379 = vector.shape_cast %378 : vector<1x4x4xf32> to vector<4x4xf32>
    %cst_216 = arith.constant dense<0.000000e+00> : vector<4x256xf32>
    %380 = tpu.matmul %379, %377, %cst_216 {dimension_numbers = #tpu.dot_dimension_numbers<[1], [0], [0], [1], [0, 0, 1, 1], [], []>} : vector<4x4xf32>, vector<4x256xf32>, vector<4x256xf32> -> vector<4x256xf32>
    %381 = arith.addf %373, %380 : vector<4x256xf32>
    %c240_i32_217 = arith.constant 240 : i32
    %382 = tpu.dynamic_rotate %322 by %c240_i32_217 dim 1 : vector<4x256xf32>, i32 -> vector<4x256xf32>
    %383 = vector.extract_strided_slice %2 {offsets = [7, 0], sizes = [1, 256], strides = [1, 1]} : vector<9x256xf32> to vector<1x256xf32>
    %384 = vector.broadcast %383 : vector<1x256xf32> to vector<4x256xf32>
    %385 = arith.mulf %382, %384 : vector<4x256xf32>
    %c7_218 = arith.constant 7 : index
    %c0_219 = arith.constant 0 : index
    %c0_220 = arith.constant 0 : index
    %386 = vector.load %arg2[%c7_218, %c0_219, %c0_220] : memref<9x4x4xf32, #tpu.memory_space<vmem>>, vector<1x4x4xf32>
    %387 = vector.shape_cast %386 : vector<1x4x4xf32> to vector<4x4xf32>
    %cst_221 = arith.constant dense<0.000000e+00> : vector<4x256xf32>
    %388 = tpu.matmul %387, %385, %cst_221 {dimension_numbers = #tpu.dot_dimension_numbers<[1], [0], [0], [1], [0, 0, 1, 1], [], []>} : vector<4x4xf32>, vector<4x256xf32>, vector<4x256xf32> -> vector<4x256xf32>
    %389 = arith.addf %381, %388 : vector<4x256xf32>
    %c239_i32_222 = arith.constant 239 : i32
    %390 = tpu.dynamic_rotate %322 by %c239_i32_222 dim 1 : vector<4x256xf32>, i32 -> vector<4x256xf32>
    %391 = vector.extract_strided_slice %2 {offsets = [8, 0], sizes = [1, 256], strides = [1, 1]} : vector<9x256xf32> to vector<1x256xf32>
    %392 = vector.broadcast %391 : vector<1x256xf32> to vector<4x256xf32>
    %393 = arith.mulf %390, %392 : vector<4x256xf32>
    %c8_223 = arith.constant 8 : index
    %c0_224 = arith.constant 0 : index
    %c0_225 = arith.constant 0 : index
    %394 = vector.load %arg2[%c8_223, %c0_224, %c0_225] : memref<9x4x4xf32, #tpu.memory_space<vmem>>, vector<1x4x4xf32>
    %395 = vector.shape_cast %394 : vector<1x4x4xf32> to vector<4x4xf32>
    %cst_226 = arith.constant dense<0.000000e+00> : vector<4x256xf32>
    %396 = tpu.matmul %395, %393, %cst_226 {dimension_numbers = #tpu.dot_dimension_numbers<[1], [0], [0], [1], [0, 0, 1, 1], [], []>} : vector<4x4xf32>, vector<4x256xf32>, vector<4x256xf32> -> vector<4x256xf32>
    %397 = arith.addf %389, %396 : vector<4x256xf32>
    %cst_227 = arith.constant 0.000000e+00 : f32
    %398 = vector.broadcast %cst_227 : f32 to vector<4x256xf32>
    %399 = arith.maximumf %397, %398 : vector<4x256xf32>
    %cst_228 = arith.constant 5.000000e-01 : f32
    %400 = vector.broadcast %cst_228 : f32 to vector<4x256xf32>
    %401 = arith.mulf %400, %6 : vector<4x256xf32>
    %402 = vector.broadcast %4 : vector<4x1xf32> to vector<4x256xf32>
    %403 = arith.addf %402, %401 : vector<4x256xf32>
    %c17_i32_229 = arith.constant 17 : i32
    %404 = tpu.dynamic_rotate %399 by %c17_i32_229 dim 1 : vector<4x256xf32>, i32 -> vector<4x256xf32>
    %405 = vector.extract_strided_slice %2 {offsets = [0, 0], sizes = [1, 256], strides = [1, 1]} : vector<9x256xf32> to vector<1x256xf32>
    %406 = vector.broadcast %405 : vector<1x256xf32> to vector<4x256xf32>
    %407 = arith.mulf %404, %406 : vector<4x256xf32>
    %c0_230 = arith.constant 0 : index
    %c0_231 = arith.constant 0 : index
    %c0_232 = arith.constant 0 : index
    %408 = vector.load %arg5[%c0_230, %c0_231, %c0_232] : memref<9x4x4xf32, #tpu.memory_space<vmem>>, vector<1x4x4xf32>
    %409 = vector.shape_cast %408 : vector<1x4x4xf32> to vector<4x4xf32>
    %cst_233 = arith.constant dense<0.000000e+00> : vector<4x256xf32>
    %410 = tpu.matmul %409, %407, %cst_233 {dimension_numbers = #tpu.dot_dimension_numbers<[1], [0], [0], [1], [0, 0, 1, 1], [], []>} : vector<4x4xf32>, vector<4x256xf32>, vector<4x256xf32> -> vector<4x256xf32>
    %411 = arith.addf %403, %410 : vector<4x256xf32>
    %c16_i32_234 = arith.constant 16 : i32
    %412 = tpu.dynamic_rotate %399 by %c16_i32_234 dim 1 : vector<4x256xf32>, i32 -> vector<4x256xf32>
    %413 = vector.extract_strided_slice %2 {offsets = [1, 0], sizes = [1, 256], strides = [1, 1]} : vector<9x256xf32> to vector<1x256xf32>
    %414 = vector.broadcast %413 : vector<1x256xf32> to vector<4x256xf32>
    %415 = arith.mulf %412, %414 : vector<4x256xf32>
    %c1_235 = arith.constant 1 : index
    %c0_236 = arith.constant 0 : index
    %c0_237 = arith.constant 0 : index
    %416 = vector.load %arg5[%c1_235, %c0_236, %c0_237] : memref<9x4x4xf32, #tpu.memory_space<vmem>>, vector<1x4x4xf32>
    %417 = vector.shape_cast %416 : vector<1x4x4xf32> to vector<4x4xf32>
    %cst_238 = arith.constant dense<0.000000e+00> : vector<4x256xf32>
    %418 = tpu.matmul %417, %415, %cst_238 {dimension_numbers = #tpu.dot_dimension_numbers<[1], [0], [0], [1], [0, 0, 1, 1], [], []>} : vector<4x4xf32>, vector<4x256xf32>, vector<4x256xf32> -> vector<4x256xf32>
    %419 = arith.addf %411, %418 : vector<4x256xf32>
    %c15_i32_239 = arith.constant 15 : i32
    %420 = tpu.dynamic_rotate %399 by %c15_i32_239 dim 1 : vector<4x256xf32>, i32 -> vector<4x256xf32>
    %421 = vector.extract_strided_slice %2 {offsets = [2, 0], sizes = [1, 256], strides = [1, 1]} : vector<9x256xf32> to vector<1x256xf32>
    %422 = vector.broadcast %421 : vector<1x256xf32> to vector<4x256xf32>
    %423 = arith.mulf %420, %422 : vector<4x256xf32>
    %c2_240 = arith.constant 2 : index
    %c0_241 = arith.constant 0 : index
    %c0_242 = arith.constant 0 : index
    %424 = vector.load %arg5[%c2_240, %c0_241, %c0_242] : memref<9x4x4xf32, #tpu.memory_space<vmem>>, vector<1x4x4xf32>
    %425 = vector.shape_cast %424 : vector<1x4x4xf32> to vector<4x4xf32>
    %cst_243 = arith.constant dense<0.000000e+00> : vector<4x256xf32>
    %426 = tpu.matmul %425, %423, %cst_243 {dimension_numbers = #tpu.dot_dimension_numbers<[1], [0], [0], [1], [0, 0, 1, 1], [], []>} : vector<4x4xf32>, vector<4x256xf32>, vector<4x256xf32> -> vector<4x256xf32>
    %427 = arith.addf %419, %426 : vector<4x256xf32>
    %c1_i32_244 = arith.constant 1 : i32
    %428 = tpu.dynamic_rotate %399 by %c1_i32_244 dim 1 : vector<4x256xf32>, i32 -> vector<4x256xf32>
    %429 = vector.extract_strided_slice %2 {offsets = [3, 0], sizes = [1, 256], strides = [1, 1]} : vector<9x256xf32> to vector<1x256xf32>
    %430 = vector.broadcast %429 : vector<1x256xf32> to vector<4x256xf32>
    %431 = arith.mulf %428, %430 : vector<4x256xf32>
    %c3_245 = arith.constant 3 : index
    %c0_246 = arith.constant 0 : index
    %c0_247 = arith.constant 0 : index
    %432 = vector.load %arg5[%c3_245, %c0_246, %c0_247] : memref<9x4x4xf32, #tpu.memory_space<vmem>>, vector<1x4x4xf32>
    %433 = vector.shape_cast %432 : vector<1x4x4xf32> to vector<4x4xf32>
    %cst_248 = arith.constant dense<0.000000e+00> : vector<4x256xf32>
    %434 = tpu.matmul %433, %431, %cst_248 {dimension_numbers = #tpu.dot_dimension_numbers<[1], [0], [0], [1], [0, 0, 1, 1], [], []>} : vector<4x4xf32>, vector<4x256xf32>, vector<4x256xf32> -> vector<4x256xf32>
    %435 = arith.addf %427, %434 : vector<4x256xf32>
    %436 = vector.extract_strided_slice %2 {offsets = [4, 0], sizes = [1, 256], strides = [1, 1]} : vector<9x256xf32> to vector<1x256xf32>
    %437 = vector.broadcast %436 : vector<1x256xf32> to vector<4x256xf32>
    %438 = arith.mulf %399, %437 : vector<4x256xf32>
    %c4_249 = arith.constant 4 : index
    %c0_250 = arith.constant 0 : index
    %c0_251 = arith.constant 0 : index
    %439 = vector.load %arg5[%c4_249, %c0_250, %c0_251] : memref<9x4x4xf32, #tpu.memory_space<vmem>>, vector<1x4x4xf32>
    %440 = vector.shape_cast %439 : vector<1x4x4xf32> to vector<4x4xf32>
    %cst_252 = arith.constant dense<0.000000e+00> : vector<4x256xf32>
    %441 = tpu.matmul %440, %438, %cst_252 {dimension_numbers = #tpu.dot_dimension_numbers<[1], [0], [0], [1], [0, 0, 1, 1], [], []>} : vector<4x4xf32>, vector<4x256xf32>, vector<4x256xf32> -> vector<4x256xf32>
    %442 = arith.addf %435, %441 : vector<4x256xf32>
    %c255_i32_253 = arith.constant 255 : i32
    %443 = tpu.dynamic_rotate %399 by %c255_i32_253 dim 1 : vector<4x256xf32>, i32 -> vector<4x256xf32>
    %444 = vector.extract_strided_slice %2 {offsets = [5, 0], sizes = [1, 256], strides = [1, 1]} : vector<9x256xf32> to vector<1x256xf32>
    %445 = vector.broadcast %444 : vector<1x256xf32> to vector<4x256xf32>
    %446 = arith.mulf %443, %445 : vector<4x256xf32>
    %c5_254 = arith.constant 5 : index
    %c0_255 = arith.constant 0 : index
    %c0_256 = arith.constant 0 : index
    %447 = vector.load %arg5[%c5_254, %c0_255, %c0_256] : memref<9x4x4xf32, #tpu.memory_space<vmem>>, vector<1x4x4xf32>
    %448 = vector.shape_cast %447 : vector<1x4x4xf32> to vector<4x4xf32>
    %cst_257 = arith.constant dense<0.000000e+00> : vector<4x256xf32>
    %449 = tpu.matmul %448, %446, %cst_257 {dimension_numbers = #tpu.dot_dimension_numbers<[1], [0], [0], [1], [0, 0, 1, 1], [], []>} : vector<4x4xf32>, vector<4x256xf32>, vector<4x256xf32> -> vector<4x256xf32>
    %450 = arith.addf %442, %449 : vector<4x256xf32>
    %c241_i32_258 = arith.constant 241 : i32
    %451 = tpu.dynamic_rotate %399 by %c241_i32_258 dim 1 : vector<4x256xf32>, i32 -> vector<4x256xf32>
    %452 = vector.extract_strided_slice %2 {offsets = [6, 0], sizes = [1, 256], strides = [1, 1]} : vector<9x256xf32> to vector<1x256xf32>
    %453 = vector.broadcast %452 : vector<1x256xf32> to vector<4x256xf32>
    %454 = arith.mulf %451, %453 : vector<4x256xf32>
    %c6_259 = arith.constant 6 : index
    %c0_260 = arith.constant 0 : index
    %c0_261 = arith.constant 0 : index
    %455 = vector.load %arg5[%c6_259, %c0_260, %c0_261] : memref<9x4x4xf32, #tpu.memory_space<vmem>>, vector<1x4x4xf32>
    %456 = vector.shape_cast %455 : vector<1x4x4xf32> to vector<4x4xf32>
    %cst_262 = arith.constant dense<0.000000e+00> : vector<4x256xf32>
    %457 = tpu.matmul %456, %454, %cst_262 {dimension_numbers = #tpu.dot_dimension_numbers<[1], [0], [0], [1], [0, 0, 1, 1], [], []>} : vector<4x4xf32>, vector<4x256xf32>, vector<4x256xf32> -> vector<4x256xf32>
    %458 = arith.addf %450, %457 : vector<4x256xf32>
    %c240_i32_263 = arith.constant 240 : i32
    %459 = tpu.dynamic_rotate %399 by %c240_i32_263 dim 1 : vector<4x256xf32>, i32 -> vector<4x256xf32>
    %460 = vector.extract_strided_slice %2 {offsets = [7, 0], sizes = [1, 256], strides = [1, 1]} : vector<9x256xf32> to vector<1x256xf32>
    %461 = vector.broadcast %460 : vector<1x256xf32> to vector<4x256xf32>
    %462 = arith.mulf %459, %461 : vector<4x256xf32>
    %c7_264 = arith.constant 7 : index
    %c0_265 = arith.constant 0 : index
    %c0_266 = arith.constant 0 : index
    %463 = vector.load %arg5[%c7_264, %c0_265, %c0_266] : memref<9x4x4xf32, #tpu.memory_space<vmem>>, vector<1x4x4xf32>
    %464 = vector.shape_cast %463 : vector<1x4x4xf32> to vector<4x4xf32>
    %cst_267 = arith.constant dense<0.000000e+00> : vector<4x256xf32>
    %465 = tpu.matmul %464, %462, %cst_267 {dimension_numbers = #tpu.dot_dimension_numbers<[1], [0], [0], [1], [0, 0, 1, 1], [], []>} : vector<4x4xf32>, vector<4x256xf32>, vector<4x256xf32> -> vector<4x256xf32>
    %466 = arith.addf %458, %465 : vector<4x256xf32>
    %c239_i32_268 = arith.constant 239 : i32
    %467 = tpu.dynamic_rotate %399 by %c239_i32_268 dim 1 : vector<4x256xf32>, i32 -> vector<4x256xf32>
    %468 = vector.extract_strided_slice %2 {offsets = [8, 0], sizes = [1, 256], strides = [1, 1]} : vector<9x256xf32> to vector<1x256xf32>
    %469 = vector.broadcast %468 : vector<1x256xf32> to vector<4x256xf32>
    %470 = arith.mulf %467, %469 : vector<4x256xf32>
    %c8_269 = arith.constant 8 : index
    %c0_270 = arith.constant 0 : index
    %c0_271 = arith.constant 0 : index
    %471 = vector.load %arg5[%c8_269, %c0_270, %c0_271] : memref<9x4x4xf32, #tpu.memory_space<vmem>>, vector<1x4x4xf32>
    %472 = vector.shape_cast %471 : vector<1x4x4xf32> to vector<4x4xf32>
    %cst_272 = arith.constant dense<0.000000e+00> : vector<4x256xf32>
    %473 = tpu.matmul %472, %470, %cst_272 {dimension_numbers = #tpu.dot_dimension_numbers<[1], [0], [0], [1], [0, 0, 1, 1], [], []>} : vector<4x4xf32>, vector<4x256xf32>, vector<4x256xf32> -> vector<4x256xf32>
    %474 = arith.addf %466, %473 : vector<4x256xf32>
    %cst_273 = arith.constant 2.500000e-01 : f32
    %475 = vector.broadcast %cst_273 : f32 to vector<4x256xf32>
    %476 = arith.mulf %475, %474 : vector<4x256xf32>
    %477 = arith.addf %320, %476 : vector<4x256xf32>
    %cst_274 = arith.constant 0.000000e+00 : f32
    %478 = vector.broadcast %cst_274 : f32 to vector<4x256xf32>
    %479 = arith.maximumf %477, %478 : vector<4x256xf32>
    %cst_275 = arith.constant 7.500000e-01 : f32
    %480 = vector.broadcast %cst_275 : f32 to vector<4x256xf32>
    %481 = arith.mulf %480, %5 : vector<4x256xf32>
    %482 = vector.broadcast %3 : vector<4x1xf32> to vector<4x256xf32>
    %483 = arith.addf %482, %481 : vector<4x256xf32>
    %c17_i32_276 = arith.constant 17 : i32
    %484 = tpu.dynamic_rotate %479 by %c17_i32_276 dim 1 : vector<4x256xf32>, i32 -> vector<4x256xf32>
    %485 = vector.extract_strided_slice %2 {offsets = [0, 0], sizes = [1, 256], strides = [1, 1]} : vector<9x256xf32> to vector<1x256xf32>
    %486 = vector.broadcast %485 : vector<1x256xf32> to vector<4x256xf32>
    %487 = arith.mulf %484, %486 : vector<4x256xf32>
    %c0_277 = arith.constant 0 : index
    %c0_278 = arith.constant 0 : index
    %c0_279 = arith.constant 0 : index
    %488 = vector.load %arg2[%c0_277, %c0_278, %c0_279] : memref<9x4x4xf32, #tpu.memory_space<vmem>>, vector<1x4x4xf32>
    %489 = vector.shape_cast %488 : vector<1x4x4xf32> to vector<4x4xf32>
    %cst_280 = arith.constant dense<0.000000e+00> : vector<4x256xf32>
    %490 = tpu.matmul %489, %487, %cst_280 {dimension_numbers = #tpu.dot_dimension_numbers<[1], [0], [0], [1], [0, 0, 1, 1], [], []>} : vector<4x4xf32>, vector<4x256xf32>, vector<4x256xf32> -> vector<4x256xf32>
    %491 = arith.addf %483, %490 : vector<4x256xf32>
    %c16_i32_281 = arith.constant 16 : i32
    %492 = tpu.dynamic_rotate %479 by %c16_i32_281 dim 1 : vector<4x256xf32>, i32 -> vector<4x256xf32>
    %493 = vector.extract_strided_slice %2 {offsets = [1, 0], sizes = [1, 256], strides = [1, 1]} : vector<9x256xf32> to vector<1x256xf32>
    %494 = vector.broadcast %493 : vector<1x256xf32> to vector<4x256xf32>
    %495 = arith.mulf %492, %494 : vector<4x256xf32>
    %c1_282 = arith.constant 1 : index
    %c0_283 = arith.constant 0 : index
    %c0_284 = arith.constant 0 : index
    %496 = vector.load %arg2[%c1_282, %c0_283, %c0_284] : memref<9x4x4xf32, #tpu.memory_space<vmem>>, vector<1x4x4xf32>
    %497 = vector.shape_cast %496 : vector<1x4x4xf32> to vector<4x4xf32>
    %cst_285 = arith.constant dense<0.000000e+00> : vector<4x256xf32>
    %498 = tpu.matmul %497, %495, %cst_285 {dimension_numbers = #tpu.dot_dimension_numbers<[1], [0], [0], [1], [0, 0, 1, 1], [], []>} : vector<4x4xf32>, vector<4x256xf32>, vector<4x256xf32> -> vector<4x256xf32>
    %499 = arith.addf %491, %498 : vector<4x256xf32>
    %c15_i32_286 = arith.constant 15 : i32
    %500 = tpu.dynamic_rotate %479 by %c15_i32_286 dim 1 : vector<4x256xf32>, i32 -> vector<4x256xf32>
    %501 = vector.extract_strided_slice %2 {offsets = [2, 0], sizes = [1, 256], strides = [1, 1]} : vector<9x256xf32> to vector<1x256xf32>
    %502 = vector.broadcast %501 : vector<1x256xf32> to vector<4x256xf32>
    %503 = arith.mulf %500, %502 : vector<4x256xf32>
    %c2_287 = arith.constant 2 : index
    %c0_288 = arith.constant 0 : index
    %c0_289 = arith.constant 0 : index
    %504 = vector.load %arg2[%c2_287, %c0_288, %c0_289] : memref<9x4x4xf32, #tpu.memory_space<vmem>>, vector<1x4x4xf32>
    %505 = vector.shape_cast %504 : vector<1x4x4xf32> to vector<4x4xf32>
    %cst_290 = arith.constant dense<0.000000e+00> : vector<4x256xf32>
    %506 = tpu.matmul %505, %503, %cst_290 {dimension_numbers = #tpu.dot_dimension_numbers<[1], [0], [0], [1], [0, 0, 1, 1], [], []>} : vector<4x4xf32>, vector<4x256xf32>, vector<4x256xf32> -> vector<4x256xf32>
    %507 = arith.addf %499, %506 : vector<4x256xf32>
    %c1_i32_291 = arith.constant 1 : i32
    %508 = tpu.dynamic_rotate %479 by %c1_i32_291 dim 1 : vector<4x256xf32>, i32 -> vector<4x256xf32>
    %509 = vector.extract_strided_slice %2 {offsets = [3, 0], sizes = [1, 256], strides = [1, 1]} : vector<9x256xf32> to vector<1x256xf32>
    %510 = vector.broadcast %509 : vector<1x256xf32> to vector<4x256xf32>
    %511 = arith.mulf %508, %510 : vector<4x256xf32>
    %c3_292 = arith.constant 3 : index
    %c0_293 = arith.constant 0 : index
    %c0_294 = arith.constant 0 : index
    %512 = vector.load %arg2[%c3_292, %c0_293, %c0_294] : memref<9x4x4xf32, #tpu.memory_space<vmem>>, vector<1x4x4xf32>
    %513 = vector.shape_cast %512 : vector<1x4x4xf32> to vector<4x4xf32>
    %cst_295 = arith.constant dense<0.000000e+00> : vector<4x256xf32>
    %514 = tpu.matmul %513, %511, %cst_295 {dimension_numbers = #tpu.dot_dimension_numbers<[1], [0], [0], [1], [0, 0, 1, 1], [], []>} : vector<4x4xf32>, vector<4x256xf32>, vector<4x256xf32> -> vector<4x256xf32>
    %515 = arith.addf %507, %514 : vector<4x256xf32>
    %516 = vector.extract_strided_slice %2 {offsets = [4, 0], sizes = [1, 256], strides = [1, 1]} : vector<9x256xf32> to vector<1x256xf32>
    %517 = vector.broadcast %516 : vector<1x256xf32> to vector<4x256xf32>
    %518 = arith.mulf %479, %517 : vector<4x256xf32>
    %c4_296 = arith.constant 4 : index
    %c0_297 = arith.constant 0 : index
    %c0_298 = arith.constant 0 : index
    %519 = vector.load %arg2[%c4_296, %c0_297, %c0_298] : memref<9x4x4xf32, #tpu.memory_space<vmem>>, vector<1x4x4xf32>
    %520 = vector.shape_cast %519 : vector<1x4x4xf32> to vector<4x4xf32>
    %cst_299 = arith.constant dense<0.000000e+00> : vector<4x256xf32>
    %521 = tpu.matmul %520, %518, %cst_299 {dimension_numbers = #tpu.dot_dimension_numbers<[1], [0], [0], [1], [0, 0, 1, 1], [], []>} : vector<4x4xf32>, vector<4x256xf32>, vector<4x256xf32> -> vector<4x256xf32>
    %522 = arith.addf %515, %521 : vector<4x256xf32>
    %c255_i32_300 = arith.constant 255 : i32
    %523 = tpu.dynamic_rotate %479 by %c255_i32_300 dim 1 : vector<4x256xf32>, i32 -> vector<4x256xf32>
    %524 = vector.extract_strided_slice %2 {offsets = [5, 0], sizes = [1, 256], strides = [1, 1]} : vector<9x256xf32> to vector<1x256xf32>
    %525 = vector.broadcast %524 : vector<1x256xf32> to vector<4x256xf32>
    %526 = arith.mulf %523, %525 : vector<4x256xf32>
    %c5_301 = arith.constant 5 : index
    %c0_302 = arith.constant 0 : index
    %c0_303 = arith.constant 0 : index
    %527 = vector.load %arg2[%c5_301, %c0_302, %c0_303] : memref<9x4x4xf32, #tpu.memory_space<vmem>>, vector<1x4x4xf32>
    %528 = vector.shape_cast %527 : vector<1x4x4xf32> to vector<4x4xf32>
    %cst_304 = arith.constant dense<0.000000e+00> : vector<4x256xf32>
    %529 = tpu.matmul %528, %526, %cst_304 {dimension_numbers = #tpu.dot_dimension_numbers<[1], [0], [0], [1], [0, 0, 1, 1], [], []>} : vector<4x4xf32>, vector<4x256xf32>, vector<4x256xf32> -> vector<4x256xf32>
    %530 = arith.addf %522, %529 : vector<4x256xf32>
    %c241_i32_305 = arith.constant 241 : i32
    %531 = tpu.dynamic_rotate %479 by %c241_i32_305 dim 1 : vector<4x256xf32>, i32 -> vector<4x256xf32>
    %532 = vector.extract_strided_slice %2 {offsets = [6, 0], sizes = [1, 256], strides = [1, 1]} : vector<9x256xf32> to vector<1x256xf32>
    %533 = vector.broadcast %532 : vector<1x256xf32> to vector<4x256xf32>
    %534 = arith.mulf %531, %533 : vector<4x256xf32>
    %c6_306 = arith.constant 6 : index
    %c0_307 = arith.constant 0 : index
    %c0_308 = arith.constant 0 : index
    %535 = vector.load %arg2[%c6_306, %c0_307, %c0_308] : memref<9x4x4xf32, #tpu.memory_space<vmem>>, vector<1x4x4xf32>
    %536 = vector.shape_cast %535 : vector<1x4x4xf32> to vector<4x4xf32>
    %cst_309 = arith.constant dense<0.000000e+00> : vector<4x256xf32>
    %537 = tpu.matmul %536, %534, %cst_309 {dimension_numbers = #tpu.dot_dimension_numbers<[1], [0], [0], [1], [0, 0, 1, 1], [], []>} : vector<4x4xf32>, vector<4x256xf32>, vector<4x256xf32> -> vector<4x256xf32>
    %538 = arith.addf %530, %537 : vector<4x256xf32>
    %c240_i32_310 = arith.constant 240 : i32
    %539 = tpu.dynamic_rotate %479 by %c240_i32_310 dim 1 : vector<4x256xf32>, i32 -> vector<4x256xf32>
    %540 = vector.extract_strided_slice %2 {offsets = [7, 0], sizes = [1, 256], strides = [1, 1]} : vector<9x256xf32> to vector<1x256xf32>
    %541 = vector.broadcast %540 : vector<1x256xf32> to vector<4x256xf32>
    %542 = arith.mulf %539, %541 : vector<4x256xf32>
    %c7_311 = arith.constant 7 : index
    %c0_312 = arith.constant 0 : index
    %c0_313 = arith.constant 0 : index
    %543 = vector.load %arg2[%c7_311, %c0_312, %c0_313] : memref<9x4x4xf32, #tpu.memory_space<vmem>>, vector<1x4x4xf32>
    %544 = vector.shape_cast %543 : vector<1x4x4xf32> to vector<4x4xf32>
    %cst_314 = arith.constant dense<0.000000e+00> : vector<4x256xf32>
    %545 = tpu.matmul %544, %542, %cst_314 {dimension_numbers = #tpu.dot_dimension_numbers<[1], [0], [0], [1], [0, 0, 1, 1], [], []>} : vector<4x4xf32>, vector<4x256xf32>, vector<4x256xf32> -> vector<4x256xf32>
    %546 = arith.addf %538, %545 : vector<4x256xf32>
    %c239_i32_315 = arith.constant 239 : i32
    %547 = tpu.dynamic_rotate %479 by %c239_i32_315 dim 1 : vector<4x256xf32>, i32 -> vector<4x256xf32>
    %548 = vector.extract_strided_slice %2 {offsets = [8, 0], sizes = [1, 256], strides = [1, 1]} : vector<9x256xf32> to vector<1x256xf32>
    %549 = vector.broadcast %548 : vector<1x256xf32> to vector<4x256xf32>
    %550 = arith.mulf %547, %549 : vector<4x256xf32>
    %c8_316 = arith.constant 8 : index
    %c0_317 = arith.constant 0 : index
    %c0_318 = arith.constant 0 : index
    %551 = vector.load %arg2[%c8_316, %c0_317, %c0_318] : memref<9x4x4xf32, #tpu.memory_space<vmem>>, vector<1x4x4xf32>
    %552 = vector.shape_cast %551 : vector<1x4x4xf32> to vector<4x4xf32>
    %cst_319 = arith.constant dense<0.000000e+00> : vector<4x256xf32>
    %553 = tpu.matmul %552, %550, %cst_319 {dimension_numbers = #tpu.dot_dimension_numbers<[1], [0], [0], [1], [0, 0, 1, 1], [], []>} : vector<4x4xf32>, vector<4x256xf32>, vector<4x256xf32> -> vector<4x256xf32>
    %554 = arith.addf %546, %553 : vector<4x256xf32>
    %cst_320 = arith.constant 0.000000e+00 : f32
    %555 = vector.broadcast %cst_320 : f32 to vector<4x256xf32>
    %556 = arith.maximumf %554, %555 : vector<4x256xf32>
    %cst_321 = arith.constant 7.500000e-01 : f32
    %557 = vector.broadcast %cst_321 : f32 to vector<4x256xf32>
    %558 = arith.mulf %557, %6 : vector<4x256xf32>
    %559 = vector.broadcast %4 : vector<4x1xf32> to vector<4x256xf32>
    %560 = arith.addf %559, %558 : vector<4x256xf32>
    %c17_i32_322 = arith.constant 17 : i32
    %561 = tpu.dynamic_rotate %556 by %c17_i32_322 dim 1 : vector<4x256xf32>, i32 -> vector<4x256xf32>
    %562 = vector.extract_strided_slice %2 {offsets = [0, 0], sizes = [1, 256], strides = [1, 1]} : vector<9x256xf32> to vector<1x256xf32>
    %563 = vector.broadcast %562 : vector<1x256xf32> to vector<4x256xf32>
    %564 = arith.mulf %561, %563 : vector<4x256xf32>
    %c0_323 = arith.constant 0 : index
    %c0_324 = arith.constant 0 : index
    %c0_325 = arith.constant 0 : index
    %565 = vector.load %arg5[%c0_323, %c0_324, %c0_325] : memref<9x4x4xf32, #tpu.memory_space<vmem>>, vector<1x4x4xf32>
    %566 = vector.shape_cast %565 : vector<1x4x4xf32> to vector<4x4xf32>
    %cst_326 = arith.constant dense<0.000000e+00> : vector<4x256xf32>
    %567 = tpu.matmul %566, %564, %cst_326 {dimension_numbers = #tpu.dot_dimension_numbers<[1], [0], [0], [1], [0, 0, 1, 1], [], []>} : vector<4x4xf32>, vector<4x256xf32>, vector<4x256xf32> -> vector<4x256xf32>
    %568 = arith.addf %560, %567 : vector<4x256xf32>
    %c16_i32_327 = arith.constant 16 : i32
    %569 = tpu.dynamic_rotate %556 by %c16_i32_327 dim 1 : vector<4x256xf32>, i32 -> vector<4x256xf32>
    %570 = vector.extract_strided_slice %2 {offsets = [1, 0], sizes = [1, 256], strides = [1, 1]} : vector<9x256xf32> to vector<1x256xf32>
    %571 = vector.broadcast %570 : vector<1x256xf32> to vector<4x256xf32>
    %572 = arith.mulf %569, %571 : vector<4x256xf32>
    %c1_328 = arith.constant 1 : index
    %c0_329 = arith.constant 0 : index
    %c0_330 = arith.constant 0 : index
    %573 = vector.load %arg5[%c1_328, %c0_329, %c0_330] : memref<9x4x4xf32, #tpu.memory_space<vmem>>, vector<1x4x4xf32>
    %574 = vector.shape_cast %573 : vector<1x4x4xf32> to vector<4x4xf32>
    %cst_331 = arith.constant dense<0.000000e+00> : vector<4x256xf32>
    %575 = tpu.matmul %574, %572, %cst_331 {dimension_numbers = #tpu.dot_dimension_numbers<[1], [0], [0], [1], [0, 0, 1, 1], [], []>} : vector<4x4xf32>, vector<4x256xf32>, vector<4x256xf32> -> vector<4x256xf32>
    %576 = arith.addf %568, %575 : vector<4x256xf32>
    %c15_i32_332 = arith.constant 15 : i32
    %577 = tpu.dynamic_rotate %556 by %c15_i32_332 dim 1 : vector<4x256xf32>, i32 -> vector<4x256xf32>
    %578 = vector.extract_strided_slice %2 {offsets = [2, 0], sizes = [1, 256], strides = [1, 1]} : vector<9x256xf32> to vector<1x256xf32>
    %579 = vector.broadcast %578 : vector<1x256xf32> to vector<4x256xf32>
    %580 = arith.mulf %577, %579 : vector<4x256xf32>
    %c2_333 = arith.constant 2 : index
    %c0_334 = arith.constant 0 : index
    %c0_335 = arith.constant 0 : index
    %581 = vector.load %arg5[%c2_333, %c0_334, %c0_335] : memref<9x4x4xf32, #tpu.memory_space<vmem>>, vector<1x4x4xf32>
    %582 = vector.shape_cast %581 : vector<1x4x4xf32> to vector<4x4xf32>
    %cst_336 = arith.constant dense<0.000000e+00> : vector<4x256xf32>
    %583 = tpu.matmul %582, %580, %cst_336 {dimension_numbers = #tpu.dot_dimension_numbers<[1], [0], [0], [1], [0, 0, 1, 1], [], []>} : vector<4x4xf32>, vector<4x256xf32>, vector<4x256xf32> -> vector<4x256xf32>
    %584 = arith.addf %576, %583 : vector<4x256xf32>
    %c1_i32_337 = arith.constant 1 : i32
    %585 = tpu.dynamic_rotate %556 by %c1_i32_337 dim 1 : vector<4x256xf32>, i32 -> vector<4x256xf32>
    %586 = vector.extract_strided_slice %2 {offsets = [3, 0], sizes = [1, 256], strides = [1, 1]} : vector<9x256xf32> to vector<1x256xf32>
    %587 = vector.broadcast %586 : vector<1x256xf32> to vector<4x256xf32>
    %588 = arith.mulf %585, %587 : vector<4x256xf32>
    %c3_338 = arith.constant 3 : index
    %c0_339 = arith.constant 0 : index
    %c0_340 = arith.constant 0 : index
    %589 = vector.load %arg5[%c3_338, %c0_339, %c0_340] : memref<9x4x4xf32, #tpu.memory_space<vmem>>, vector<1x4x4xf32>
    %590 = vector.shape_cast %589 : vector<1x4x4xf32> to vector<4x4xf32>
    %cst_341 = arith.constant dense<0.000000e+00> : vector<4x256xf32>
    %591 = tpu.matmul %590, %588, %cst_341 {dimension_numbers = #tpu.dot_dimension_numbers<[1], [0], [0], [1], [0, 0, 1, 1], [], []>} : vector<4x4xf32>, vector<4x256xf32>, vector<4x256xf32> -> vector<4x256xf32>
    %592 = arith.addf %584, %591 : vector<4x256xf32>
    %593 = vector.extract_strided_slice %2 {offsets = [4, 0], sizes = [1, 256], strides = [1, 1]} : vector<9x256xf32> to vector<1x256xf32>
    %594 = vector.broadcast %593 : vector<1x256xf32> to vector<4x256xf32>
    %595 = arith.mulf %556, %594 : vector<4x256xf32>
    %c4_342 = arith.constant 4 : index
    %c0_343 = arith.constant 0 : index
    %c0_344 = arith.constant 0 : index
    %596 = vector.load %arg5[%c4_342, %c0_343, %c0_344] : memref<9x4x4xf32, #tpu.memory_space<vmem>>, vector<1x4x4xf32>
    %597 = vector.shape_cast %596 : vector<1x4x4xf32> to vector<4x4xf32>
    %cst_345 = arith.constant dense<0.000000e+00> : vector<4x256xf32>
    %598 = tpu.matmul %597, %595, %cst_345 {dimension_numbers = #tpu.dot_dimension_numbers<[1], [0], [0], [1], [0, 0, 1, 1], [], []>} : vector<4x4xf32>, vector<4x256xf32>, vector<4x256xf32> -> vector<4x256xf32>
    %599 = arith.addf %592, %598 : vector<4x256xf32>
    %c255_i32_346 = arith.constant 255 : i32
    %600 = tpu.dynamic_rotate %556 by %c255_i32_346 dim 1 : vector<4x256xf32>, i32 -> vector<4x256xf32>
    %601 = vector.extract_strided_slice %2 {offsets = [5, 0], sizes = [1, 256], strides = [1, 1]} : vector<9x256xf32> to vector<1x256xf32>
    %602 = vector.broadcast %601 : vector<1x256xf32> to vector<4x256xf32>
    %603 = arith.mulf %600, %602 : vector<4x256xf32>
    %c5_347 = arith.constant 5 : index
    %c0_348 = arith.constant 0 : index
    %c0_349 = arith.constant 0 : index
    %604 = vector.load %arg5[%c5_347, %c0_348, %c0_349] : memref<9x4x4xf32, #tpu.memory_space<vmem>>, vector<1x4x4xf32>
    %605 = vector.shape_cast %604 : vector<1x4x4xf32> to vector<4x4xf32>
    %cst_350 = arith.constant dense<0.000000e+00> : vector<4x256xf32>
    %606 = tpu.matmul %605, %603, %cst_350 {dimension_numbers = #tpu.dot_dimension_numbers<[1], [0], [0], [1], [0, 0, 1, 1], [], []>} : vector<4x4xf32>, vector<4x256xf32>, vector<4x256xf32> -> vector<4x256xf32>
    %607 = arith.addf %599, %606 : vector<4x256xf32>
    %c241_i32_351 = arith.constant 241 : i32
    %608 = tpu.dynamic_rotate %556 by %c241_i32_351 dim 1 : vector<4x256xf32>, i32 -> vector<4x256xf32>
    %609 = vector.extract_strided_slice %2 {offsets = [6, 0], sizes = [1, 256], strides = [1, 1]} : vector<9x256xf32> to vector<1x256xf32>
    %610 = vector.broadcast %609 : vector<1x256xf32> to vector<4x256xf32>
    %611 = arith.mulf %608, %610 : vector<4x256xf32>
    %c6_352 = arith.constant 6 : index
    %c0_353 = arith.constant 0 : index
    %c0_354 = arith.constant 0 : index
    %612 = vector.load %arg5[%c6_352, %c0_353, %c0_354] : memref<9x4x4xf32, #tpu.memory_space<vmem>>, vector<1x4x4xf32>
    %613 = vector.shape_cast %612 : vector<1x4x4xf32> to vector<4x4xf32>
    %cst_355 = arith.constant dense<0.000000e+00> : vector<4x256xf32>
    %614 = tpu.matmul %613, %611, %cst_355 {dimension_numbers = #tpu.dot_dimension_numbers<[1], [0], [0], [1], [0, 0, 1, 1], [], []>} : vector<4x4xf32>, vector<4x256xf32>, vector<4x256xf32> -> vector<4x256xf32>
    %615 = arith.addf %607, %614 : vector<4x256xf32>
    %c240_i32_356 = arith.constant 240 : i32
    %616 = tpu.dynamic_rotate %556 by %c240_i32_356 dim 1 : vector<4x256xf32>, i32 -> vector<4x256xf32>
    %617 = vector.extract_strided_slice %2 {offsets = [7, 0], sizes = [1, 256], strides = [1, 1]} : vector<9x256xf32> to vector<1x256xf32>
    %618 = vector.broadcast %617 : vector<1x256xf32> to vector<4x256xf32>
    %619 = arith.mulf %616, %618 : vector<4x256xf32>
    %c7_357 = arith.constant 7 : index
    %c0_358 = arith.constant 0 : index
    %c0_359 = arith.constant 0 : index
    %620 = vector.load %arg5[%c7_357, %c0_358, %c0_359] : memref<9x4x4xf32, #tpu.memory_space<vmem>>, vector<1x4x4xf32>
    %621 = vector.shape_cast %620 : vector<1x4x4xf32> to vector<4x4xf32>
    %cst_360 = arith.constant dense<0.000000e+00> : vector<4x256xf32>
    %622 = tpu.matmul %621, %619, %cst_360 {dimension_numbers = #tpu.dot_dimension_numbers<[1], [0], [0], [1], [0, 0, 1, 1], [], []>} : vector<4x4xf32>, vector<4x256xf32>, vector<4x256xf32> -> vector<4x256xf32>
    %623 = arith.addf %615, %622 : vector<4x256xf32>
    %c239_i32_361 = arith.constant 239 : i32
    %624 = tpu.dynamic_rotate %556 by %c239_i32_361 dim 1 : vector<4x256xf32>, i32 -> vector<4x256xf32>
    %625 = vector.extract_strided_slice %2 {offsets = [8, 0], sizes = [1, 256], strides = [1, 1]} : vector<9x256xf32> to vector<1x256xf32>
    %626 = vector.broadcast %625 : vector<1x256xf32> to vector<4x256xf32>
    %627 = arith.mulf %624, %626 : vector<4x256xf32>
    %c8_362 = arith.constant 8 : index
    %c0_363 = arith.constant 0 : index
    %c0_364 = arith.constant 0 : index
    %628 = vector.load %arg5[%c8_362, %c0_363, %c0_364] : memref<9x4x4xf32, #tpu.memory_space<vmem>>, vector<1x4x4xf32>
    %629 = vector.shape_cast %628 : vector<1x4x4xf32> to vector<4x4xf32>
    %cst_365 = arith.constant dense<0.000000e+00> : vector<4x256xf32>
    %630 = tpu.matmul %629, %627, %cst_365 {dimension_numbers = #tpu.dot_dimension_numbers<[1], [0], [0], [1], [0, 0, 1, 1], [], []>} : vector<4x4xf32>, vector<4x256xf32>, vector<4x256xf32> -> vector<4x256xf32>
    %631 = arith.addf %623, %630 : vector<4x256xf32>
    %cst_366 = arith.constant 2.500000e-01 : f32
    %632 = vector.broadcast %cst_366 : f32 to vector<4x256xf32>
    %633 = arith.mulf %632, %631 : vector<4x256xf32>
    %634 = arith.addf %477, %633 : vector<4x256xf32>
    %c0_367 = arith.constant 0 : index
    %c0_368 = arith.constant 0 : index
    %c0_369 = arith.constant 0 : index
    %635 = vector.load %arg9[%c0_367, %c0_368, %c0_369] : memref<1x4x256xf32, #tpu.memory_space<vmem>>, vector<1x4x256xf32>
    %636 = vector.shape_cast %635 : vector<1x4x256xf32> to vector<4x256xf32>
    %637 = vector.shape_cast %634 : vector<4x256xf32> to vector<1x4x256xf32>
    tpu.vector_store %arg9[%c0_367, %c0_368, %c0_369], %637 {strides = array<i32>} : memref<1x4x256xf32, #tpu.memory_space<vmem>>, vector<1x4x256xf32>,
    return
  }
  func.func @transform_0(%arg0: i32) -> (i32, i32, i32) {
    %c0_i32 = arith.constant 0 : i32
    %c0_i32_0 = arith.constant 0 : i32
    %c0_i32_1 = arith.constant 0 : i32
    return %arg0, %c0_i32, %c0_i32_0 : i32, i32, i32
  }
  func.func @transform_1(%arg0: i32) -> (i32, i32, i32) {
    %c0_i32 = arith.constant 0 : i32
    %c0_i32_0 = arith.constant 0 : i32
    %c0_i32_1 = arith.constant 0 : i32
    %c0_i32_2 = arith.constant 0 : i32
    return %c0_i32, %c0_i32_0, %c0_i32_1 : i32, i32, i32
  }
  func.func @transform_2(%arg0: i32) -> (i32, i32) {
    %c0_i32 = arith.constant 0 : i32
    %c0_i32_0 = arith.constant 0 : i32
    %c0_i32_1 = arith.constant 0 : i32
    return %c0_i32, %c0_i32_0 : i32, i32
  }
  func.func @transform_3(%arg0: i32) -> (i32, i32) {
    %c0_i32 = arith.constant 0 : i32
    %c0_i32_0 = arith.constant 0 : i32
    %c0_i32_1 = arith.constant 0 : i32
    return %c0_i32, %c0_i32_0 : i32, i32
  }
  func.func @transform_4(%arg0: i32) -> (i32, i32, i32) {
    %c0_i32 = arith.constant 0 : i32
    %c0_i32_0 = arith.constant 0 : i32
    %c0_i32_1 = arith.constant 0 : i32
    %c0_i32_2 = arith.constant 0 : i32
    return %c0_i32, %c0_i32_0, %c0_i32_1 : i32, i32, i32
  }
  func.func @transform_5(%arg0: i32) -> (i32, i32) {
    %c0_i32 = arith.constant 0 : i32
    %c0_i32_0 = arith.constant 0 : i32
    %c0_i32_1 = arith.constant 0 : i32
    return %c0_i32, %c0_i32_0 : i32, i32
  }
  func.func @transform_6(%arg0: i32) -> (i32, i32) {
    %c0_i32 = arith.constant 0 : i32
    %c0_i32_0 = arith.constant 0 : i32
    %c0_i32_1 = arith.constant 0 : i32
    return %c0_i32, %c0_i32_0 : i32, i32
  }
  func.func @transform_7(%arg0: i32) -> (i32, i32) {
    %c0_i32 = arith.constant 0 : i32
    %c0_i32_0 = arith.constant 0 : i32
    %c0_i32_1 = arith.constant 0 : i32
    return %c0_i32, %c0_i32_0 : i32, i32
  }
  func.func @transform_8(%arg0: i32) -> (i32, i32, i32) {
    %c0_i32 = arith.constant 0 : i32
    %c0_i32_0 = arith.constant 0 : i32
    %c0_i32_1 = arith.constant 0 : i32
    return %arg0, %c0_i32, %c0_i32_0 : i32, i32, i32
  }
}

</mosaic_0001>

<bundles_post_ra>
// kernel: ode_block_forward.1
= control target key start
LH: loop header
LB: loop body
LE: loop exit
PB: predicated region body
PF: predicated region fallthrough
CT: control target
= control target key end

     0   :  { %s7220_s27 = smov 0   ;;  %s8493_s0 = inlined_call_operand.vmem [shape: f32[2,4,256], index: 0, kind: input, shape index: {}]   ;;  %s8494_s1 = inlined_call_operand.vmem [shape: f32[9,4,4], index: 1, kind: input, shape index: {}]   ;;  %s8495_s2 = inlined_call_operand.vmem [shape: f32[4,1], index: 2, kind: input, shape index: {}]   ;;  %s8496_s3 = inlined_call_operand.vmem [shape: f32[4,256], index: 3, kind: input, shape index: {}]   ;;  %s8497_s4 = inlined_call_operand.vmem [shape: f32[9,4,4], index: 4, kind: input, shape index: {}]   ;;  %s8498_s5 = inlined_call_operand.vmem [shape: f32[4,1], index: 5, kind: input, shape index: {}]   ;;  %s8499_s6 = inlined_call_operand.vmem [shape: f32[4,256], index: 6, kind: input, shape index: {}]   ;;  %s8500_s7 = inlined_call_operand.vmem [shape: f32[9,256], index: 7, kind: input, shape index: {}]   ;;  %s8501_s8 = inlined_call_operand.vmem [shape: f32[2,4,256], index: 8, kind: output, shape index: {}]  }
   0x1 LB: > { %s6869_s28 = sadd.s32 4294967295, %s7163_s27   ;;  %p6873_p0 = scmp.ge.s32.totalorder %s7163_s27, 1  ;;  %s7163_s27 = sphi %s7220_s27, %s18_s27  }
   0x2   : > { %p262_p1 = scmp.lt.s32.totalorder %s7163_s27, 3 }
   0x4   : > { %p263_p2 = pnand %p6873_p0, %p262_p1 }
   0x6   : > { %266 = sbr.rel (%p263_p2) target bundleno = 2826 (0xb0a), region = 52 }
   0xb   : > { %p296_p3 = scmp.lt.s32.totalorder %s6869_s28, 1  ;;  %s7165_s11 = smov 16   ;;  %v8502_v3 = vmov 0.0   ;;  %v7172_v4 = vmov 0   ;;  %v311_v5 = vld [vmem:[%s8495_s2] sm:$0xf]  ;;  %v334_v6 = vlaneseq }
   0xc   : > { %s7166_s12 = smov 17   ;;  %425 = vmatprep.mubr.f32.mxu0 %v8502_v3  ;;  %526 = vmatprep.mubr.f32.mxu1 %v8502_v3  ;;  %s7168_s13 = smov 15   ;;  %v7281_v11 = vld [vmem:[%s8500_s7 + $0x8] sm:$0xff]  ;;  %v7286_v12 = vld [vmem:[%s8500_s7] sm:$0xff]  ;;  %vm354_vm1 = vcmask 1043456   ;;  %vm350_vm5 = vcmask 31744  }
   0xd   : > { %s8539_s28 = smov (!%p296_p3, %s6869_s28), 1  ;;  %s7169_s14 = smov 1   ;;  %7134 = vset.pattern.permute.xlu0 %v7172_v4  ;;  %v7272_v7 = vshrl.u32 %v334_v6, 7  ;;  %v7275_v9 = vand.u32 127, %v334_v6  ;;  %v7331_v33 = vld [vmem:[%s8494_s1 + $0x4] sm:$0xf] }
   0xe   : > { %s7114_s29 = sshll.u32 %s8539_s28, 3  ;;  %s7170_s15 = smov 127   ;;  %v7360_v46 = vld [vmem:[%s8494_s1] sm:$0xf]  ;;  %v7389_v59 = vld [vmem:[%s8494_s1 + $0x8] sm:$0xf] }
   0xf   : > { %s300_s10 = scalar_lea.vmem %s8493_s0, %s7114_s29  ;;  %s7171_s16 = smov 113   ;;  %v739_v8 = vsub.s32 4, %v7272_v7  ;;  %v443_v10 = vsub.s32 1, %v7272_v7  ;;  %vm438_vm0 = vcmp.lt.s32.totalorder %v7275_v9, 16  ;;  %v341_v19 = vsub.s32 0, %v7272_v7 }
  0x10   : > { %v7236_v0 = vld [vmem:[%s300_s10] sm:$0xff]  ;;  %s7173_s17 = smov 112   ;;  %s7174_s18 = smov 111   ;;  %v544_v20 = vsub.s32 2, %v7272_v7  ;;  %v645_v23 = vsub.s32 3, %v7272_v7  ;;  %vm539_vm2 = vcmp.lt.s32.totalorder %v7275_v9, 15 }
  0x11   : > { %v7239_v1 = vmax.f32 %v7236_v0, 0.0  ;;  %v7289_v15 = vrot.slane %v7286_v12, %v739_v8  ;;  %v7292_v16 = vrot.slane %v7281_v11, %v739_v8  ;;  %v7296_v17 = vrot.slane %v7281_v11, %v443_v10  ;;  %v7394_v60 = vld [vmem:[%s8494_s1 + $0xc] sm:$0xf] }
  0x12   : > { %v7299_v18 = vrot.slane %v7286_v12, %v443_v10  ;;  %vm336_vm3 = vcmp.lt.s32.totalorder %v7275_v9, 17  ;;  %v7317_v29 = vrot.slane %v7281_v11, %v341_v19  ;;  %v7320_v30 = vrot.slane %v7286_v12, %v341_v19  ;;  %v7427_v10 = vld [vmem:[%s8494_s1 + $0x14] sm:$0xf] }
  0x13   : > { %434 = vrot.lane.b32.xlu1 %v7239_v1, %s7165_s11  ;;  %330 = vrot.lane.b32.xlu0 %v7239_v1, %s7166_s12  ;;  %v328_v2 = vcombine.high %v7239_v1, %v7239_v1  ;;  %v7306_v24 = vcombine.low %v7289_v15, %v7292_v16  ;;  %v7323_v31 = vrot.slane %v7286_v12, %v544_v20  ;;  %vm640_vm4 = vcmp.lt.s32.totalorder %v7275_v9, 1 }
  0x14   : > { %v7326_v32 = vrot.slane %v7281_v11, %v544_v20  ;;  %v7336_v36 = vrot.slane %v7286_v12, %v645_v23  ;;  %v843_v37 = vsub.s32 5, %v7272_v7  ;;  %v7352_v44 = vrot.slane %v7281_v11, %v645_v23 }
  0x15   : > { %v749_v38 = vmul.f32 %v7306_v24, %v7239_v1  ;;  %v944_v55 = vsub.s32 6, %v7272_v7  ;;  %vm838_vm6 = vcmp.lt.s32.totalorder %v7275_v9, 127  ;;  %v1045_v4 = vsub.s32 7, %v7272_v7  ;;  %v7422_v7 = vld [vmem:[%s8494_s1 + $0x10] sm:$0xf] }
  0x16   : > { %v7366_v50 = vrot.slane %v7286_v12, %v843_v37  ;;  %v7382_v58 = vrot.slane %v7281_v11, %v843_v37  ;;  %vm939_vm7 = vcmp.lt.s32.totalorder %v7275_v9, 113  ;;  %vm1040_vm8 = vcmp.lt.s32.totalorder %v7275_v9, 112  ;;  %v7470_v37 = vld [vmem:[%s8500_s7 + $0x10] ss:$0 sm:$0xff] }
  0x17   : > { %535 = vrot.lane.b32.xlu0 %v7239_v1, %s7168_s13  ;;  %436 = vrot.lane.b32.xlu1 %v328_v2, %s7165_s11  ;;  %v753_v51 = vcombine.high %v749_v38, %v749_v38  ;;  %v7413_v8 = vrot.slane %v7281_v11, %v944_v55  ;;  %vm1141_vm9 = vcmp.lt.s32.totalorder %v7275_v9, 111 }
  0x1b   : > { %537 = vrot.lane.b32.xlu1 %v328_v2, %s7168_s13  ;;  %332 = vrot.lane.b32.xlu0 %v328_v2, %s7166_s12 }
  0x1f   : > { %638 = vrot.lane.b32.xlu1 %v328_v2, %s7169_s14  ;;  %636 = vrot.lane.b32.xlu0 %v7239_v1, %s7169_s14 }
  0x23   : > { %836 = vrot.lane.b32.xlu1 %v328_v2, %s7170_s15  ;;  %834 = vrot.lane.b32.xlu0 %v7239_v1, %s7170_s15 }
  0x27   : > { %937 = vrot.lane.b32.xlu1 %v328_v2, %s7171_s16  ;;  %935 = vrot.lane.b32.xlu0 %v7239_v1, %s7171_s16 }
  0x2b   : > { %1038 = vrot.lane.b32.xlu1 %v328_v2, %s7173_s17  ;;  %1036 = vrot.lane.b32.xlu0 %v7239_v1, %s7173_s17 }
  0x2f   : > { %1139 = vrot.lane.b32.xlu1 %v328_v2, %s7174_s18  ;;  %1137 = vrot.lane.b32.xlu0 %v7239_v1, %s7174_s18  ;;  %v7404_v2 = vrot.slane %v7286_v12, %v944_v55 }
  0x33   : > { %319 = vperm.xlu0 %7134, %v311_v5  }
  0x85   : > { %v435_v13 = vpop.permute.xlu1 %434  ;;  %v331_v14 = vpop.permute.xlu0 %330 }
  0x89   : > { %v536_v21 = vpop.permute.xlu0 %535  ;;  %v437_v22 = vpop.permute.xlu1 %436 }
  0x8a   : > { %v440_v25 = vsel %vm438_vm0, %v437_v22, %v435_v13  ;;  %v439_v26 = vsel %vm438_vm0, %v435_v13, %v437_v22 }
  0x8b   : > { %v450_v27 = vmul.f32 %v7296_v17, %v439_v26  ;;  %v449_v28 = vmul.f32 %v7299_v18, %v440_v25  ;;  %v7445_v25 = vrot.slane %v7281_v11, %v1045_v4 }
  0x8d   : > { %6882 = vmatprep.subr.msk.mxu1 %vm354_vm1, %v450_v27  ;;  %v538_v34 = vpop.permute.xlu1 %537  ;;  %v333_v35 = vpop.permute.xlu0 %332 }
  0x8e   : > { %v540_v39 = vsel %vm539_vm2, %v536_v21, %v538_v34  ;;  %v338_v40 = vsel %vm336_vm3, %v333_v35, %v331_v14  ;;  %6883 = vmatpush1.msk.msra.mxu1 %vm354_vm1, %v449_v28  ;;  %v337_v41 = vsel %vm336_vm3, %v331_v14, %v333_v35  ;;  %v541_v42 = vsel %vm539_vm2, %v538_v34, %v536_v21 }
  0x8f   : > { %v348_v43 = vmul.f32 %v7317_v29, %v337_v41  ;;  %v347_v45 = vmul.f32 %v7320_v30, %v338_v40  ;;  %6884 = vmatmul.mubr.msk.f32.vlgmr.msra.gmra.mxu1 %vm350_vm5, %v7331_v33  ;;  %v551_v47 = vmul.f32 %v7326_v32, %v540_v39  ;;  %v550_v52 = vmul.f32 %v7323_v31, %v541_v42  ;;  %v7480_v39 = vld [vmem:[%s8494_s1 + $0x1c] sm:$0xf] }
  0x90   : > { %728 = vmatprep.mubr.f32.mxu1 %v8502_v3  ;;  %v7437_v21 = vrot.slane %v7286_v12, %v1045_v4  ;;  %v7453_v12 = vld [vmem:[%s8494_s1 + $0x18] sm:$0xf] }
  0x91   : > { %v639_v48 = vpop.permute.xlu1 %638  ;;  %6878 = vmatprep.subr.msk.mxu0 %vm354_vm1, %v348_v43  ;;  %v637_v49 = vpop.permute.xlu0 %636 }
  0x92   : > { %v641_v53 = vsel %vm640_vm4, %v637_v49, %v639_v48  ;;  %v642_v54 = vsel %vm640_vm4, %v639_v48, %v637_v49  ;;  %6879 = vmatpush1.msk.msra.mxu0 %vm354_vm1, %v347_v45  ;;  %v7496_v48 = vld [vmem:[%s8494_s1 + $0x20] sm:$0xf] }
  0x93   : > { %v651_v56 = vmul.f32 %v7336_v36, %v642_v54  ;;  %v652_v57 = vmul.f32 %v7352_v44, %v641_v53  ;;  %6886 = vmatprep.subr.msk.mxu0 %vm354_vm1, %v551_v47  ;;  %6880 = vmatmul.mubr.msk.f32.vlgmr.msra.gmra.mxu0 %vm350_vm5, %v7360_v46  ;;  %v7507_v49 = vld [vmem:[%s8496_s3] sm:$0xff] }
  0x94   : > { %6887 = vmatpush1.msk.msra.mxu0 %vm354_vm1, %v550_v52  ;;  %627 = vmatprep.mubr.f32.mxu0 %v8502_v3 }
  0x95   : > { %v837_v61 = vpop.permute.xlu1 %836  ;;  %6890 = vmatprep.subr.msk.mxu1 %vm354_vm1, %v652_v57  ;;  %v835_v62 = vpop.permute.xlu0 %834  ;;  %6894 = vmatprep.subr.msk.mxu0 %vm354_vm1, %v753_v51  ;;  %v316_v51 = vmul.f32 0.0, %v7507_v49 }
  0x96   : > { %v839_v63 = vsel %vm838_vm6, %v835_v62, %v837_v61  ;;  %v840_v1 = vsel %vm838_vm6, %v837_v61, %v835_v62  ;;  %6891 = vmatpush1.msk.msra.mxu1 %vm354_vm1, %v651_v56 }
  0x97   : > { %v849_v5 = vmul.f32 %v7366_v50, %v839_v63  ;;  %v850_v6 = vmul.f32 %v7382_v58, %v840_v1  ;;  %6888 = vmatmul.mubr.msk.f32.vlgmr.msra.gmra.mxu0 %vm350_vm5, %v7389_v59  ;;  %6892 = vmatmul.mubr.msk.f32.vlgmr.msra.gmra.mxu1 %vm350_vm5, %v7394_v60  ;;  %v323_v53 = vcombine.high %v316_v51, %v316_v51 }
  0x98   : > { %6895 = vmatpush1.msk.msra.mxu0 %vm354_vm1, %v749_v38  ;;  %825 = vmatprep.mubr.f32.mxu0 %v8502_v3  ;;  %v7475_v38 = vld [vmem:[%s8500_s7 + $0x18] ss:$0 sm:$0xff] }
  0x99   : > { %v938_v13 = vpop.permute.xlu1 %937  ;;  %6898 = vmatprep.subr.msk.mxu1 %vm354_vm1, %v850_v6  ;;  %v936_v14 = vpop.permute.xlu0 %935  ;;  %926 = vmatprep.mubr.f32.mxu1 %v8502_v3 }
  0x9a   : > { %v940_v19 = vsel %vm939_vm7, %v936_v14, %v938_v13  ;;  %v941_v20 = vsel %vm939_vm7, %v938_v13, %v936_v14  ;;  %6899 = vmatpush1.msk.msra.mxu1 %vm354_vm1, %v849_v5 }
  0x9b   : > { %v950_v22 = vmul.f32 %v7404_v2, %v940_v19  ;;  %v951_v23 = vmul.f32 %v7413_v8, %v941_v20  ;;  %6896 = vmatmul.mubr.msk.f32.vlgmr.msra.gmra.mxu0 %vm350_vm5, %v7422_v7  ;;  %6900 = vmatmul.mubr.msk.f32.vlgmr.msra.gmra.mxu1 %vm350_vm5, %v7427_v10 }
  0x9c   : > { %1027 = vmatprep.mubr.f32.mxu0 %v8502_v3  ;;  %1128 = vmatprep.mubr.f32.mxu1 %v8502_v3 }
  0x9d   : > { %v1039_v26 = vpop.permute.xlu1 %1038  ;;  %6902 = vmatprep.subr.msk.mxu0 %vm354_vm1, %v951_v23  ;;  %v1037_v27 = vpop.permute.xlu0 %1036 }
  0x9e   : > { %v1041_v11 = vsel %vm1040_vm8, %v1037_v27, %v1039_v26  ;;  %v1042_v28 = vsel %vm1040_vm8, %v1039_v26, %v1037_v27  ;;  %6903 = vmatpush1.msk.msra.mxu0 %vm354_vm1, %v950_v22 }
  0x9f   : > { %v1051_v34 = vmul.f32 %v7437_v21, %v1041_v11  ;;  %v1052_v35 = vmul.f32 %v7445_v25, %v1042_v28  ;;  %6904 = vmatmul.mubr.msk.f32.vlgmr.msra.gmra.mxu0 %vm350_vm5, %v7453_v12 }
  0xa0   : > { %1229 = vmatprep.mubr.f32.mxu0 %v8502_v3 }
  0xa1   : > { %v1140_v40 = vpop.permute.xlu1 %1139  ;;  %6906 = vmatprep.subr.msk.mxu1 %vm354_vm1, %v1052_v35  ;;  %v1138_v41 = vpop.permute.xlu0 %1137 }
  0xa2   : > { %v1142_v42 = vsel %vm1141_vm9, %v1138_v41, %v1140_v40  ;;  %v1143_v43 = vsel %vm1141_vm9, %v1140_v40, %v1138_v41  ;;  %6907 = vmatpush1.msk.msra.mxu1 %vm354_vm1, %v1051_v34 }
  0xa3   : > { %v1152_v45 = vmul.f32 %v7470_v37, %v1142_v42  ;;  %v1153_v47 = vmul.f32 %v7475_v38, %v1143_v43  ;;  %6908 = vmatmul.mubr.msk.f32.vlgmr.msra.gmra.mxu1 %vm350_vm5, %v7480_v39 }
  0xa4   : > { %1333 = vmatprep.mubr.f32.mxu1 %v8502_v3 }
  0xa5   : > { %6912 = vmatprep.subr.msk.mxu0 %vm354_vm1, %v1153_v47 }
  0xa6   : > { %6913 = vmatpush1.msk.msra.mxu0 %vm354_vm1, %v1152_v45 }
  0xa7   : > { %6914 = vmatmul.mubr.msk.f32.vlgmr.msra.gmra.mxu0 %vm350_vm5, %v7496_v48 }
  0xa8   : > { %1425 = vmatprep.mubr.f32.mxu0 %v8502_v3 }
  0xae   : > { %v7510_v52 = vpop.permute.xlu0 %319 }
  0xaf   : > { %v325_v55 = vadd.f32 %v7510_v52, %v316_v51  ;;  %v326_v56 = vadd.f32 %v323_v53, %v7510_v52 }
 0x14f   : > { %v528_v54 = vpop.f32.mrf.mxu1 }
 0x151   : > { %v530_v61 = vpop.f32.mrf.mxu1 }
 0x153   : > { %v427_v57 = vpop.f32.mrf.mxu0 }
 0x154   : > { %v432_v62 = vadd.f32 %v427_v57, %v325_v55 }
 0x155   : > { %v429_v63 = vpop.f32.mrf.mxu0 }
 0x156   : > { %v433_v1 = vadd.f32 %v429_v63, %v326_v56  ;;  %v533_v4 = vadd.f32 %v528_v54, %v432_v62 }
 0x157   : > { %v629_v5 = vpop.f32.mrf.mxu0  ;;  %v730_v6 = vpop.f32.mrf.mxu1 }
 0x158   : > { %v534_v13 = vadd.f32 %v530_v61, %v433_v1  ;;  %v634_v14 = vadd.f32 %v629_v5, %v533_v4  ;;  %v312_v5 = vld [vmem:[%s8498_s5] sm:$0xf] }
 0x159   : > { %v631_v19 = vpop.f32.mrf.mxu0  ;;  %v732_v20 = vpop.f32.mrf.mxu1 }
 0x15a   : > { %v635_v22 = vadd.f32 %v631_v19, %v534_v13  ;;  %v735_v23 = vadd.f32 %v730_v6, %v634_v14 }
 0x15b   : > { %v827_v26 = vpop.f32.mrf.mxu0  ;;  %v928_v27 = vpop.f32.mrf.mxu1 }
 0x15c   : > { %v736_v11 = vadd.f32 %v732_v20, %v635_v22  ;;  %v832_v28 = vadd.f32 %v827_v26, %v735_v23 }
 0x15d   : > { %v829_v34 = vpop.f32.mrf.mxu0  ;;  %v930_v35 = vpop.f32.mrf.mxu1 }
 0x15e   : > { %v833_v40 = vadd.f32 %v829_v34, %v736_v11  ;;  %v933_v41 = vadd.f32 %v928_v27, %v832_v28  ;;  %v7542_v27 = vld [vmem:[%s8497_s4] sm:$0xf] }
 0x15f   : > { %v1029_v42 = vpop.f32.mrf.mxu0 }
 0x160   : > { %v934_v43 = vadd.f32 %v930_v35, %v833_v40  ;;  %v1034_v45 = vadd.f32 %v1029_v42, %v933_v41  ;;  %v7557_v42 = vld [vmem:[%s8497_s4 + $0x4] sm:$0xf] }
 0x161   : > { %v1031_v47 = vpop.f32.mrf.mxu0 }
 0x162   : > { %v1035_v53 = vadd.f32 %v1031_v47, %v934_v43 }
 0x163   : > { %v1130_v51 = vpop.f32.mrf.mxu1 }
 0x164   : > { %v1135_v54 = vadd.f32 %v1130_v51, %v1034_v45 }
 0x165   : > { %v1132_v55 = vpop.f32.mrf.mxu1 }
 0x166   : > { %v1136_v57 = vadd.f32 %v1132_v55, %v1035_v53  ;;  %v7573_v55 = vld [vmem:[%s8497_s4 + $0x8] sm:$0xf] }
 0x167   : > { %v1231_v56 = vpop.f32.mrf.mxu0 }
 0x168   : > { %v1236_v61 = vadd.f32 %v1231_v56, %v1135_v54 }
 0x169   : > { %v1233_v62 = vpop.f32.mrf.mxu0 }
 0x16a   : > { %v1238_v63 = vmax.f32 %v1236_v61, 0.0  ;;  %v1237_v1 = vadd.f32 %v1233_v62, %v1136_v57 }
 0x16c   : > { %1342 = vrot.lane.b32.xlu0 %v1238_v63, %s7165_s11  ;;  %1251 = vrot.lane.b32.xlu1 %v1238_v63, %s7166_s12  ;;  %v1239_v4 = vmax.f32 %v1237_v1, 0.0  ;;  %v1618_v1 = vmul.f32 %v1238_v63, %v7289_v15 }
 0x16e   : > { %v1619_v57 = vmul.f32 %v1239_v4, %v7292_v16 }
 0x170   : > { %1434 = vrot.lane.b32.xlu0 %v1238_v63, %s7168_s13  ;;  %1253 = vrot.lane.b32.xlu1 %v1239_v4, %s7166_s12 }
 0x174   : > { %1526 = vrot.lane.b32.xlu0 %v1238_v63, %s7169_s14  ;;  %1344 = vrot.lane.b32.xlu1 %v1239_v4, %s7165_s11 }
 0x178   : > { %1704 = vrot.lane.b32.xlu0 %v1238_v63, %s7170_s15  ;;  %1436 = vrot.lane.b32.xlu1 %v1239_v4, %s7168_s13 }
 0x17c   : > { %1796 = vrot.lane.b32.xlu0 %v1238_v63, %s7171_s16  ;;  %1528 = vrot.lane.b32.xlu1 %v1239_v4, %s7169_s14 }
 0x180   : > { %1888 = vrot.lane.b32.xlu0 %v1238_v63, %s7173_s17  ;;  %1706 = vrot.lane.b32.xlu1 %v1239_v4, %s7170_s15 }
 0x184   : > { %1980 = vrot.lane.b32.xlu0 %v1238_v63, %s7174_s18  ;;  %1798 = vrot.lane.b32.xlu1 %v1239_v4, %s7171_s16  ;;  %v7599_v63 = vld [vmem:[%s8497_s4 + $0x10] sm:$0xf] }
 0x188   : > { %1243 = vperm.xlu0 %7134, %v312_v5   ;;  %1890 = vrot.lane.b32.xlu1 %v1239_v4, %s7173_s17 }
 0x18c   : > { %1982 = vrot.lane.b32.xlu1 %v1239_v4, %s7174_s18  ;;  %v7593_v4 = vld [vmem:[%s8497_s4 + $0xc] sm:$0xf] }
 0x1de   : > { %v1343_v6 = vpop.permute.xlu0 %1342  ;;  %v1252_v13 = vpop.permute.xlu1 %1251 }
 0x1e2   : > { %v1435_v14 = vpop.permute.xlu0 %1434  ;;  %v1254_v19 = vpop.permute.xlu1 %1253 }
 0x1e3   : > { %v1255_v20 = vsel %vm336_vm3, %v1252_v13, %v1254_v19  ;;  %v1256_v22 = vsel %vm336_vm3, %v1254_v19, %v1252_v13 }
 0x1e4   : > { %v1257_v23 = vmul.f32 %v1256_v22, %v7320_v30  ;;  %v1258_v26 = vmul.f32 %v1255_v20, %v7317_v29 }
 0x1e6   : > { %v1527_v11 = vpop.permute.xlu0 %1526  ;;  %6915 = vmatprep.subr.msk.mxu1 %vm354_vm1, %v1258_v26  ;;  %v1345_v28 = vpop.permute.xlu1 %1344  ;;  %v7617_v26 = vld [vmem:[%s8497_s4 + $0x14] sm:$0xf] }
 0x1e7   : > { %v1346_v34 = vsel %vm438_vm0, %v1343_v6, %v1345_v28  ;;  %v1347_v35 = vsel %vm438_vm0, %v1345_v28, %v1343_v6  ;;  %6916 = vmatpush1.msk.msra.mxu1 %vm354_vm1, %v1257_v23 }
 0x1e8   : > { %v1348_v40 = vmul.f32 %v1347_v35, %v7299_v18  ;;  %v1349_v41 = vmul.f32 %v1346_v34, %v7296_v17  ;;  %6917 = vmatmul.mubr.msk.f32.vlgmr.msra.gmra.mxu1 %vm350_vm5, %v7542_v27 }
 0x1e9   : > { %1517 = vmatprep.mubr.f32.mxu1 %v8502_v3 }
 0x1ea   : > { %6919 = vmatprep.subr.msk.mxu0 %vm354_vm1, %v1349_v41  ;;  %v1437_v43 = vpop.permute.xlu1 %1436  ;;  %v1705_v51 = vpop.permute.xlu0 %1704 }
 0x1eb   : > { %v1438_v45 = vsel %vm539_vm2, %v1435_v14, %v1437_v43  ;;  %v1439_v47 = vsel %vm539_vm2, %v1437_v43, %v1435_v14  ;;  %6920 = vmatpush1.msk.msra.mxu0 %vm354_vm1, %v1348_v40  ;;  %v7633_v43 = vld [vmem:[%s8497_s4 + $0x18] sm:$0xf] }
 0x1ec   : > { %v1440_v53 = vmul.f32 %v1439_v47, %v7323_v31  ;;  %v1441_v54 = vmul.f32 %v1438_v45, %v7326_v32  ;;  %6921 = vmatmul.mubr.msk.f32.vlgmr.msra.gmra.mxu0 %vm350_vm5, %v7557_v42  ;;  %8516 = vst [vmem:[#allocation2_spill] sm:$0xff] %v7633_v43 }
 0x1ed   : > { %1609 = vmatprep.mubr.f32.mxu0 %v8502_v3 }
 0x1ee   : > { %6923 = vmatprep.subr.msk.mxu1 %vm354_vm1, %v1441_v54  ;;  %v1529_v56 = vpop.permute.xlu1 %1528  ;;  %v1797_v13 = vpop.permute.xlu0 %1796 }
 0x1ef   : > { %v1530_v61 = vsel %vm640_vm4, %v1527_v11, %v1529_v56  ;;  %v1531_v62 = vsel %vm640_vm4, %v1529_v56, %v1527_v11  ;;  %6924 = vmatpush1.msk.msra.mxu1 %vm354_vm1, %v1440_v53  ;;  %v7649_v56 = vld [vmem:[%s8497_s4 + $0x1c] sm:$0xf] }
 0x1f0   : > { %v1532_v5 = vmul.f32 %v1531_v62, %v7336_v36  ;;  %v1533_v6 = vmul.f32 %v1530_v61, %v7352_v44  ;;  %6925 = vmatmul.mubr.msk.f32.vlgmr.msra.gmra.mxu1 %vm350_vm5, %v7573_v55  ;;  %6931 = vmatprep.subr.msk.mxu1 %vm354_vm1, %v1619_v57  ;;  %8517 = vst [vmem:[#allocation3_spill] sm:$0xff] %v7649_v56 }
 0x1f1   : > { %6932 = vmatpush1.msk.msra.mxu1 %vm354_vm1, %v1618_v1  ;;  %1695 = vmatprep.mubr.f32.mxu1 %v8502_v3 }
 0x1f2   : > { %6927 = vmatprep.subr.msk.mxu0 %vm354_vm1, %v1533_v6  ;;  %v1707_v14 = vpop.permute.xlu1 %1706  ;;  %v1889_v35 = vpop.permute.xlu0 %1888 }
 0x1f3   : > { %v1708_v19 = vsel %vm838_vm6, %v1705_v51, %v1707_v14  ;;  %v1709_v20 = vsel %vm838_vm6, %v1707_v14, %v1705_v51  ;;  %6928 = vmatpush1.msk.msra.mxu0 %vm354_vm1, %v1532_v5  ;;  %v7676_v14 = vld [vmem:[%s8499_s6] sm:$0xff] }
 0x1f4   : > { %v1710_v22 = vmul.f32 %v1708_v19, %v7366_v50  ;;  %v1711_v23 = vmul.f32 %v1709_v20, %v7382_v58  ;;  %6929 = vmatmul.mubr.msk.f32.vlgmr.msra.gmra.mxu0 %vm350_vm5, %v7593_v4  ;;  %6933 = vmatmul.mubr.msk.f32.vlgmr.msra.gmra.mxu1 %vm350_vm5, %v7599_v63  ;;  %8519 = vst [vmem:[#allocation5_spill] sm:$0xff] %v7676_v14  ;;  %v1240_v19 = vmul.f32 0.0, %v7676_v14 }
 0x1f5   : > { %1787 = vmatprep.mubr.f32.mxu0 %v8502_v3  ;;  %1879 = vmatprep.mubr.f32.mxu1 %v8502_v3 }
 0x1f6   : > { %6935 = vmatprep.subr.msk.mxu0 %vm354_vm1, %v1711_v23  ;;  %v1799_v11 = vpop.permute.xlu1 %1798  ;;  %v1981_v57 = vpop.permute.xlu0 %1980  ;;  %v1247_v23 = vcombine.high %v1240_v19, %v1240_v19 }
 0x1f7   : > { %v1800_v28 = vsel %vm939_vm7, %v1797_v13, %v1799_v11  ;;  %v1801_v34 = vsel %vm939_vm7, %v1799_v11, %v1797_v13  ;;  %6936 = vmatpush1.msk.msra.mxu0 %vm354_vm1, %v1710_v22  ;;  %v7665_v13 = vld [vmem:[%s8497_s4 + $0x20] sm:$0xf] }
 0x1f8   : > { %v1802_v40 = vmul.f32 %v1800_v28, %v7404_v2  ;;  %v1803_v41 = vmul.f32 %v1801_v34, %v7413_v8  ;;  %6937 = vmatmul.mubr.msk.f32.vlgmr.msra.gmra.mxu0 %vm350_vm5, %v7617_v26  ;;  %8518 = vst [vmem:[#allocation4_spill] sm:$0xff] %v7665_v13 }
 0x1f9   : > { %1971 = vmatprep.mubr.f32.mxu0 %v8502_v3 }
 0x1fa   : > { %v1891_v45 = vpop.permute.xlu1 %1890  ;;  %6939 = vmatprep.subr.msk.mxu1 %vm354_vm1, %v1803_v41 }
 0x1fb   : > { %v1892_v47 = vsel %vm1040_vm8, %v1889_v35, %v1891_v45  ;;  %v1893_v51 = vsel %vm1040_vm8, %v1891_v45, %v1889_v35  ;;  %6940 = vmatpush1.msk.msra.mxu1 %vm354_vm1, %v1802_v40 }
 0x1fc   : > { %v1894_v53 = vmul.f32 %v1892_v47, %v7437_v21  ;;  %v1895_v54 = vmul.f32 %v1893_v51, %v7445_v25  ;;  %6941 = vmatmul.mubr.msk.f32.vlgmr.msra.gmra.mxu1 %vm350_vm5, %v7633_v43 }
 0x1fd   : > { %2063 = vmatprep.mubr.f32.mxu1 %v8502_v3 }
 0x1fe   : > { %6943 = vmatprep.subr.msk.mxu0 %vm354_vm1, %v1895_v54  ;;  %v1983_v61 = vpop.permute.xlu1 %1982 }
 0x1ff   : > { %v1984_v62 = vsel %vm1141_vm9, %v1981_v57, %v1983_v61  ;;  %v1985_v1 = vsel %vm1141_vm9, %v1983_v61, %v1981_v57  ;;  %6944 = vmatpush1.msk.msra.mxu0 %vm354_vm1, %v1894_v53 }
 0x200   : > { %v1986_v5 = vmul.f32 %v7470_v37, %v1984_v62  ;;  %v1987_v6 = vmul.f32 %v7475_v38, %v1985_v1  ;;  %6945 = vmatmul.mubr.msk.f32.vlgmr.msra.gmra.mxu0 %vm350_vm5, %v7649_v56 }
 0x201   : > { %2167 = vmatprep.mubr.f32.mxu0 %v8502_v3 }
 0x202   : > { %6947 = vmatprep.subr.msk.mxu1 %vm354_vm1, %v1987_v6 }
 0x203   : > { %6948 = vmatpush1.msk.msra.mxu1 %vm354_vm1, %v1986_v5  ;;  %v7679_v22 = vpop.permute.xlu0 %1243 }
 0x204   : > { %6949 = vmatmul.mubr.msk.f32.vlgmr.msra.gmra.mxu1 %vm350_vm5, %v7665_v13  ;;  %8520 = vst [vmem:[#allocation6_spill] sm:$0xff] %v7679_v22  ;;  %v1249_v34 = vadd.f32 %v7679_v22, %v1240_v19  ;;  %v1250_v41 = vadd.f32 %v1247_v23, %v7679_v22 }
 0x205   : > { %2254 = vmatprep.mubr.f32.mxu1 %v8502_v3 }
 0x2a8   : > { %v1335_v20 = vpop.f32.mrf.mxu1 }
 0x2a9   : > { %v1340_v40 = vadd.f32 %v1335_v20, %v1249_v34 }
 0x2aa   : > { %v1337_v11 = vpop.f32.mrf.mxu1 }
 0x2ab   : > { %v1341_v47 = vadd.f32 %v1337_v11, %v1250_v41 }
 0x2ac   : > { %v1427_v28 = vpop.f32.mrf.mxu0 }
 0x2ad   : > { %v1432_v51 = vadd.f32 %v1427_v28, %v1340_v40 }
 0x2ae   : > { %v1429_v45 = vpop.f32.mrf.mxu0 }
 0x2af   : > { %v1433_v57 = vadd.f32 %v1429_v45, %v1341_v47 }
 0x2b0   : > { %v1519_v35 = vpop.f32.mrf.mxu1 }
 0x2b1   : > { %v1524_v61 = vadd.f32 %v1519_v35, %v1432_v51 }
 0x2b2   : > { %v1521_v53 = vpop.f32.mrf.mxu1 }
 0x2b3   : > { %v1525_v5 = vadd.f32 %v1521_v53, %v1433_v57 }
 0x2b4   : > { %v1611_v54 = vpop.f32.mrf.mxu0  ;;  %v1697_v1 = vpop.f32.mrf.mxu1 }
 0x2b5   : > { %v1616_v6 = vadd.f32 %v1611_v54, %v1524_v61 }
 0x2b6   : > { %v1613_v62 = vpop.f32.mrf.mxu0  ;;  %v1699_v14 = vpop.f32.mrf.mxu1 }
 0x2b7   : > { %v1617_v3 = vadd.f32 %v1613_v62, %v1525_v5  ;;  %v1702_v56 = vadd.f32 %v1697_v1, %v1616_v6 }
 0x2b8   : > { %v1789_v13 = vpop.f32.mrf.mxu0 }
 0x2b9   : > { %v1703_v43 = vadd.f32 %v1699_v14, %v1617_v3  ;;  %v1794_v34 = vadd.f32 %v1789_v13, %v1702_v56 }
 0x2ba   : > { %v1791_v20 = vpop.f32.mrf.mxu0 }
 0x2bb   : > { %v1795_v11 = vadd.f32 %v1791_v20, %v1703_v43 }
 0x2bc   : > { %v1881_v19 = vpop.f32.mrf.mxu1 }
 0x2bd   : > { %v1886_v28 = vadd.f32 %v1881_v19, %v1794_v34 }
 0x2be   : > { %v1883_v23 = vpop.f32.mrf.mxu1 }
 0x2bf   : > { %v1887_v41 = vadd.f32 %v1883_v23, %v1795_v11 }
 0x2c0   : > { %v1973_v22 = vpop.f32.mrf.mxu0 }
 0x2c1   : > { %v1978_v45 = vadd.f32 %v1973_v22, %v1886_v28 }
 0x2c2   : > { %v1975_v40 = vpop.f32.mrf.mxu0 }
 0x2c3   : > { %v1979_v47 = vadd.f32 %v1975_v40, %v1887_v41  ;;  %v8521_v40 = vmov 0.0  }
 0x2c4   : > { %v2065_v35 = vpop.f32.mrf.mxu1 }
 0x2c5   : > { %v2070_v51 = vadd.f32 %v2065_v35, %v1978_v45 }
 0x2c6   : > { %v2067_v53 = vpop.f32.mrf.mxu1 }
 0x2c7   : > { %v2071_v54 = vadd.f32 %v2067_v53, %v1979_v47  ;;  %v2072_v57 = vmul.f32 0.25, %v2070_v51 }
 0x2c9   : > { %v2073_v61 = vmul.f32 0.25, %v2071_v54 }
 0x2cb   : > { %v2076_v62 = vcombine.low %v2072_v57, %v2073_v61 }
 0x2cd   : > { %v7684_v1 = vadd.f32 %v2076_v62, %v7236_v0 }
 0x2cf   : > { %v2079_v3 = vmax.f32 %v7684_v1, 0.0 }
 0x2d1   : > { %2089 = vrot.lane.b32.xlu1 %v2079_v3, %s7166_s12  ;;  %v2087_v43 = vcombine.high %v2079_v3, %v2079_v3  ;;  %v2437_v45 = vmul.f32 %v2079_v3, %v7306_v24 }
 0x2d3   : > { %2091 = vrot.lane.b32.xlu0 %v2087_v43, %s7166_s12  ;;  %v2439_v57 = vcombine.high %v2437_v45, %v2437_v45 }
 0x2d5   : > { %2176 = vrot.lane.b32.xlu1 %v2079_v3, %s7165_s11 }
 0x2d7   : > { %2178 = vrot.lane.b32.xlu0 %v2087_v43, %s7165_s11 }
 0x2d9   : > { %2263 = vrot.lane.b32.xlu1 %v2079_v3, %s7168_s13 }
 0x2db   : > { %2265 = vrot.lane.b32.xlu0 %v2087_v43, %s7168_s13 }
 0x2dd   : > { %2350 = vrot.lane.b32.xlu1 %v2079_v3, %s7169_s14 }
 0x2df   : > { %2352 = vrot.lane.b32.xlu0 %v2087_v43, %s7169_s14 }
 0x2e1   : > { %2517 = vrot.lane.b32.xlu1 %v2079_v3, %s7170_s15 }
 0x2e3   : > { %2519 = vrot.lane.b32.xlu0 %v2087_v43, %s7170_s15 }
 0x2e5   : > { %2604 = vrot.lane.b32.xlu1 %v2079_v3, %s7171_s16 }
 0x2e7   : > { %2606 = vrot.lane.b32.xlu0 %v2087_v43, %s7171_s16 }
 0x2e9   : > { %2691 = vrot.lane.b32.xlu1 %v2079_v3, %s7173_s17 }
 0x2eb   : > { %2693 = vrot.lane.b32.xlu0 %v2087_v43, %s7173_s17 }
 0x2ed   : > { %2778 = vrot.lane.b32.xlu1 %v2079_v3, %s7174_s18 }
 0x2ef   : > { %2780 = vrot.lane.b32.xlu0 %v2087_v43, %s7174_s18 }
 0x343   : > { %v2090_v0 = vpop.permute.xlu1 %2089 }
 0x345   : > { %v2092_v56 = vpop.permute.xlu0 %2091 }
 0x346   : > { %v2093_v13 = vsel %vm336_vm3, %v2090_v0, %v2092_v56  ;;  %v2094_v14 = vsel %vm336_vm3, %v2092_v56, %v2090_v0 }
 0x347   : > { %v2095_v22 = vmul.f32 %v2094_v14, %v7320_v30  ;;  %v2096_v5 = vmul.f32 %v2093_v13, %v7317_v29  ;;  %v2177_v6 = vpop.permute.xlu1 %2176 }
 0x349   : > { %6950 = vmatprep.subr.msk.mxu0 %vm354_vm1, %v2096_v5  ;;  %v2179_v19 = vpop.permute.xlu0 %2178 }
 0x34a   : > { %v2180_v20 = vsel %vm438_vm0, %v2177_v6, %v2179_v19  ;;  %v2181_v34 = vsel %vm438_vm0, %v2179_v19, %v2177_v6  ;;  %6951 = vmatpush1.msk.msra.mxu0 %vm354_vm1, %v2095_v22 }
 0x34b   : > { %v2182_v23 = vmul.f32 %v2181_v34, %v7299_v18  ;;  %v2183_v11 = vmul.f32 %v2180_v20, %v7296_v17  ;;  %v2264_v28 = vpop.permute.xlu1 %2263  ;;  %6952 = vmatmul.mubr.msk.f32.vlgmr.msra.gmra.mxu0 %vm350_vm5, %v7360_v46 }
 0x34c   : > { %2341 = vmatprep.mubr.f32.mxu0 %v8521_v40 }
 0x34d   : > { %6953 = vmatprep.subr.msk.mxu1 %vm354_vm1, %v2183_v11  ;;  %v2266_v41 = vpop.permute.xlu0 %2265 }
 0x34e   : > { %v2267_v35 = vsel %vm539_vm2, %v2264_v28, %v2266_v41  ;;  %v2268_v47 = vsel %vm539_vm2, %v2266_v41, %v2264_v28  ;;  %6954 = vmatpush1.msk.msra.mxu1 %vm354_vm1, %v2182_v23 }
 0x34f   : > { %v2269_v51 = vmul.f32 %v2268_v47, %v7323_v31  ;;  %v2270_v53 = vmul.f32 %v2267_v35, %v7326_v32  ;;  %v2351_v46 = vpop.permute.xlu1 %2350  ;;  %6955 = vmatmul.mubr.msk.f32.vlgmr.msra.gmra.mxu1 %vm350_vm5, %v7331_v33 }
 0x350   : > { %2428 = vmatprep.mubr.f32.mxu1 %v8521_v40 }
 0x351   : > { %6956 = vmatprep.subr.msk.mxu0 %vm354_vm1, %v2270_v53  ;;  %v2353_v54 = vpop.permute.xlu0 %2352 }
 0x352   : > { %v2354_v61 = vsel %vm640_vm4, %v2351_v46, %v2353_v54  ;;  %v2355_v62 = vsel %vm640_vm4, %v2353_v54, %v2351_v46  ;;  %6957 = vmatpush1.msk.msra.mxu0 %vm354_vm1, %v2269_v51 }
 0x353   : > { %v2356_v3 = vmul.f32 %v2355_v62, %v7336_v36  ;;  %v2357_v43 = vmul.f32 %v2354_v61, %v7352_v44  ;;  %v2518_v0 = vpop.permute.xlu1 %2517  ;;  %6958 = vmatmul.mubr.msk.f32.vlgmr.msra.gmra.mxu0 %vm350_vm5, %v7389_v59  ;;  %6962 = vmatprep.subr.msk.mxu0 %vm354_vm1, %v2439_v57 }
 0x354   : > { %6963 = vmatpush1.msk.msra.mxu0 %vm354_vm1, %v2437_v45  ;;  %2508 = vmatprep.mubr.f32.mxu0 %v8521_v40 }
 0x355   : > { %6959 = vmatprep.subr.msk.mxu1 %vm354_vm1, %v2357_v43  ;;  %v2520_v33 = vpop.permute.xlu0 %2519 }
 0x356   : > { %v2521_v56 = vsel %vm838_vm6, %v2518_v0, %v2520_v33  ;;  %v2522_v13 = vsel %vm838_vm6, %v2520_v33, %v2518_v0  ;;  %6960 = vmatpush1.msk.msra.mxu1 %vm354_vm1, %v2356_v3 }
 0x357   : > { %v2523_v14 = vmul.f32 %v2521_v56, %v7366_v50  ;;  %v2524_v59 = vmul.f32 %v2522_v13, %v7382_v58  ;;  %v2605_v22 = vpop.permute.xlu1 %2604  ;;  %6961 = vmatmul.mubr.msk.f32.vlgmr.msra.gmra.mxu1 %vm350_vm5, %v7394_v60  ;;  %6964 = vmatmul.mubr.msk.f32.vlgmr.msra.gmra.mxu0 %vm350_vm5, %v7422_v7 }
 0x358   : > { %2595 = vmatprep.mubr.f32.mxu1 %v8521_v40  ;;  %2682 = vmatprep.mubr.f32.mxu0 %v8521_v40 }
 0x359   : > { %6965 = vmatprep.subr.msk.mxu1 %vm354_vm1, %v2524_v59  ;;  %v2607_v5 = vpop.permute.xlu0 %2606 }
 0x35a   : > { %v2608_v6 = vsel %vm939_vm7, %v2605_v22, %v2607_v5  ;;  %v2609_v19 = vsel %vm939_vm7, %v2607_v5, %v2605_v22  ;;  %6966 = vmatpush1.msk.msra.mxu1 %vm354_vm1, %v2523_v14 }
 0x35b   : > { %v2610_v60 = vmul.f32 %v2608_v6, %v7404_v2  ;;  %v2611_v20 = vmul.f32 %v2609_v19, %v7413_v8  ;;  %v2692_v7 = vpop.permute.xlu1 %2691  ;;  %6967 = vmatmul.mubr.msk.f32.vlgmr.msra.gmra.mxu1 %vm350_vm5, %v7427_v10 }
 0x35c   : > { %2769 = vmatprep.mubr.f32.mxu1 %v8521_v40 }
 0x35d   : > { %6968 = vmatprep.subr.msk.mxu0 %vm354_vm1, %v2611_v20  ;;  %v2694_v34 = vpop.permute.xlu0 %2693 }
 0x35e   : > { %v2695_v23 = vsel %vm1040_vm8, %v2692_v7, %v2694_v34  ;;  %v2696_v11 = vsel %vm1040_vm8, %v2694_v34, %v2692_v7  ;;  %6969 = vmatpush1.msk.msra.mxu0 %vm354_vm1, %v2610_v60 }
 0x35f   : > { %v2697_v28 = vmul.f32 %v2695_v23, %v7437_v21  ;;  %v2698_v41 = vmul.f32 %v2696_v11, %v7445_v25  ;;  %6970 = vmatmul.mubr.msk.f32.vlgmr.msra.gmra.mxu0 %vm350_vm5, %v7453_v12  ;;  %v2779_v10 = vpop.permute.xlu1 %2778  ;;  %v2080_v12 = vmul.f32 0.25, %v7507_v49 }
 0x360   : > { %2856 = vmatprep.mubr.f32.mxu0 %v8521_v40 }
 0x361   : > { %6971 = vmatprep.subr.msk.mxu1 %vm354_vm1, %v2698_v41  ;;  %v2781_v45 = vpop.permute.xlu0 %2780  ;;  %v2082_v54 = vcombine.high %v2080_v12, %v2080_v12  ;;  %v2084_v62 = vadd.f32 %v2080_v12, %v7510_v52 }
 0x362   : > { %v2782_v35 = vsel %vm1141_vm9, %v2779_v10, %v2781_v45  ;;  %v2783_v47 = vsel %vm1141_vm9, %v2781_v45, %v2779_v10  ;;  %6972 = vmatpush1.msk.msra.mxu1 %vm354_vm1, %v2697_v28 }
 0x363   : > { %v2784_v51 = vmul.f32 %v7470_v37, %v2782_v35  ;;  %v2785_v53 = vmul.f32 %v7475_v38, %v2783_v47  ;;  %6973 = vmatmul.mubr.msk.f32.vlgmr.msra.gmra.mxu1 %vm350_vm5, %v7480_v39  ;;  %v2085_v43 = vadd.f32 %v2082_v54, %v7510_v52 }
 0x364   : > { %2951 = vmatprep.mubr.f32.mxu1 %v8521_v40 }
 0x365   : > { %6974 = vmatprep.subr.msk.mxu0 %vm354_vm1, %v2785_v53 }
 0x366   : > { %6975 = vmatpush1.msk.msra.mxu0 %vm354_vm1, %v2784_v51 }
 0x367   : > { %6976 = vmatmul.mubr.msk.f32.vlgmr.msra.gmra.mxu0 %vm350_vm5, %v7496_v48 }
 0x368   : > { %3038 = vmatprep.mubr.f32.mxu0 %v8521_v40 }
 0x40b   : > { %v2169_v46 = vpop.f32.mrf.mxu0 }
 0x40c   : > { %v2174_v3 = vadd.f32 %v2169_v46, %v2084_v62 }
 0x40d   : > { %v2171_v57 = vpop.f32.mrf.mxu0 }
 0x40e   : > { %v2175_v33 = vadd.f32 %v2171_v57, %v2085_v43 }
 0x40f   : > { %v2256_v61 = vpop.f32.mrf.mxu1 }
 0x410   : > { %v2261_v56 = vadd.f32 %v2256_v61, %v2174_v3 }
 0x411   : > { %v2258_v0 = vpop.f32.mrf.mxu1 }
 0x412   : > { %v2262_v48 = vadd.f32 %v2258_v0, %v2175_v33 }
 0x413   : > { %v2343_v39 = vpop.f32.mrf.mxu0 }
 0x414   : > { %v2348_v59 = vadd.f32 %v2343_v39, %v2261_v56 }
 0x415   : > { %v2345_v13 = vpop.f32.mrf.mxu0 }
 0x416   : > { %v2349_v49 = vadd.f32 %v2345_v13, %v2262_v48 }
 0x417   : > { %v2430_v14 = vpop.f32.mrf.mxu1  ;;  %v2510_v5 = vpop.f32.mrf.mxu0 }
 0x418   : > { %v2435_v6 = vadd.f32 %v2430_v14, %v2348_v59 }
 0x419   : > { %v2432_v22 = vpop.f32.mrf.mxu1  ;;  %v2512_v60 = vpop.f32.mrf.mxu0 }
 0x41a   : > { %v2436_v19 = vadd.f32 %v2432_v22, %v2349_v49  ;;  %v2515_v7 = vadd.f32 %v2510_v5, %v2435_v6 }
 0x41b   : > { %v2597_v20 = vpop.f32.mrf.mxu1 }
 0x41c   : > { %v2516_v23 = vadd.f32 %v2512_v60, %v2436_v19  ;;  %v2602_v28 = vadd.f32 %v2597_v20, %v2515_v7 }
 0x41d   : > { %v2599_v11 = vpop.f32.mrf.mxu1 }
 0x41e   : > { %v2603_v45 = vadd.f32 %v2599_v11, %v2516_v23 }
 0x41f   : > { %v2684_v34 = vpop.f32.mrf.mxu0 }
 0x420   : > { %v2689_v35 = vadd.f32 %v2684_v34, %v2602_v28 }
 0x421   : > { %v2686_v41 = vpop.f32.mrf.mxu0 }
 0x422   : > { %v2690_v51 = vadd.f32 %v2686_v41, %v2603_v45 }
 0x423   : > { %v2771_v10 = vpop.f32.mrf.mxu1 }
 0x424   : > { %v2776_v53 = vadd.f32 %v2771_v10, %v2689_v35 }
 0x425   : > { %v2773_v47 = vpop.f32.mrf.mxu1 }
 0x426   : > { %v2777_v46 = vadd.f32 %v2773_v47, %v2690_v51 }
 0x427   : > { %v2858_v12 = vpop.f32.mrf.mxu0 }
 0x428   : > { %v2863_v54 = vadd.f32 %v2858_v12, %v2776_v53 }
 0x429   : > { %v2860_v57 = vpop.f32.mrf.mxu0 }
 0x42a   : > { %v2865_v61 = vmax.f32 %v2863_v54, 0.0  ;;  %v2864_v62 = vadd.f32 %v2860_v57, %v2777_v46 }
 0x42c   : > { %v2866_v39 = vmax.f32 %v2864_v62, 0.0  ;;  %2873 = vrot.lane.b32.xlu1 %v2865_v61, %s7166_s12  ;;  %v3221_v10 = vmul.f32 %v2865_v61, %v7289_v15 }
 0x42e   : > { %2875 = vrot.lane.b32.xlu0 %v2866_v39, %s7166_s12  ;;  %v3222_v11 = vmul.f32 %v2866_v39, %v7292_v16 }
 0x430   : > { %2960 = vrot.lane.b32.xlu1 %v2865_v61, %s7165_s11 }
 0x432   : > { %2962 = vrot.lane.b32.xlu0 %v2866_v39, %s7165_s11 }
 0x434   : > { %3047 = vrot.lane.b32.xlu1 %v2865_v61, %s7168_s13 }
 0x436   : > { %3049 = vrot.lane.b32.xlu0 %v2866_v39, %s7168_s13 }
 0x438   : > { %3134 = vrot.lane.b32.xlu1 %v2865_v61, %s7169_s14 }
 0x43a   : > { %3136 = vrot.lane.b32.xlu0 %v2866_v39, %s7169_s14 }
 0x43c   : > { %3302 = vrot.lane.b32.xlu1 %v2865_v61, %s7170_s15 }
 0x43e   : > { %3304 = vrot.lane.b32.xlu0 %v2866_v39, %s7170_s15 }
 0x440   : > { %3389 = vrot.lane.b32.xlu1 %v2865_v61, %s7171_s16 }
 0x442   : > { %3391 = vrot.lane.b32.xlu0 %v2866_v39, %s7171_s16 }
 0x444   : > { %3476 = vrot.lane.b32.xlu1 %v2865_v61, %s7173_s17 }
 0x446   : > { %3478 = vrot.lane.b32.xlu0 %v2866_v39, %s7173_s17 }
 0x448   : > { %3563 = vrot.lane.b32.xlu1 %v2865_v61, %s7174_s18 }
 0x44a   : > { %3565 = vrot.lane.b32.xlu0 %v2866_v39, %s7174_s18 }
 0x49e   : > { %v2874_v3 = vpop.permute.xlu1 %2873 }
 0x4a0   : > { %v2876_v43 = vpop.permute.xlu0 %2875 }
 0x4a1   : > { %v2877_v0 = vsel %vm336_vm3, %v2874_v3, %v2876_v43  ;;  %v2878_v33 = vsel %vm336_vm3, %v2876_v43, %v2874_v3 }
 0x4a2   : > { %v2879_v56 = vmul.f32 %v2878_v33, %v7320_v30  ;;  %v2880_v13 = vmul.f32 %v2877_v0, %v7317_v29  ;;  %v2961_v14 = vpop.permute.xlu1 %2960 }
 0x4a4   : > { %6977 = vmatprep.subr.msk.mxu1 %vm354_vm1, %v2880_v13  ;;  %v2963_v48 = vpop.permute.xlu0 %2962 }
 0x4a5   : > { %v2964_v59 = vsel %vm438_vm0, %v2961_v14, %v2963_v48  ;;  %v2965_v22 = vsel %vm438_vm0, %v2963_v48, %v2961_v14  ;;  %6978 = vmatpush1.msk.msra.mxu1 %vm354_vm1, %v2879_v56  ;;  %v8522_v56 = vld [vmem:[#allocation2_spill] sm:$0xff] }
 0x4a6   : > { %v2966_v5 = vmul.f32 %v2965_v22, %v7299_v18  ;;  %v2967_v49 = vmul.f32 %v2964_v59, %v7296_v17  ;;  %v3048_v6 = vpop.permute.xlu1 %3047  ;;  %6979 = vmatmul.mubr.msk.f32.vlgmr.msra.gmra.mxu1 %vm350_vm5, %v7542_v27 }
 0x4a7   : > { %3125 = vmatprep.mubr.f32.mxu1 %v8521_v40 }
 0x4a8   : > { %6980 = vmatprep.subr.msk.mxu0 %vm354_vm1, %v2967_v49  ;;  %v3050_v19 = vpop.permute.xlu0 %3049  ;;  %v8524_v49 = vld [vmem:[#allocation4_spill] sm:$0xff] }
 0x4a9   : > { %v3051_v60 = vsel %vm539_vm2, %v3048_v6, %v3050_v19  ;;  %v3052_v20 = vsel %vm539_vm2, %v3050_v19, %v3048_v6  ;;  %6981 = vmatpush1.msk.msra.mxu0 %vm354_vm1, %v2966_v5  ;;  %v8523_v5 = vld [vmem:[#allocation3_spill] sm:$0xff]  ;;  %v8525_v6 = vld [vmem:[#allocation5_spill] sm:$0xff] }
 0x4aa   : > { %v3053_v7 = vmul.f32 %v3052_v20, %v7323_v31  ;;  %v3054_v34 = vmul.f32 %v3051_v60, %v7326_v32  ;;  %v3135_v23 = vpop.permute.xlu1 %3134  ;;  %6982 = vmatmul.mubr.msk.f32.vlgmr.msra.gmra.mxu0 %vm350_vm5, %v7557_v42  ;;  %v2867_v19 = vmul.f32 0.25, %v8525_v6 }
 0x4ab   : > { %3212 = vmatprep.mubr.f32.mxu0 %v8521_v40 }
 0x4ac   : > { %6983 = vmatprep.subr.msk.mxu1 %vm354_vm1, %v3054_v34  ;;  %v3137_v27 = vpop.permute.xlu0 %3136 }
 0x4ad   : > { %v3138_v28 = vsel %vm640_vm4, %v3135_v23, %v3137_v27  ;;  %v3139_v41 = vsel %vm640_vm4, %v3137_v27, %v3135_v23  ;;  %6984 = vmatpush1.msk.msra.mxu1 %vm354_vm1, %v3053_v7  ;;  %v8526_v7 = vld [vmem:[#allocation6_spill] sm:$0xff] }
 0x4ae   : > { %v3140_v45 = vmul.f32 %v3139_v41, %v7336_v36  ;;  %v3141_v42 = vmul.f32 %v3138_v28, %v7352_v44  ;;  %v3303_v35 = vpop.permute.xlu1 %3302  ;;  %6985 = vmatmul.mubr.msk.f32.vlgmr.msra.gmra.mxu1 %vm350_vm5, %v7573_v55  ;;  %6989 = vmatprep.subr.msk.mxu1 %vm354_vm1, %v3222_v11  ;;  %v2871_v34 = vadd.f32 %v2867_v19, %v8526_v7 }
 0x4af   : > { %6990 = vmatpush1.msk.msra.mxu1 %vm354_vm1, %v3221_v10  ;;  %3293 = vmatprep.mubr.f32.mxu1 %v8521_v40 }
 0x4b0   : > { %6986 = vmatprep.subr.msk.mxu0 %vm354_vm1, %v3141_v42  ;;  %v3305_v47 = vpop.permute.xlu0 %3304 }
 0x4b1   : > { %v3306_v51 = vsel %vm838_vm6, %v3303_v35, %v3305_v47  ;;  %v3307_v53 = vsel %vm838_vm6, %v3305_v47, %v3303_v35  ;;  %6987 = vmatpush1.msk.msra.mxu0 %vm354_vm1, %v3140_v45 }
 0x4b2   : > { %v3308_v12 = vmul.f32 %v3306_v51, %v7366_v50  ;;  %v3309_v55 = vmul.f32 %v3307_v53, %v7382_v58  ;;  %v3390_v46 = vpop.permute.xlu1 %3389  ;;  %6988 = vmatmul.mubr.msk.f32.vlgmr.msra.gmra.mxu0 %vm350_vm5, %v7593_v4  ;;  %6991 = vmatmul.mubr.msk.f32.vlgmr.msra.gmra.mxu1 %vm350_vm5, %v7599_v63 }
 0x4b3   : > { %3380 = vmatprep.mubr.f32.mxu0 %v8521_v40  ;;  %3467 = vmatprep.mubr.f32.mxu1 %v8521_v40 }
 0x4b4   : > { %6992 = vmatprep.subr.msk.mxu0 %vm354_vm1, %v3309_v55  ;;  %v3392_v54 = vpop.permute.xlu0 %3391 }
 0x4b5   : > { %v3393_v57 = vsel %vm939_vm7, %v3390_v46, %v3392_v54  ;;  %v3394_v61 = vsel %vm939_vm7, %v3392_v54, %v3390_v46  ;;  %6993 = vmatpush1.msk.msra.mxu0 %vm354_vm1, %v3308_v12 }
 0x4b6   : > { %v3395_v4 = vmul.f32 %v3393_v57, %v7404_v2  ;;  %v3396_v62 = vmul.f32 %v3394_v61, %v7413_v8  ;;  %v3477_v63 = vpop.permute.xlu1 %3476  ;;  %6994 = vmatmul.mubr.msk.f32.vlgmr.msra.gmra.mxu0 %vm350_vm5, %v7617_v26 }
 0x4b7   : > { %3554 = vmatprep.mubr.f32.mxu0 %v8521_v40 }
 0x4b8   : > { %v3479_v39 = vpop.permute.xlu0 %3478  ;;  %6995 = vmatprep.subr.msk.mxu1 %vm354_vm1, %v3396_v62 }
 0x4b9   : > { %v3480_v3 = vsel %vm1040_vm8, %v3477_v63, %v3479_v39  ;;  %v3481_v43 = vsel %vm1040_vm8, %v3479_v39, %v3477_v63  ;;  %6996 = vmatpush1.msk.msra.mxu1 %vm354_vm1, %v3395_v4 }
 0x4ba   : > { %v3482_v0 = vmul.f32 %v3480_v3, %v7437_v21  ;;  %v3483_v33 = vmul.f32 %v3481_v43, %v7445_v25  ;;  %6997 = vmatmul.mubr.msk.f32.vlgmr.msra.gmra.mxu1 %vm350_vm5, %v8522_v56  ;;  %v3564_v26 = vpop.permute.xlu1 %3563 }
 0x4bb   : > { %3641 = vmatprep.mubr.f32.mxu1 %v8521_v40 }
 0x4bc   : > { %6998 = vmatprep.subr.msk.mxu0 %vm354_vm1, %v3483_v33  ;;  %v3566_v13 = vpop.permute.xlu0 %3565 }
 0x4bd   : > { %v3567_v14 = vsel %vm1141_vm9, %v3564_v26, %v3566_v13  ;;  %v3568_v48 = vsel %vm1141_vm9, %v3566_v13, %v3564_v26  ;;  %6999 = vmatpush1.msk.msra.mxu0 %vm354_vm1, %v3482_v0 }
 0x4be   : > { %v3569_v59 = vmul.f32 %v7470_v37, %v3567_v14  ;;  %v3570_v22 = vmul.f32 %v7475_v38, %v3568_v48  ;;  %7000 = vmatmul.mubr.msk.f32.vlgmr.msra.gmra.mxu0 %vm350_vm5, %v8523_v5  ;;  %v2869_v37 = vcombine.high %v2867_v19, %v2867_v19 }
 0x4bf   : > { %3745 = vmatprep.mubr.f32.mxu0 %v8521_v40 }
 0x4c0   : > { %7001 = vmatprep.subr.msk.mxu1 %vm354_vm1, %v3570_v22  ;;  %v2872_v11 = vadd.f32 %v2869_v37, %v8526_v7 }
 0x4c1   : > { %7002 = vmatpush1.msk.msra.mxu1 %vm354_vm1, %v3569_v59 }
 0x4c2   : > { %7003 = vmatmul.mubr.msk.f32.vlgmr.msra.gmra.mxu1 %vm350_vm5, %v8524_v49 }
 0x4c3   : > { %3832 = vmatprep.mubr.f32.mxu1 %v8521_v40 }
 0x566   : > { %v2953_v60 = vpop.f32.mrf.mxu1 }
 0x567   : > { %v2958_v27 = vadd.f32 %v2953_v60, %v2871_v34 }
 0x568   : > { %v2955_v20 = vpop.f32.mrf.mxu1 }
 0x569   : > { %v2959_v41 = vadd.f32 %v2955_v20, %v2872_v11 }
 0x56a   : > { %v3040_v38 = vpop.f32.mrf.mxu0 }
 0x56b   : > { %v3045_v10 = vadd.f32 %v3040_v38, %v2958_v27 }
 0x56c   : > { %v3042_v28 = vpop.f32.mrf.mxu0 }
 0x56d   : > { %v3046_v35 = vadd.f32 %v3042_v28, %v2959_v41 }
 0x56e   : > { %v3127_v23 = vpop.f32.mrf.mxu1 }
 0x56f   : > { %v3132_v47 = vadd.f32 %v3127_v23, %v3045_v10 }
 0x570   : > { %v3129_v45 = vpop.f32.mrf.mxu1 }
 0x571   : > { %v3133_v12 = vadd.f32 %v3129_v45, %v3046_v35 }
 0x572   : > { %v3214_v42 = vpop.f32.mrf.mxu0  ;;  %v3295_v53 = vpop.f32.mrf.mxu1 }
 0x573   : > { %v3219_v55 = vadd.f32 %v3214_v42, %v3132_v47 }
 0x574   : > { %v3216_v51 = vpop.f32.mrf.mxu0  ;;  %v3297_v54 = vpop.f32.mrf.mxu1 }
 0x575   : > { %v3220_v46 = vadd.f32 %v3216_v51, %v3133_v12  ;;  %v3300_v61 = vadd.f32 %v3295_v53, %v3219_v55  ;;  %v7951_v51 = vld [vmem:[%s8494_s1] sm:$0xf] }
 0x576   : > { %v3382_v57 = vpop.f32.mrf.mxu0 }
 0x577   : > { %v3301_v62 = vadd.f32 %v3297_v54, %v3220_v46  ;;  %v3387_v39 = vadd.f32 %v3382_v57, %v3300_v61 }
 0x578   : > { %v3384_v63 = vpop.f32.mrf.mxu0 }
 0x579   : > { %v3388_v0 = vadd.f32 %v3384_v63, %v3301_v62 }
 0x57a   : > { %v3469_v4 = vpop.f32.mrf.mxu1 }
 0x57b   : > { %v3474_v33 = vadd.f32 %v3469_v4, %v3387_v39  ;;  %v7968_v4 = vld [vmem:[%s8494_s1 + $0x4] sm:$0xf] }
 0x57c   : > { %v3471_v3 = vpop.f32.mrf.mxu1 }
 0x57d   : > { %v3475_v26 = vadd.f32 %v3471_v3, %v3388_v0 }
 0x57e   : > { %v3556_v43 = vpop.f32.mrf.mxu0 }
 0x57f   : > { %v3561_v13 = vadd.f32 %v3556_v43, %v3474_v33 }
 0x580   : > { %v3558_v56 = vpop.f32.mrf.mxu0 }
 0x581   : > { %v3562_v48 = vadd.f32 %v3558_v56, %v3475_v26  ;;  %v7984_v56 = vld [vmem:[%s8494_s1 + $0x8] sm:$0xf] }
 0x582   : > { %v3643_v14 = vpop.f32.mrf.mxu1 }
 0x583   : > { %v3648_v59 = vadd.f32 %v3643_v14, %v3561_v13 }
 0x584   : > { %v3645_v22 = vpop.f32.mrf.mxu1 }
 0x585   : > { %v3649_v5 = vadd.f32 %v3645_v22, %v3562_v48  ;;  %v3650_v49 = vmul.f32 0.25, %v3648_v59 }
 0x587   : > { %v3651_v6 = vmul.f32 0.25, %v3649_v5  ;;  %v8002_v5 = vld [vmem:[%s8494_s1 + $0xc] sm:$0xf] }
 0x589   : > { %v3654_v19 = vcombine.low %v3650_v49, %v3651_v6  ;;  %v8009_v49 = vld [vmem:[%s8494_s1 + $0x10] sm:$0xf] }
 0x58b   : > { %v7915_v60 = vadd.f32 %v3654_v19, %v7684_v1 }
 0x58d   : > { %v3657_v37 = vmax.f32 %v7915_v60, 0.0 }
 0x58f   : > { %3667 = vrot.lane.b32.xlu1 %v3657_v37, %s7166_s12  ;;  %v3665_v20 = vcombine.high %v3657_v37, %v3657_v37  ;;  %v4015_v12 = vmul.f32 %v3657_v37, %v7306_v24 }
 0x591   : > { %3669 = vrot.lane.b32.xlu0 %v3665_v20, %s7166_s12  ;;  %v4017_v63 = vcombine.high %v4015_v12, %v4015_v12 }
 0x593   : > { %3754 = vrot.lane.b32.xlu1 %v3657_v37, %s7165_s11 }
 0x595   : > { %3756 = vrot.lane.b32.xlu0 %v3665_v20, %s7165_s11 }
 0x597   : > { %3841 = vrot.lane.b32.xlu1 %v3657_v37, %s7168_s13 }
 0x599   : > { %3843 = vrot.lane.b32.xlu0 %v3665_v20, %s7168_s13 }
 0x59b   : > { %3928 = vrot.lane.b32.xlu1 %v3657_v37, %s7169_s14 }
 0x59d   : > { %3930 = vrot.lane.b32.xlu0 %v3665_v20, %s7169_s14 }
 0x59f   : > { %4095 = vrot.lane.b32.xlu1 %v3657_v37, %s7170_s15 }
 0x5a1   : > { %4097 = vrot.lane.b32.xlu0 %v3665_v20, %s7170_s15 }
 0x5a3   : > { %4182 = vrot.lane.b32.xlu1 %v3657_v37, %s7171_s16 }
 0x5a5   : > { %4184 = vrot.lane.b32.xlu0 %v3665_v20, %s7171_s16 }
 0x5a7   : > { %4269 = vrot.lane.b32.xlu1 %v3657_v37, %s7173_s17 }
 0x5a9   : > { %4271 = vrot.lane.b32.xlu0 %v3665_v20, %s7173_s17 }
 0x5ab   : > { %4356 = vrot.lane.b32.xlu1 %v3657_v37, %s7174_s18 }
 0x5ad   : > { %4358 = vrot.lane.b32.xlu0 %v3665_v20, %s7174_s18 }
 0x601   : > { %v3668_v1 = vpop.permute.xlu1 %3667 }
 0x603   : > { %v3670_v38 = vpop.permute.xlu0 %3669 }
 0x604   : > { %v3671_v34 = vsel %vm336_vm3, %v3668_v1, %v3670_v38  ;;  %v3672_v23 = vsel %vm336_vm3, %v3670_v38, %v3668_v1 }
 0x605   : > { %v3673_v27 = vmul.f32 %v3672_v23, %v7320_v30  ;;  %v3674_v11 = vmul.f32 %v3671_v34, %v7317_v29  ;;  %v3755_v28 = vpop.permute.xlu1 %3754  ;;  %v8026_v34 = vld [vmem:[%s8494_s1 + $0x14] sm:$0xf] }
 0x607   : > { %7004 = vmatprep.subr.msk.mxu0 %vm354_vm1, %v3674_v11  ;;  %v3757_v41 = vpop.permute.xlu0 %3756 }
 0x608   : > { %v3758_v10 = vsel %vm438_vm0, %v3755_v28, %v3757_v41  ;;  %v3759_v45 = vsel %vm438_vm0, %v3757_v41, %v3755_v28  ;;  %7005 = vmatpush1.msk.msra.mxu0 %vm354_vm1, %v3673_v27 }
 0x609   : > { %v3760_v42 = vmul.f32 %v3759_v45, %v7299_v18  ;;  %v3761_v35 = vmul.f32 %v3758_v10, %v7296_v17  ;;  %v3842_v47 = vpop.permute.xlu1 %3841  ;;  %7006 = vmatmul.mubr.msk.f32.vlgmr.msra.gmra.mxu0 %vm350_vm5, %v7951_v51  ;;  %v8042_v10 = vld [vmem:[%s8494_s1 + $0x18] sm:$0xf] }
 0x60a   : > { %3919 = vmatprep.mubr.f32.mxu0 %v8521_v40 }
 0x60b   : > { %7007 = vmatprep.subr.msk.mxu1 %vm354_vm1, %v3761_v35  ;;  %v3844_v53 = vpop.permute.xlu0 %3843 }
 0x60c   : > { %v3845_v55 = vsel %vm539_vm2, %v3842_v47, %v3844_v53  ;;  %v3846_v46 = vsel %vm539_vm2, %v3844_v53, %v3842_v47  ;;  %7008 = vmatpush1.msk.msra.mxu1 %vm354_vm1, %v3760_v42  ;;  %v8056_v53 = vld [vmem:[%s8500_s7 + $0x10] ss:$0 sm:$0xff] }
 0x60d   : > { %v3847_v54 = vmul.f32 %v3846_v46, %v7323_v31  ;;  %v3848_v57 = vmul.f32 %v3845_v55, %v7326_v32  ;;  %v3929_v61 = vpop.permute.xlu1 %3928  ;;  %7009 = vmatmul.mubr.msk.f32.vlgmr.msra.gmra.mxu1 %vm350_vm5, %v7968_v4  ;;  %v8062_v55 = vld [vmem:[%s8500_s7 + $0x18] ss:$0 sm:$0xff] }
 0x60e   : > { %4006 = vmatprep.mubr.f32.mxu1 %v8521_v40 }
 0x60f   : > { %7010 = vmatprep.subr.msk.mxu0 %vm354_vm1, %v3848_v57  ;;  %v3931_v62 = vpop.permute.xlu0 %3930  ;;  %v8078_v57 = vld [vmem:[%s8494_s1 + $0x20] sm:$0xf] }
 0x610   : > { %v3932_v39 = vsel %vm640_vm4, %v3929_v61, %v3931_v62  ;;  %v3933_v3 = vsel %vm640_vm4, %v3931_v62, %v3929_v61  ;;  %7011 = vmatpush1.msk.msra.mxu0 %vm354_vm1, %v3847_v54  ;;  %v8068_v54 = vld [vmem:[%s8494_s1 + $0x1c] sm:$0xf]  ;;  %v8086_v61 = vld [vmem:[%s8496_s3] sm:$0xff] }
 0x611   : > { %v3934_v43 = vmul.f32 %v3933_v3, %v7336_v36  ;;  %v3935_v0 = vmul.f32 %v3932_v39, %v7352_v44  ;;  %v4096_v33 = vpop.permute.xlu1 %4095  ;;  %7012 = vmatmul.mubr.msk.f32.vlgmr.msra.gmra.mxu0 %vm350_vm5, %v7984_v56  ;;  %7016 = vmatprep.subr.msk.mxu0 %vm354_vm1, %v4017_v63  ;;  %v3658_v62 = vmul.f32 0.5, %v8086_v61 }
 0x612   : > { %7017 = vmatpush1.msk.msra.mxu0 %vm354_vm1, %v4015_v12  ;;  %4086 = vmatprep.mubr.f32.mxu0 %v8521_v40 }
 0x613   : > { %7013 = vmatprep.subr.msk.mxu1 %vm354_vm1, %v3935_v0  ;;  %v4098_v26 = vpop.permute.xlu0 %4097  ;;  %v3660_v39 = vcombine.high %v3658_v62, %v3658_v62  ;;  %v3662_v0 = vadd.f32 %v3658_v62, %v7510_v52 }
 0x614   : > { %v4099_v13 = vsel %vm838_vm6, %v4096_v33, %v4098_v26  ;;  %v4100_v14 = vsel %vm838_vm6, %v4098_v26, %v4096_v33  ;;  %7014 = vmatpush1.msk.msra.mxu1 %vm354_vm1, %v3934_v43 }
 0x615   : > { %v4101_v48 = vmul.f32 %v4099_v13, %v7366_v50  ;;  %v4102_v59 = vmul.f32 %v4100_v14, %v7382_v58  ;;  %v4183_v22 = vpop.permute.xlu1 %4182  ;;  %7015 = vmatmul.mubr.msk.f32.vlgmr.msra.gmra.mxu1 %vm350_vm5, %v8002_v5  ;;  %7018 = vmatmul.mubr.msk.f32.vlgmr.msra.gmra.mxu0 %vm350_vm5, %v8009_v49  ;;  %v3663_v13 = vadd.f32 %v3660_v39, %v7510_v52 }
 0x616   : > { %4173 = vmatprep.mubr.f32.mxu1 %v8521_v40  ;;  %4260 = vmatprep.mubr.f32.mxu0 %v8521_v40 }
 0x617   : > { %7019 = vmatprep.subr.msk.mxu1 %vm354_vm1, %v4102_v59  ;;  %v4185_v6 = vpop.permute.xlu0 %4184 }
 0x618   : > { %v4186_v19 = vsel %vm939_vm7, %v4183_v22, %v4185_v6  ;;  %v4187_v37 = vsel %vm939_vm7, %v4185_v6, %v4183_v22  ;;  %7020 = vmatpush1.msk.msra.mxu1 %vm354_vm1, %v4101_v48 }
 0x619   : > { %v4188_v20 = vmul.f32 %v4186_v19, %v7404_v2  ;;  %v4189_v1 = vmul.f32 %v4187_v37, %v7413_v8  ;;  %v4270_v38 = vpop.permute.xlu1 %4269  ;;  %7021 = vmatmul.mubr.msk.f32.vlgmr.msra.gmra.mxu1 %vm350_vm5, %v8026_v34 }
 0x61a   : > { %4347 = vmatprep.mubr.f32.mxu1 %v8521_v40 }
 0x61b   : > { %7022 = vmatprep.subr.msk.mxu0 %vm354_vm1, %v4189_v1  ;;  %v4272_v23 = vpop.permute.xlu0 %4271 }
 0x61c   : > { %v4273_v27 = vsel %vm1040_vm8, %v4270_v38, %v4272_v23  ;;  %v4274_v11 = vsel %vm1040_vm8, %v4272_v23, %v4270_v38  ;;  %7023 = vmatpush1.msk.msra.mxu0 %vm354_vm1, %v4188_v20 }
 0x61d   : > { %v4275_v28 = vmul.f32 %v4273_v27, %v7437_v21  ;;  %v4276_v41 = vmul.f32 %v4274_v11, %v7445_v25  ;;  %7024 = vmatmul.mubr.msk.f32.vlgmr.msra.gmra.mxu0 %vm350_vm5, %v8042_v10  ;;  %v4357_v45 = vpop.permute.xlu1 %4356 }
 0x61e   : > { %4434 = vmatprep.mubr.f32.mxu0 %v8521_v40 }
 0x61f   : > { %7025 = vmatprep.subr.msk.mxu1 %vm354_vm1, %v4276_v41  ;;  %v4359_v42 = vpop.permute.xlu0 %4358 }
 0x620   : > { %v4360_v35 = vsel %vm1141_vm9, %v4357_v45, %v4359_v42  ;;  %v4361_v47 = vsel %vm1141_vm9, %v4359_v42, %v4357_v45  ;;  %7026 = vmatpush1.msk.msra.mxu1 %vm354_vm1, %v4275_v28 }
 0x621   : > { %v4362_v12 = vmul.f32 %v8056_v53, %v4360_v35  ;;  %v4363_v46 = vmul.f32 %v8062_v55, %v4361_v47  ;;  %7027 = vmatmul.mubr.msk.f32.vlgmr.msra.gmra.mxu1 %vm350_vm5, %v8068_v54 }
 0x622   : > { %4529 = vmatprep.mubr.f32.mxu1 %v8521_v40 }
 0x623   : > { %7028 = vmatprep.subr.msk.mxu0 %vm354_vm1, %v4363_v46 }
 0x624   : > { %7029 = vmatpush1.msk.msra.mxu0 %vm354_vm1, %v4362_v12 }
 0x625   : > { %7030 = vmatmul.mubr.msk.f32.vlgmr.msra.gmra.mxu0 %vm350_vm5, %v8078_v57 }
 0x626   : > { %4616 = vmatprep.mubr.f32.mxu0 %v8521_v40 }
 0x6c9   : > { %v3747_v63 = vpop.f32.mrf.mxu0 }
 0x6ca   : > { %v3752_v26 = vadd.f32 %v3747_v63, %v3662_v0 }
 0x6cb   : > { %v3749_v3 = vpop.f32.mrf.mxu0 }
 0x6cc   : > { %v3753_v48 = vadd.f32 %v3749_v3, %v3663_v13 }
 0x6cd   : > { %v3834_v43 = vpop.f32.mrf.mxu1 }
 0x6ce   : > { %v3839_v59 = vadd.f32 %v3834_v43, %v3752_v26 }
 0x6cf   : > { %v3836_v14 = vpop.f32.mrf.mxu1 }
 0x6d0   : > { %v3840_v19 = vadd.f32 %v3836_v14, %v3753_v48 }
 0x6d1   : > { %v3921_v33 = vpop.f32.mrf.mxu0 }
 0x6d2   : > { %v3926_v37 = vadd.f32 %v3921_v33, %v3839_v59 }
 0x6d3   : > { %v3923_v22 = vpop.f32.mrf.mxu0 }
 0x6d4   : > { %v3927_v38 = vadd.f32 %v3923_v22, %v3840_v19 }
 0x6d5   : > { %v4008_v6 = vpop.f32.mrf.mxu1  ;;  %v4088_v1 = vpop.f32.mrf.mxu0 }
 0x6d6   : > { %v4013_v23 = vadd.f32 %v4008_v6, %v3926_v37 }
 0x6d7   : > { %v4010_v20 = vpop.f32.mrf.mxu1  ;;  %v4090_v11 = vpop.f32.mrf.mxu0 }
 0x6d8   : > { %v4014_v27 = vadd.f32 %v4010_v20, %v3927_v38  ;;  %v4093_v41 = vadd.f32 %v4088_v1, %v4013_v23 }
 0x6d9   : > { %v4175_v28 = vpop.f32.mrf.mxu1 }
 0x6da   : > { %v4094_v42 = vadd.f32 %v4090_v11, %v4014_v27  ;;  %v4180_v47 = vadd.f32 %v4175_v28, %v4093_v41 }
 0x6db   : > { %v4177_v35 = vpop.f32.mrf.mxu1 }
 0x6dc   : > { %v4181_v62 = vadd.f32 %v4177_v35, %v4094_v42  ;;  %v8124_v42 = vld [vmem:[%s8497_s4] sm:$0xf] }
 0x6dd   : > { %v4262_v45 = vpop.f32.mrf.mxu0 }
 0x6de   : > { %v4267_v63 = vadd.f32 %v4262_v45, %v4180_v47 }
 0x6df   : > { %v4264_v12 = vpop.f32.mrf.mxu0 }
 0x6e0   : > { %v4268_v3 = vadd.f32 %v4264_v12, %v4181_v62 }
 0x6e1   : > { %v4349_v46 = vpop.f32.mrf.mxu1 }
 0x6e2   : > { %v4354_v43 = vadd.f32 %v4349_v46, %v4267_v63 }
 0x6e3   : > { %v4351_v39 = vpop.f32.mrf.mxu1 }
 0x6e4   : > { %v4355_v33 = vadd.f32 %v4351_v39, %v4268_v3  ;;  %v8140_v39 = vld [vmem:[%s8497_s4 + $0x4] sm:$0xf] }
 0x6e5   : > { %v4436_v0 = vpop.f32.mrf.mxu0 }
 0x6e6   : > { %v4441_v26 = vadd.f32 %v4436_v0, %v4354_v43 }
 0x6e7   : > { %v4438_v13 = vpop.f32.mrf.mxu0 }
 0x6e8   : > { %v4443_v14 = vmax.f32 %v4441_v26, 0.0  ;;  %v4442_v48 = vadd.f32 %v4438_v13, %v4355_v33 }
 0x6ea   : > { %v4444_v59 = vmax.f32 %v4442_v48, 0.0  ;;  %4451 = vrot.lane.b32.xlu1 %v4443_v14, %s7166_s12  ;;  %v4799_v26 = vmul.f32 %v4443_v14, %v7289_v15 }
 0x6ec   : > { %4453 = vrot.lane.b32.xlu0 %v4444_v59, %s7166_s12  ;;  %v4800_v43 = vmul.f32 %v4444_v59, %v7292_v16 }
 0x6ee   : > { %4538 = vrot.lane.b32.xlu1 %v4443_v14, %s7165_s11 }
 0x6f0   : > { %4540 = vrot.lane.b32.xlu0 %v4444_v59, %s7165_s11 }
 0x6f2   : > { %4625 = vrot.lane.b32.xlu1 %v4443_v14, %s7168_s13 }
 0x6f4   : > { %4627 = vrot.lane.b32.xlu0 %v4444_v59, %s7168_s13 }
 0x6f6   : > { %4712 = vrot.lane.b32.xlu1 %v4443_v14, %s7169_s14 }
 0x6f8   : > { %4714 = vrot.lane.b32.xlu0 %v4444_v59, %s7169_s14 }
 0x6fa   : > { %4880 = vrot.lane.b32.xlu1 %v4443_v14, %s7170_s15 }
 0x6fc   : > { %4882 = vrot.lane.b32.xlu0 %v4444_v59, %s7170_s15 }
 0x6fe   : > { %4967 = vrot.lane.b32.xlu1 %v4443_v14, %s7171_s16 }
 0x700   : > { %4969 = vrot.lane.b32.xlu0 %v4444_v59, %s7171_s16 }
 0x702   : > { %5054 = vrot.lane.b32.xlu1 %v4443_v14, %s7173_s17 }
 0x704   : > { %5056 = vrot.lane.b32.xlu0 %v4444_v59, %s7173_s17 }
 0x706   : > { %5141 = vrot.lane.b32.xlu1 %v4443_v14, %s7174_s18 }
 0x708   : > { %5143 = vrot.lane.b32.xlu0 %v4444_v59, %s7174_s18 }
 0x75c   : > { %v4452_v22 = vpop.permute.xlu1 %4451 }
 0x75e   : > { %v4454_v6 = vpop.permute.xlu0 %4453 }
 0x75f   : > { %v4455_v19 = vsel %vm336_vm3, %v4452_v22, %v4454_v6  ;;  %v4456_v37 = vsel %vm336_vm3, %v4454_v6, %v4452_v22  ;;  %v8158_v6 = vld [vmem:[%s8497_s4 + $0x8] sm:$0xf] }
 0x760   : > { %v4457_v20 = vmul.f32 %v4456_v37, %v7320_v30  ;;  %v4458_v1 = vmul.f32 %v4455_v19, %v7317_v29  ;;  %v4539_v38 = vpop.permute.xlu1 %4538 }
 0x762   : > { %7031 = vmatprep.subr.msk.mxu1 %vm354_vm1, %v4458_v1  ;;  %v4541_v23 = vpop.permute.xlu0 %4540 }
 0x763   : > { %v4542_v27 = vsel %vm438_vm0, %v4539_v38, %v4541_v23  ;;  %v4543_v11 = vsel %vm438_vm0, %v4541_v23, %v4539_v38  ;;  %7032 = vmatpush1.msk.msra.mxu1 %vm354_vm1, %v4457_v20  ;;  %v8176_v38 = vld [vmem:[%s8497_s4 + $0xc] sm:$0xf]  ;;  %v8183_v23 = vld [vmem:[%s8497_s4 + $0x10] sm:$0xf] }
 0x764   : > { %v4544_v28 = vmul.f32 %v4543_v11, %v7299_v18  ;;  %v4545_v41 = vmul.f32 %v4542_v27, %v7296_v17  ;;  %v4626_v45 = vpop.permute.xlu1 %4625  ;;  %7033 = vmatmul.mubr.msk.f32.vlgmr.msra.gmra.mxu1 %vm350_vm5, %v8124_v42 }
 0x765   : > { %4703 = vmatprep.mubr.f32.mxu1 %v8521_v40 }
 0x766   : > { %7034 = vmatprep.subr.msk.mxu0 %vm354_vm1, %v4545_v41  ;;  %v4628_v35 = vpop.permute.xlu0 %4627 }
 0x767   : > { %v4629_v47 = vsel %vm539_vm2, %v4626_v45, %v4628_v35  ;;  %v4630_v12 = vsel %vm539_vm2, %v4628_v35, %v4626_v45  ;;  %7035 = vmatpush1.msk.msra.mxu0 %vm354_vm1, %v4544_v28 }
 0x768   : > { %v4631_v46 = vmul.f32 %v4630_v12, %v7323_v31  ;;  %v4632_v62 = vmul.f32 %v4629_v47, %v7326_v32  ;;  %v4713_v63 = vpop.permute.xlu1 %4712  ;;  %7036 = vmatmul.mubr.msk.f32.vlgmr.msra.gmra.mxu0 %vm350_vm5, %v8140_v39  ;;  %v8200_v47 = vld [vmem:[%s8497_s4 + $0x14] sm:$0xf] }
 0x769   : > { %4790 = vmatprep.mubr.f32.mxu0 %v8521_v40  ;;  %8527 = vst [vmem:[#allocation2_spill] sm:$0xff] %v8200_v47 }
 0x76a   : > { %7037 = vmatprep.subr.msk.mxu1 %vm354_vm1, %v4632_v62  ;;  %v4715_v3 = vpop.permute.xlu0 %4714 }
 0x76b   : > { %v4716_v0 = vsel %vm640_vm4, %v4713_v63, %v4715_v3  ;;  %v4717_v33 = vsel %vm640_vm4, %v4715_v3, %v4713_v63  ;;  %7038 = vmatpush1.msk.msra.mxu1 %vm354_vm1, %v4631_v46 }
 0x76c   : > { %v4718_v13 = vmul.f32 %v4717_v33, %v7336_v36  ;;  %v4719_v48 = vmul.f32 %v4716_v0, %v7352_v44  ;;  %v4881_v22 = vpop.permute.xlu1 %4880  ;;  %7039 = vmatmul.mubr.msk.f32.vlgmr.msra.gmra.mxu1 %vm350_vm5, %v8158_v6  ;;  %7043 = vmatprep.subr.msk.mxu1 %vm354_vm1, %v4800_v43  ;;  %v8216_v43 = vld [vmem:[%s8497_s4 + $0x18] sm:$0xf] }
 0x76d   : > { %7044 = vmatpush1.msk.msra.mxu1 %vm354_vm1, %v4799_v26  ;;  %4871 = vmatprep.mubr.f32.mxu1 %v8521_v40  ;;  %8528 = vst [vmem:[#allocation3_spill] sm:$0xff] %v8216_v43 }
 0x76e   : > { %7040 = vmatprep.subr.msk.mxu0 %vm354_vm1, %v4719_v48  ;;  %v4883_v14 = vpop.permute.xlu0 %4882 }
 0x76f   : > { %v4884_v59 = vsel %vm838_vm6, %v4881_v22, %v4883_v14  ;;  %v4885_v19 = vsel %vm838_vm6, %v4883_v14, %v4881_v22  ;;  %7041 = vmatpush1.msk.msra.mxu0 %vm354_vm1, %v4718_v13  ;;  %v8232_v14 = vld [vmem:[%s8497_s4 + $0x1c] sm:$0xf] }
 0x770   : > { %v4886_v37 = vmul.f32 %v4884_v59, %v7366_v50  ;;  %v4887_v20 = vmul.f32 %v4885_v19, %v7382_v58  ;;  %v4968_v1 = vpop.permute.xlu1 %4967  ;;  %7042 = vmatmul.mubr.msk.f32.vlgmr.msra.gmra.mxu0 %vm350_vm5, %v8176_v38  ;;  %7045 = vmatmul.mubr.msk.f32.vlgmr.msra.gmra.mxu1 %vm350_vm5, %v8183_v23  ;;  %8529 = vst [vmem:[#allocation4_spill] sm:$0xff] %v8232_v14  ;;  %v8242_v59 = vld [vmem:[%s8497_s4 + $0x20] sm:$0xf] }
 0x771   : > { %4958 = vmatprep.mubr.f32.mxu0 %v8521_v40  ;;  %5045 = vmatprep.mubr.f32.mxu1 %v8521_v40  ;;  %8530 = vst [vmem:[#allocation5_spill] sm:$0xff] %v8242_v59  ;;  %v8250_v19 = vld [vmem:[%s8499_s6] sm:$0xff] }
 0x772   : > { %7046 = vmatprep.subr.msk.mxu0 %vm354_vm1, %v4887_v20  ;;  %v4970_v27 = vpop.permute.xlu0 %4969  ;;  %8531 = vst [vmem:[#allocation7_spill] sm:$0xff] %v8250_v19 }
 0x773   : > { %v4971_v11 = vsel %vm939_vm7, %v4968_v1, %v4970_v27  ;;  %v4972_v28 = vsel %vm939_vm7, %v4970_v27, %v4968_v1  ;;  %7047 = vmatpush1.msk.msra.mxu0 %vm354_vm1, %v4886_v37  ;;  %v4445_v37 = vmul.f32 0.5, %v8250_v19 }
 0x774   : > { %v4973_v41 = vmul.f32 %v4971_v11, %v7404_v2  ;;  %v4974_v45 = vmul.f32 %v4972_v28, %v7413_v8  ;;  %v5055_v35 = vpop.permute.xlu1 %5054  ;;  %7048 = vmatmul.mubr.msk.f32.vlgmr.msra.gmra.mxu0 %vm350_vm5, %v8200_v47 }
 0x775   : > { %5132 = vmatprep.mubr.f32.mxu0 %v8521_v40  ;;  %v4447_v1 = vcombine.high %v4445_v37, %v4445_v37  ;;  %v4449_v28 = vadd.f32 %v4445_v37, %v8526_v7 }
 0x776   : > { %v5057_v12 = vpop.permute.xlu0 %5056  ;;  %7049 = vmatprep.subr.msk.mxu1 %vm354_vm1, %v4974_v45 }
 0x777   : > { %v5058_v46 = vsel %vm1040_vm8, %v5055_v35, %v5057_v12  ;;  %v5059_v62 = vsel %vm1040_vm8, %v5057_v12, %v5055_v35  ;;  %7050 = vmatpush1.msk.msra.mxu1 %vm354_vm1, %v4973_v41  ;;  %v4450_v35 = vadd.f32 %v4447_v1, %v8526_v7 }
 0x778   : > { %v5060_v63 = vmul.f32 %v5058_v46, %v7437_v21  ;;  %v5061_v3 = vmul.f32 %v5059_v62, %v7445_v25  ;;  %7051 = vmatmul.mubr.msk.f32.vlgmr.msra.gmra.mxu1 %vm350_vm5, %v8216_v43  ;;  %v5142_v0 = vpop.permute.xlu1 %5141 }
 0x779   : > { %5219 = vmatprep.mubr.f32.mxu1 %v8521_v40 }
 0x77a   : > { %7052 = vmatprep.subr.msk.mxu0 %vm354_vm1, %v5061_v3  ;;  %v5144_v33 = vpop.permute.xlu0 %5143 }
 0x77b   : > { %v5145_v26 = vsel %vm1141_vm9, %v5142_v0, %v5144_v33  ;;  %v5146_v13 = vsel %vm1141_vm9, %v5144_v33, %v5142_v0  ;;  %7053 = vmatpush1.msk.msra.mxu0 %vm354_vm1, %v5060_v63 }
 0x77c   : > { %v5147_v48 = vmul.f32 %v8056_v53, %v5145_v26  ;;  %v5148_v22 = vmul.f32 %v8062_v55, %v5146_v13  ;;  %7054 = vmatmul.mubr.msk.f32.vlgmr.msra.gmra.mxu0 %vm350_vm5, %v8232_v14 }
 0x77d   : > { %5323 = vmatprep.mubr.f32.mxu0 %v8521_v40 }
 0x77e   : > { %7055 = vmatprep.subr.msk.mxu1 %vm354_vm1, %v5148_v22 }
 0x77f   : > { %7056 = vmatpush1.msk.msra.mxu1 %vm354_vm1, %v5147_v48 }
 0x780   : > { %7057 = vmatmul.mubr.msk.f32.vlgmr.msra.gmra.mxu1 %vm350_vm5, %v8242_v59 }
 0x781   : > { %5410 = vmatprep.mubr.f32.mxu1 %v8521_v40 }
 0x824   : > { %v4531_v20 = vpop.f32.mrf.mxu1 }
 0x825   : > { %v4536_v45 = vadd.f32 %v4531_v20, %v4449_v28 }
 0x826   : > { %v4533_v27 = vpop.f32.mrf.mxu1 }
 0x827   : > { %v4537_v46 = vadd.f32 %v4533_v27, %v4450_v35 }
 0x828   : > { %v4618_v11 = vpop.f32.mrf.mxu0 }
 0x829   : > { %v4623_v62 = vadd.f32 %v4618_v11, %v4536_v45 }
 0x82a   : > { %v4620_v12 = vpop.f32.mrf.mxu0 }
 0x82b   : > { %v4624_v0 = vadd.f32 %v4620_v12, %v4537_v46 }
 0x82c   : > { %v4705_v41 = vpop.f32.mrf.mxu1 }
 0x82d   : > { %v4710_v33 = vadd.f32 %v4705_v41, %v4623_v62 }
 0x82e   : > { %v4707_v63 = vpop.f32.mrf.mxu1 }
 0x82f   : > { %v4711_v48 = vadd.f32 %v4707_v63, %v4624_v0 }
 0x830   : > { %v4792_v3 = vpop.f32.mrf.mxu0  ;;  %v4873_v13 = vpop.f32.mrf.mxu1 }
 0x831   : > { %v4797_v22 = vadd.f32 %v4792_v3, %v4710_v33 }
 0x832   : > { %v4794_v26 = vpop.f32.mrf.mxu0  ;;  %v4875_v59 = vpop.f32.mrf.mxu1 }
 0x833   : > { %v4798_v19 = vadd.f32 %v4794_v26, %v4711_v48  ;;  %v4878_v43 = vadd.f32 %v4873_v13, %v4797_v22 }
 0x834   : > { %v4960_v14 = vpop.f32.mrf.mxu0 }
 0x835   : > { %v4879_v47 = vadd.f32 %v4875_v59, %v4798_v19  ;;  %v4965_v28 = vadd.f32 %v4960_v14, %v4878_v43 }
 0x836   : > { %v4962_v20 = vpop.f32.mrf.mxu0 }
 0x837   : > { %v4966_v27 = vadd.f32 %v4962_v20, %v4879_v47 }
 0x838   : > { %v5047_v37 = vpop.f32.mrf.mxu1 }
 0x839   : > { %v5052_v11 = vadd.f32 %v5047_v37, %v4965_v28 }
 0x83a   : > { %v5049_v1 = vpop.f32.mrf.mxu1 }
 0x83b   : > { %v5053_v35 = vadd.f32 %v5049_v1, %v4966_v27 }
 0x83c   : > { %v5134_v7 = vpop.f32.mrf.mxu0 }
 0x83d   : > { %v5139_v12 = vadd.f32 %v5134_v7, %v5052_v11 }
 0x83e   : > { %v5136_v45 = vpop.f32.mrf.mxu0 }
 0x83f   : > { %v5140_v46 = vadd.f32 %v5136_v45, %v5053_v35 }
 0x840   : > { %v5221_v41 = vpop.f32.mrf.mxu1 }
 0x841   : > { %v5226_v62 = vadd.f32 %v5221_v41, %v5139_v12 }
 0x842   : > { %v5223_v63 = vpop.f32.mrf.mxu1 }
 0x843   : > { %v5227_v3 = vadd.f32 %v5223_v63, %v5140_v46  ;;  %v5228_v0 = vmul.f32 0.25, %v5226_v62 }
 0x845   : > { %v5229_v33 = vmul.f32 0.25, %v5227_v3 }
 0x847   : > { %v5232_v26 = vcombine.low %v5228_v0, %v5229_v33 }
 0x849   : > { %v8256_v13 = vadd.f32 %v5232_v26, %v7915_v60 }
 0x84b   : > { %v5235_v43 = vmax.f32 %v8256_v13, 0.0 }
 0x84d   : > { %5245 = vrot.lane.b32.xlu1 %v5235_v43, %s7166_s12  ;;  %v5243_v47 = vcombine.high %v5235_v43, %v5235_v43  ;;  %v5593_v35 = vmul.f32 %v5235_v43, %v7306_v24 }
 0x84f   : > { %5247 = vrot.lane.b32.xlu0 %v5243_v47, %s7166_s12  ;;  %v5595_v63 = vcombine.high %v5593_v35, %v5593_v35 }
 0x851   : > { %5332 = vrot.lane.b32.xlu1 %v5235_v43, %s7165_s11 }
 0x853   : > { %5334 = vrot.lane.b32.xlu0 %v5243_v47, %s7165_s11 }
 0x855   : > { %5419 = vrot.lane.b32.xlu1 %v5235_v43, %s7168_s13 }
 0x857   : > { %5421 = vrot.lane.b32.xlu0 %v5243_v47, %s7168_s13 }
 0x859   : > { %5506 = vrot.lane.b32.xlu1 %v5235_v43, %s7169_s14 }
 0x85b   : > { %5508 = vrot.lane.b32.xlu0 %v5243_v47, %s7169_s14 }
 0x85d   : > { %5673 = vrot.lane.b32.xlu1 %v5235_v43, %s7170_s15 }
 0x85f   : > { %5675 = vrot.lane.b32.xlu0 %v5243_v47, %s7170_s15 }
 0x861   : > { %5760 = vrot.lane.b32.xlu1 %v5235_v43, %s7171_s16 }
 0x863   : > { %5762 = vrot.lane.b32.xlu0 %v5243_v47, %s7171_s16 }
 0x865   : > { %5847 = vrot.lane.b32.xlu1 %v5235_v43, %s7173_s17 }
 0x867   : > { %5849 = vrot.lane.b32.xlu0 %v5243_v47, %s7173_s17 }
 0x869   : > { %5934 = vrot.lane.b32.xlu1 %v5235_v43, %s7174_s18 }
 0x86b   : > { %5936 = vrot.lane.b32.xlu0 %v5243_v47, %s7174_s18 }
 0x8bf   : > { %v5246_v7 = vpop.permute.xlu1 %5245 }
 0x8c1   : > { %v5248_v60 = vpop.permute.xlu0 %5247 }
 0x8c2   : > { %v5249_v14 = vsel %vm336_vm3, %v5246_v7, %v5248_v60  ;;  %v5250_v59 = vsel %vm336_vm3, %v5248_v60, %v5246_v7 }
 0x8c3   : > { %v5251_v19 = vmul.f32 %v5250_v59, %v7320_v30  ;;  %v5252_v48 = vmul.f32 %v5249_v14, %v7317_v29  ;;  %v5333_v22 = vpop.permute.xlu1 %5332 }
 0x8c5   : > { %7058 = vmatprep.subr.msk.mxu0 %vm354_vm1, %v5252_v48  ;;  %v5335_v37 = vpop.permute.xlu0 %5334 }
 0x8c6   : > { %v5336_v20 = vsel %vm438_vm0, %v5333_v22, %v5335_v37  ;;  %v5337_v28 = vsel %vm438_vm0, %v5335_v37, %v5333_v22  ;;  %7059 = vmatpush1.msk.msra.mxu0 %vm354_vm1, %v5251_v19 }
 0x8c7   : > { %v5338_v1 = vmul.f32 %v5337_v28, %v7299_v18  ;;  %v5339_v27 = vmul.f32 %v5336_v20, %v7296_v17  ;;  %v5420_v11 = vpop.permute.xlu1 %5419  ;;  %7060 = vmatmul.mubr.msk.f32.vlgmr.msra.gmra.mxu0 %vm350_vm5, %v7951_v51 }
 0x8c8   : > { %5497 = vmatprep.mubr.f32.mxu0 %v8521_v40 }
 0x8c9   : > { %7061 = vmatprep.subr.msk.mxu1 %vm354_vm1, %v5339_v27  ;;  %v5422_v45 = vpop.permute.xlu0 %5421 }
 0x8ca   : > { %v5423_v12 = vsel %vm539_vm2, %v5420_v11, %v5422_v45  ;;  %v5424_v41 = vsel %vm539_vm2, %v5422_v45, %v5420_v11  ;;  %7062 = vmatpush1.msk.msra.mxu1 %vm354_vm1, %v5338_v1 }
 0x8cb   : > { %v5425_v46 = vmul.f32 %v5424_v41, %v7323_v31  ;;  %v5426_v62 = vmul.f32 %v5423_v12, %v7326_v32  ;;  %v5507_v51 = vpop.permute.xlu1 %5506  ;;  %7063 = vmatmul.mubr.msk.f32.vlgmr.msra.gmra.mxu1 %vm350_vm5, %v7968_v4 }
 0x8cc   : > { %5584 = vmatprep.mubr.f32.mxu1 %v8521_v40 }
 0x8cd   : > { %7064 = vmatprep.subr.msk.mxu0 %vm354_vm1, %v5426_v62  ;;  %v5509_v24 = vpop.permute.xlu0 %5508 }
 0x8ce   : > { %v5510_v3 = vsel %vm640_vm4, %v5507_v51, %v5509_v24  ;;  %v5511_v0 = vsel %vm640_vm4, %v5509_v24, %v5507_v51  ;;  %7065 = vmatpush1.msk.msra.mxu0 %vm354_vm1, %v5425_v46 }
 0x8cf   : > { %v5512_v33 = vmul.f32 %v5511_v0, %v7336_v36  ;;  %v5513_v26 = vmul.f32 %v5510_v3, %v7352_v44  ;;  %v5674_v43 = vpop.permute.xlu1 %5673  ;;  %7066 = vmatmul.mubr.msk.f32.vlgmr.msra.gmra.mxu0 %vm350_vm5, %v7984_v56  ;;  %7070 = vmatprep.subr.msk.mxu0 %vm354_vm1, %v5595_v63 }
 0x8d0   : > { %7071 = vmatpush1.msk.msra.mxu0 %vm354_vm1, %v5593_v35  ;;  %5664 = vmatprep.mubr.f32.mxu0 %v8521_v40 }
 0x8d1   : > { %7067 = vmatprep.subr.msk.mxu1 %vm354_vm1, %v5513_v26  ;;  %v5676_v4 = vpop.permute.xlu0 %5675 }
 0x8d2   : > { %v5677_v47 = vsel %vm838_vm6, %v5674_v43, %v5676_v4  ;;  %v5678_v7 = vsel %vm838_vm6, %v5676_v4, %v5674_v43  ;;  %7068 = vmatpush1.msk.msra.mxu1 %vm354_vm1, %v5512_v33 }
 0x8d3   : > { %v5679_v60 = vmul.f32 %v5677_v47, %v7366_v50  ;;  %v5680_v56 = vmul.f32 %v5678_v7, %v7382_v58  ;;  %v5761_v14 = vpop.permute.xlu1 %5760  ;;  %7069 = vmatmul.mubr.msk.f32.vlgmr.msra.gmra.mxu1 %vm350_vm5, %v8002_v5  ;;  %7072 = vmatmul.mubr.msk.f32.vlgmr.msra.gmra.mxu0 %vm350_vm5, %v8009_v49 }
 0x8d4   : > { %5751 = vmatprep.mubr.f32.mxu1 %v8521_v40  ;;  %5838 = vmatprep.mubr.f32.mxu0 %v8521_v40 }
 0x8d5   : > { %7073 = vmatprep.subr.msk.mxu1 %vm354_vm1, %v5680_v56  ;;  %v5763_v59 = vpop.permute.xlu0 %5762 }
 0x8d6   : > { %v5764_v19 = vsel %vm939_vm7, %v5761_v14, %v5763_v59  ;;  %v5765_v48 = vsel %vm939_vm7, %v5763_v59, %v5761_v14  ;;  %7074 = vmatpush1.msk.msra.mxu1 %vm354_vm1, %v5679_v60 }
 0x8d7   : > { %v5766_v5 = vmul.f32 %v5764_v19, %v7404_v2  ;;  %v5767_v22 = vmul.f32 %v5765_v48, %v7413_v8  ;;  %v5848_v49 = vpop.permute.xlu1 %5847  ;;  %7075 = vmatmul.mubr.msk.f32.vlgmr.msra.gmra.mxu1 %vm350_vm5, %v8026_v34 }
 0x8d8   : > { %5925 = vmatprep.mubr.f32.mxu1 %v8521_v40 }
 0x8d9   : > { %7076 = vmatprep.subr.msk.mxu0 %vm354_vm1, %v5767_v22  ;;  %v5850_v37 = vpop.permute.xlu0 %5849 }
 0x8da   : > { %v5851_v20 = vsel %vm1040_vm8, %v5848_v49, %v5850_v37  ;;  %v5852_v28 = vsel %vm1040_vm8, %v5850_v37, %v5848_v49  ;;  %7077 = vmatpush1.msk.msra.mxu0 %vm354_vm1, %v5766_v5 }
 0x8db   : > { %v5853_v1 = vmul.f32 %v5851_v20, %v7437_v21  ;;  %v5854_v27 = vmul.f32 %v5852_v28, %v7445_v25  ;;  %7078 = vmatmul.mubr.msk.f32.vlgmr.msra.gmra.mxu0 %vm350_vm5, %v8042_v10  ;;  %v5935_v34 = vpop.permute.xlu1 %5934  ;;  %v5236_v10 = vmul.f32 0.75, %v8086_v61 }
 0x8dc   : > { %6012 = vmatprep.mubr.f32.mxu0 %v8521_v40 }
 0x8dd   : > { %7079 = vmatprep.subr.msk.mxu1 %vm354_vm1, %v5854_v27  ;;  %v5937_v11 = vpop.permute.xlu0 %5936  ;;  %v5238_v62 = vcombine.high %v5236_v10, %v5236_v10  ;;  %v5240_v63 = vadd.f32 %v5236_v10, %v7510_v52 }
 0x8de   : > { %v5938_v45 = vsel %vm1141_vm9, %v5935_v34, %v5937_v11  ;;  %v5939_v35 = vsel %vm1141_vm9, %v5937_v11, %v5935_v34  ;;  %7080 = vmatpush1.msk.msra.mxu1 %vm354_vm1, %v5853_v1 }
 0x8df   : > { %v5940_v12 = vmul.f32 %v8056_v53, %v5938_v45  ;;  %v5941_v41 = vmul.f32 %v8062_v55, %v5939_v35  ;;  %7081 = vmatmul.mubr.msk.f32.vlgmr.msra.gmra.mxu1 %vm350_vm5, %v8068_v54  ;;  %v5241_v0 = vadd.f32 %v5238_v62, %v7510_v52 }
 0x8e0   : > { %6107 = vmatprep.mubr.f32.mxu1 %v8521_v40 }
 0x8e1   : > { %7082 = vmatprep.subr.msk.mxu0 %vm354_vm1, %v5941_v41 }
 0x8e2   : > { %7083 = vmatpush1.msk.msra.mxu0 %vm354_vm1, %v5940_v12 }
 0x8e3   : > { %7084 = vmatmul.mubr.msk.f32.vlgmr.msra.gmra.mxu0 %vm350_vm5, %v8078_v57 }
 0x8e4   : > { %6194 = vmatprep.mubr.f32.mxu0 %v8521_v40 }
 0x987   : > { %v5325_v46 = vpop.f32.mrf.mxu0 }
 0x988   : > { %v5330_v3 = vadd.f32 %v5325_v46, %v5240_v63 }
 0x989   : > { %v5327_v51 = vpop.f32.mrf.mxu0 }
 0x98a   : > { %v5331_v26 = vadd.f32 %v5327_v51, %v5241_v0 }
 0x98b   : > { %v5412_v24 = vpop.f32.mrf.mxu1 }
 0x98c   : > { %v5417_v43 = vadd.f32 %v5412_v24, %v5330_v3 }
 0x98d   : > { %v5414_v33 = vpop.f32.mrf.mxu1 }
 0x98e   : > { %v5418_v57 = vadd.f32 %v5414_v33, %v5331_v26 }
 0x98f   : > { %v5499_v54 = vpop.f32.mrf.mxu0 }
 0x990   : > { %v5504_v7 = vadd.f32 %v5499_v54, %v5417_v43 }
 0x991   : > { %v5501_v4 = vpop.f32.mrf.mxu0 }
 0x992   : > { %v5505_v61 = vadd.f32 %v5501_v4, %v5418_v57 }
 0x993   : > { %v5586_v47 = vpop.f32.mrf.mxu1  ;;  %v5666_v56 = vpop.f32.mrf.mxu0 }
 0x994   : > { %v5591_v14 = vadd.f32 %v5586_v47, %v5504_v7 }
 0x995   : > { %v5588_v60 = vpop.f32.mrf.mxu1  ;;  %v5668_v19 = vpop.f32.mrf.mxu0 }
 0x996   : > { %v5592_v59 = vadd.f32 %v5588_v60, %v5505_v61  ;;  %v5671_v5 = vadd.f32 %v5666_v56, %v5591_v14 }
 0x997   : > { %v5753_v48 = vpop.f32.mrf.mxu1 }
 0x998   : > { %v5672_v49 = vadd.f32 %v5668_v19, %v5592_v59  ;;  %v5758_v20 = vadd.f32 %v5753_v48, %v5671_v5 }
 0x999   : > { %v5755_v37 = vpop.f32.mrf.mxu1 }
 0x99a   : > { %v5759_v1 = vadd.f32 %v5755_v37, %v5672_v49  ;;  %v8532_v37 = vld [vmem:[#allocation2_spill] sm:$0xff] }
 0x99b   : > { %v5840_v22 = vpop.f32.mrf.mxu0 }
 0x99c   : > { %v5845_v27 = vadd.f32 %v5840_v22, %v5758_v20 }
 0x99d   : > { %v5842_v52 = vpop.f32.mrf.mxu0 }
 0x99e   : > { %v5846_v11 = vadd.f32 %v5842_v52, %v5759_v1  ;;  %v8533_v1 = vld [vmem:[#allocation3_spill] sm:$0xff] }
 0x99f   : > { %v5927_v28 = vpop.f32.mrf.mxu1 }
 0x9a0   : > { %v5932_v45 = vadd.f32 %v5927_v28, %v5845_v27 }
 0x9a1   : > { %v5929_v34 = vpop.f32.mrf.mxu1 }
 0x9a2   : > { %v5933_v12 = vadd.f32 %v5929_v34, %v5846_v11 }
 0x9a3   : > { %v6014_v35 = vpop.f32.mrf.mxu0 }
 0x9a4   : > { %v6019_v41 = vadd.f32 %v6014_v35, %v5932_v45  ;;  %v8534_v35 = vld [vmem:[#allocation4_spill] sm:$0xff] }
 0x9a5   : > { %v6016_v10 = vpop.f32.mrf.mxu0 }
 0x9a6   : > { %v6021_v46 = vmax.f32 %v6019_v41, 0.0  ;;  %v6020_v62 = vadd.f32 %v6016_v10, %v5933_v12  ;;  %v8536_v12 = vld [vmem:[#allocation7_spill] sm:$0xff] }
 0x9a7   : > { %v6023_v41 = vmul.f32 0.75, %v8536_v12 }
 0x9a8   : > { %v6022_v51 = vmax.f32 %v6020_v62, 0.0  ;;  %6029 = vrot.lane.b32.xlu1 %v6021_v46, %s7166_s12 }
 0x9a9   : > { %v6025_v10 = vcombine.high %v6023_v41, %v6023_v41 }
 0x9aa   : > { %6031 = vrot.lane.b32.xlu0 %v6022_v51, %s7166_s12  ;;  %v6378_v14 = vmul.f32 %v6022_v51, %v7292_v16 }
 0x9ac   : > { %6116 = vrot.lane.b32.xlu1 %v6021_v46, %s7165_s11 }
 0x9ae   : > { %6118 = vrot.lane.b32.xlu0 %v6022_v51, %s7165_s11 }
 0x9b0   : > { %6203 = vrot.lane.b32.xlu1 %v6021_v46, %s7168_s13 }
 0x9b2   : > { %6205 = vrot.lane.b32.xlu0 %v6022_v51, %s7168_s13  ;;  %s305_s13 = scalar_lea.vmem %s8501_s8, %s7114_s29 }
 0x9b4   : > { %6290 = vrot.lane.b32.xlu1 %v6021_v46, %s7169_s14 }
 0x9b6   : > { %6292 = vrot.lane.b32.xlu0 %v6022_v51, %s7169_s14 }
 0x9b8   : > { %6458 = vrot.lane.b32.xlu1 %v6021_v46, %s7170_s15 }
 0x9ba   : > { %6460 = vrot.lane.b32.xlu0 %v6022_v51, %s7170_s15 }
 0x9bc   : > { %6545 = vrot.lane.b32.xlu1 %v6021_v46, %s7171_s16 }
 0x9be   : > { %6547 = vrot.lane.b32.xlu0 %v6022_v51, %s7171_s16 }
 0x9c0   : > { %6632 = vrot.lane.b32.xlu1 %v6021_v46, %s7173_s17 }
 0x9c2   : > { %6634 = vrot.lane.b32.xlu0 %v6022_v51, %s7173_s17 }
 0x9c4   : > { %6719 = vrot.lane.b32.xlu1 %v6021_v46, %s7174_s18 }
 0x9c6   : > { %6721 = vrot.lane.b32.xlu0 %v6022_v51, %s7174_s18  ;;  %v8537_v51 = vld [vmem:[#allocation6_spill] sm:$0xff] }
 0xa1a   : > { %v6030_v24 = vpop.permute.xlu1 %6029 }
 0xa1c   : > { %v6032_v63 = vpop.permute.xlu0 %6031 }
 0xa1d   : > { %v6033_v54 = vsel %vm336_vm3, %v6030_v24, %v6032_v63  ;;  %v6034_v3 = vsel %vm336_vm3, %v6032_v63, %v6030_v24  ;;  %v6028_v63 = vadd.f32 %v6025_v10, %v8537_v51 }
 0xa1e   : > { %v6035_v0 = vmul.f32 %v6034_v3, %v7320_v30  ;;  %v6036_v33 = vmul.f32 %v6033_v54, %v7317_v29  ;;  %v6117_v26 = vpop.permute.xlu1 %6116 }
 0xa20   : > { %7085 = vmatprep.subr.msk.mxu1 %vm354_vm1, %v6036_v33  ;;  %v6119_v43 = vpop.permute.xlu0 %6118 }
 0xa21   : > { %v6120_v4 = vsel %vm438_vm0, %v6117_v26, %v6119_v43  ;;  %v6121_v47 = vsel %vm438_vm0, %v6119_v43, %v6117_v26  ;;  %7086 = vmatpush1.msk.msra.mxu1 %vm354_vm1, %v6035_v0 }
 0xa22   : > { %v6122_v57 = vmul.f32 %v6121_v47, %v7299_v18  ;;  %v6123_v7 = vmul.f32 %v6120_v4, %v7296_v17  ;;  %v6204_v60 = vpop.permute.xlu1 %6203  ;;  %7087 = vmatmul.mubr.msk.f32.vlgmr.msra.gmra.mxu1 %vm350_vm5, %v8124_v42 }
 0xa23   : > { %6281 = vmatprep.mubr.f32.mxu1 %v8521_v40 }
 0xa24   : > { %7088 = vmatprep.subr.msk.mxu0 %vm354_vm1, %v6123_v7  ;;  %v6206_v29 = vpop.permute.xlu0 %6205 }
 0xa25   : > { %v6207_v30 = vsel %vm539_vm2, %v6204_v60, %v6206_v29  ;;  %v6208_v56 = vsel %vm539_vm2, %v6206_v29, %v6204_v60  ;;  %7089 = vmatpush1.msk.msra.mxu0 %vm354_vm1, %v6122_v57 }
 0xa26   : > { %v6209_v18 = vmul.f32 %v6208_v56, %v7323_v31  ;;  %v6210_v17 = vmul.f32 %v6207_v30, %v7326_v32  ;;  %v6291_v61 = vpop.permute.xlu1 %6290  ;;  %7090 = vmatmul.mubr.msk.f32.vlgmr.msra.gmra.mxu0 %vm350_vm5, %v8140_v39  ;;  %v6377_v31 = vmul.f32 %v6021_v46, %v7289_v15 }
 0xa27   : > { %6368 = vmatprep.mubr.f32.mxu0 %v8521_v40 }
 0xa28   : > { %7091 = vmatprep.subr.msk.mxu1 %vm354_vm1, %v6210_v17  ;;  %v6293_v42 = vpop.permute.xlu0 %6292 }
 0xa29   : > { %v6294_v59 = vsel %vm640_vm4, %v6291_v61, %v6293_v42  ;;  %v6295_v19 = vsel %vm640_vm4, %v6293_v42, %v6291_v61  ;;  %7092 = vmatpush1.msk.msra.mxu1 %vm354_vm1, %v6209_v18 }
 0xa2a   : > { %v6296_v32 = vmul.f32 %v6295_v19, %v7336_v36  ;;  %v6297_v39 = vmul.f32 %v6294_v59, %v7352_v44  ;;  %v6459_v48 = vpop.permute.xlu1 %6458  ;;  %7093 = vmatmul.mubr.msk.f32.vlgmr.msra.gmra.mxu1 %vm350_vm5, %v8158_v6  ;;  %7097 = vmatprep.subr.msk.mxu1 %vm354_vm1, %v6378_v14 }
 0xa2b   : > { %7098 = vmatpush1.msk.msra.mxu1 %vm354_vm1, %v6377_v31  ;;  %6449 = vmatprep.mubr.f32.mxu1 %v8521_v40 }
 0xa2c   : > { %7094 = vmatprep.subr.msk.mxu0 %vm354_vm1, %v6297_v39  ;;  %v6461_v16 = vpop.permute.xlu0 %6460 }
 0xa2d   : > { %v6462_v15 = vsel %vm838_vm6, %v6459_v48, %v6461_v16  ;;  %v6463_v36 = vsel %vm838_vm6, %v6461_v16, %v6459_v48  ;;  %7095 = vmatpush1.msk.msra.mxu0 %vm354_vm1, %v6296_v32 }
 0xa2e   : > { %v6464_v44 = vmul.f32 %v6462_v15, %v7366_v50  ;;  %v6465_v6 = vmul.f32 %v6463_v36, %v7382_v58  ;;  %v6546_v5 = vpop.permute.xlu1 %6545  ;;  %7096 = vmatmul.mubr.msk.f32.vlgmr.msra.gmra.mxu0 %vm350_vm5, %v8176_v38  ;;  %7099 = vmatmul.mubr.msk.f32.vlgmr.msra.gmra.mxu1 %vm350_vm5, %v8183_v23 }
 0xa2f   : > { %6536 = vmatprep.mubr.f32.mxu0 %v8521_v40  ;;  %6623 = vmatprep.mubr.f32.mxu1 %v8521_v40 }
 0xa30   : > { %7100 = vmatprep.subr.msk.mxu0 %vm354_vm1, %v6465_v6  ;;  %v6548_v22 = vpop.permute.xlu0 %6547 }
 0xa31   : > { %v6549_v49 = vsel %vm939_vm7, %v6546_v5, %v6548_v22  ;;  %v6550_v50 = vsel %vm939_vm7, %v6548_v22, %v6546_v5  ;;  %7101 = vmatpush1.msk.msra.mxu0 %vm354_vm1, %v6464_v44 }
 0xa32   : > { %v6551_v58 = vmul.f32 %v6549_v49, %v7404_v2  ;;  %v6552_v38 = vmul.f32 %v6550_v50, %v7413_v8  ;;  %v6633_v23 = vpop.permute.xlu1 %6632  ;;  %7102 = vmatmul.mubr.msk.f32.vlgmr.msra.gmra.mxu0 %vm350_vm5, %v8532_v37 }
 0xa33   : > { %6710 = vmatprep.mubr.f32.mxu0 %v8521_v40 }
 0xa34   : > { %v6635_v20 = vpop.permute.xlu0 %6634  ;;  %7103 = vmatprep.subr.msk.mxu1 %vm354_vm1, %v6552_v38 }
 0xa35   : > { %v6636_v52 = vsel %vm1040_vm8, %v6633_v23, %v6635_v20  ;;  %v6637_v28 = vsel %vm1040_vm8, %v6635_v20, %v6633_v23  ;;  %7104 = vmatpush1.msk.msra.mxu1 %vm354_vm1, %v6551_v58 }
 0xa36   : > { %v6638_v2 = vmul.f32 %v6636_v52, %v7437_v21  ;;  %v6639_v8 = vmul.f32 %v6637_v28, %v7445_v25  ;;  %7105 = vmatmul.mubr.msk.f32.vlgmr.msra.gmra.mxu1 %vm350_vm5, %v8533_v1  ;;  %v6720_v27 = vpop.permute.xlu1 %6719 }
 0xa37   : > { %6797 = vmatprep.mubr.f32.mxu1 %v8521_v40  ;;  %v8535_v40 = vld [vmem:[#allocation5_spill] sm:$0xff] }
 0xa38   : > { %7106 = vmatprep.subr.msk.mxu0 %vm354_vm1, %v6639_v8  ;;  %v6722_v34 = vpop.permute.xlu0 %6721 }
 0xa39   : > { %v6723_v11 = vsel %vm1141_vm9, %v6720_v27, %v6722_v34  ;;  %v6724_v45 = vsel %vm1141_vm9, %v6722_v34, %v6720_v27  ;;  %7107 = vmatpush1.msk.msra.mxu0 %vm354_vm1, %v6638_v2 }
 0xa3a   : > { %v6725_v21 = vmul.f32 %v8056_v53, %v6723_v11  ;;  %v6726_v25 = vmul.f32 %v8062_v55, %v6724_v45  ;;  %7108 = vmatmul.mubr.msk.f32.vlgmr.msra.gmra.mxu0 %vm350_vm5, %v8534_v35  ;;  %v6027_v53 = vadd.f32 %v6023_v41, %v8537_v51 }
 0xa3c   : > { %7109 = vmatprep.subr.msk.mxu1 %vm354_vm1, %v6726_v25 }
 0xa3d   : > { %7110 = vmatpush1.msk.msra.mxu1 %vm354_vm1, %v6725_v21 }
 0xa3e   : > { %7111 = vmatmul.mubr.msk.f32.vlgmr.msra.gmra.mxu1 %vm350_vm5, %v8535_v40 }
 0xae2   : > { %v6109_v9 = vpop.f32.mrf.mxu1 }
 0xae3   : > { %v6114_v55 = vadd.f32 %v6109_v9, %v6027_v53 }
 0xae4   : > { %v6111_v46 = vpop.f32.mrf.mxu1 }
 0xae5   : > { %v6115_v3 = vadd.f32 %v6111_v46, %v6028_v63 }
 0xae6   : > { %v6196_v62 = vpop.f32.mrf.mxu0 }
 0xae7   : > { %v6201_v0 = vadd.f32 %v6196_v62, %v6114_v55 }
 0xae8   : > { %v6198_v54 = vpop.f32.mrf.mxu0 }
 0xae9   : > { %v6202_v43 = vadd.f32 %v6198_v54, %v6115_v3 }
 0xaea   : > { %v6283_v24 = vpop.f32.mrf.mxu1 }
 0xaeb   : > { %v6288_v4 = vadd.f32 %v6283_v24, %v6201_v0 }
 0xaec   : > { %v6285_v33 = vpop.f32.mrf.mxu1 }
 0xaed   : > { %v6289_v7 = vadd.f32 %v6285_v33, %v6202_v43 }
 0xaee   : > { %v6370_v26 = vpop.f32.mrf.mxu0  ;;  %v6451_v57 = vpop.f32.mrf.mxu1 }
 0xaef   : > { %v6375_v60 = vadd.f32 %v6370_v26, %v6288_v4 }
 0xaf0   : > { %v6372_v47 = vpop.f32.mrf.mxu0  ;;  %v6453_v30 = vpop.f32.mrf.mxu1 }
 0xaf1   : > { %v6376_v29 = vadd.f32 %v6372_v47, %v6289_v7  ;;  %v6456_v18 = vadd.f32 %v6451_v57, %v6375_v60 }
 0xaf2   : > { %v6538_v56 = vpop.f32.mrf.mxu0 }
 0xaf3   : > { %v6457_v61 = vadd.f32 %v6453_v30, %v6376_v29  ;;  %v6543_v14 = vadd.f32 %v6538_v56, %v6456_v18 }
 0xaf4   : > { %v6540_v42 = vpop.f32.mrf.mxu0 }
 0xaf5   : > { %v6544_v31 = vadd.f32 %v6540_v42, %v6457_v61 }
 0xaf6   : > { %v6625_v17 = vpop.f32.mrf.mxu1 }
 0xaf7   : > { %v6630_v32 = vadd.f32 %v6625_v17, %v6543_v14 }
 0xaf8   : > { %v6627_v59 = vpop.f32.mrf.mxu1 }
 0xaf9   : > { %v6631_v48 = vadd.f32 %v6627_v59, %v6544_v31 }
 0xafa   : > { %v6712_v19 = vpop.f32.mrf.mxu0 }
 0xafb   : > { %v6717_v16 = vadd.f32 %v6712_v19, %v6630_v32 }
 0xafc   : > { %v6714_v39 = vpop.f32.mrf.mxu0 }
 0xafd   : > { %v6718_v36 = vadd.f32 %v6714_v39, %v6631_v48 }
 0xafe   : > { %v6799_v15 = vpop.f32.mrf.mxu1 }
 0xaff   : > { %v6804_v44 = vadd.f32 %v6799_v15, %v6717_v16 }
 0xb00   : > { %v6801_v6 = vpop.f32.mrf.mxu1 }
 0xb01   : > { %v6805_v5 = vadd.f32 %v6801_v6, %v6718_v36  ;;  %v6806_v22 = vmul.f32 0.25, %v6804_v44 }
 0xb03   : > { %v6807_v49 = vmul.f32 0.25, %v6805_v5 }
 0xb05   : > { %v6810_v50 = vcombine.low %v6806_v22, %v6807_v49 }
 0xb07   : > { %v6812_v58 = vadd.f32 %v6810_v50, %v8256_v13 }
 0xb09   : > { %6813 = vst [vmem:[%s305_s13] sm:$0xff] %v6812_v58 }
 0xb0a PF: > { %s18_s27 = sadd.s32 1, %s7163_s27  }
 0xb0b   : > { %p15_p4 = scmp.ge.s32.totalorder %s18_s27, 4  }
 0xb0d   :  { %17 = sbr.rel (!%p15_p4) target bundleno = 1 (0x1), region = 98 }

</bundles_post_ra>
